<compile_context>
chip_gen: v6e
topology: v6e:2x2x1
jax: 0.10.0
libtpu: 0.0.40
codegen_flags: <defaults>
</compile_context>

<pallas_src>
import jax
import jax.numpy as jnp
from jax import lax
from jax.experimental import pallas as pl
from jax.experimental.pallas import tpu as pltpu


def _leaky(x):
    # LeakyReLU(0.1) -- the reference module explicitly uses negative_slope=0.1.
    return jnp.maximum(x, 0.1 * x)


# Weight argument order shared by the kernel signature and the wrapper.
_WEIGHT_KEYS = (
    'wxr', 'wxz', 'wxn',          # GRU input(x) weights per gate      (D, H)
    'wtr', 'wtz', 'wtn',          # GRU input(t_diff) weights per gate (1, H)
    'whr', 'whz', 'whn',          # GRU hidden weights per gate        (H, H)
    'bir', 'biz', 'bin',          # GRU input biases per gate          (1, H)
    'bhr', 'bhz', 'bhn',          # GRU hidden biases per gate         (1, H)
    'wlm', 'blm', 'wlv', 'blv',   # hidden2latent split into mean / log-var halves
    'w1z', 'w1t', 'b1', 'g1', 'be1',   # MLPODEF layer 1 (Linear(L+1,H) + LayerNorm(H))
    'w2', 'b2', 'g2', 'be2',           # MLPODEF layer 2 (Linear(H,L) + LayerNorm(L))
    'wl2h', 'bl2h', 'wh2o', 'bh2o',    # decoder head: latent2hidden, hidden2output
)


# --------------------------------------------------------------------------------------
# Fused ODEVAE forward kernel (encoder + latent ODE decoder + output head).
# All operands are whole-array VMEM resident; no grid, no scratch, single invocation.
# --------------------------------------------------------------------------------------
def odevae_kernel(
    xf_ref, tdf_ref, tall_ref,
    wxr_ref, wxz_ref, wxn_ref,
    wtr_ref, wtz_ref, wtn_ref,
    whr_ref, whz_ref, whn_ref,
    bir_ref, biz_ref, bin_ref,
    bhr_ref, bhz_ref, bhn_ref,
    wlm_ref, blm_ref, wlv_ref, blv_ref,
    w1z_ref, w1t_ref, b1_ref, g1_ref, be1_ref,
    w2_ref, b2_ref, g2_ref, be2_ref,
    wl2h_ref, bl2h_ref, wh2o_ref, bh2o_ref,
    xs_ref, zs_ref, mu_ref, lv_ref,
):
    f32 = jnp.float32
    T_all, B, _ = tall_ref.shape
    T_obs = xf_ref.shape[0] // B
    H = whr_ref.shape[0]

    # ================= Encoder: GRU over the time-reversed (x, dt) sequence ===========
    xf = xf_ref[...]                      # (T_obs*B, D)
    tdf = tdf_ref[...]                    # (T_obs*B, 1)

    # Hoisted input projections: one batched matmul per gate covering every timestep,
    # so the serial recurrence only pays for the tiny h @ W_h* matmuls.
    gi_r = (jnp.dot(xf, wxr_ref[...], preferred_element_type=f32)
            + tdf * wtr_ref[...] + bir_ref[...])             # (T_obs*B, H)
    gi_z = (jnp.dot(xf, wxz_ref[...], preferred_element_type=f32)
            + tdf * wtz_ref[...] + biz_ref[...])
    gi_n = (jnp.dot(xf, wxn_ref[...], preferred_element_type=f32)
            + tdf * wtn_ref[...] + bin_ref[...])

    whr = whr_ref[...]; whz = whz_ref[...]; whn = whn_ref[...]
    bhr = bhr_ref[...]; bhz = bhz_ref[...]; bhn = bhn_ref[...]

    # Fully statically unrolled GRU recurrence (PyTorch gate order r, z, n). Indices are
    # compile-time constants, so every gate slice is a static, lane-aligned access.
    h = jnp.zeros((B, H), f32)
    for i in range(T_obs):
        j = T_obs - 1 - i                 # torch.flip: consume the sequence in reverse
        rows = slice(j * B, (j + 1) * B)
        r = jax.nn.sigmoid(gi_r[rows] + jnp.dot(h, whr, preferred_element_type=f32) + bhr)
        u = jax.nn.sigmoid(gi_z[rows] + jnp.dot(h, whz, preferred_element_type=f32) + bhz)
        n = jnp.tanh(gi_n[rows] + r * (jnp.dot(h, whn, preferred_element_type=f32) + bhn))
        h = (1.0 - u) * n + u * h

    h0 = _leaky(h)
    z0_mean = jnp.dot(h0, wlm_ref[...], preferred_element_type=f32) + blm_ref[...]
    z0_lvar = jnp.dot(h0, wlv_ref[...], preferred_element_type=f32) + blv_ref[...]
    mu_ref[...] = z0_mean
    lv_ref[...] = z0_lvar

    # ================= Decoder: explicit-Euler latent ODE ==============================
    w1z = w1z_ref[...]; w1t = w1t_ref[...]; b1 = b1_ref[...]
    g1 = g1_ref[...]; be1 = be1_ref[...]
    w2 = w2_ref[...]; b2 = b2_ref[...]; g2 = g2_ref[...]; be2 = be2_ref[...]

    def layernorm(v, g, b):
        mu = jnp.mean(v, axis=-1, keepdims=True)
        var = jnp.mean((v - mu) ** 2, axis=-1, keepdims=True)
        return (v - mu) * lax.rsqrt(var + 1e-5) * g + b

    # Statically unrolled Euler loop; only the latent update lives on the serial chain.
    # z stays in registers/VMEM the whole time (no HBM round trip through z0).
    z = z0_mean
    for i in range(T_all):
        t_left = tall_ref[i - 1] if i > 0 else jnp.zeros((B, 1), f32)   # ts_all[i]
        dt = tall_ref[i] - t_left
        # MLPODEF.forward: cat([z, t], -1) folded into z @ w1z + t * w1t.
        a1 = jnp.dot(z, w1z, preferred_element_type=f32) + t_left * w1t + b1
        a1 = _leaky(layernorm(a1, g1, be1))
        fz = jnp.dot(a1, w2, preferred_element_type=f32) + b2
        fz = _leaky(layernorm(fz, g2, be2))
        # TODO(synk): ode_solver_factory's default solver is not pinned by the snippet;
        # a single explicit-Euler step per output interval is used here.
        z = z + dt * fz
        zs_ref[i * B:(i + 1) * B, :] = z          # static VMEM store; HBM DMA happens once

    # Hoisted output head: two batched matmuls over all T_all*B latents, each written
    # with a single whole-array store (instead of 2*T_all tiny matmuls + per-step stores).
    zs = zs_ref[...]                                             # (T_all*B, L)
    hd = _leaky(jnp.dot(zs, wl2h_ref[...], preferred_element_type=f32) + bl2h_ref[...])
    xs_ref[...] = jnp.dot(hd, wh2o_ref[...], preferred_element_type=f32) + bh2o_ref[...]


# --------------------------------------------------------------------------------------
# ODEVAE forward (generate=False path: z0 = z0_mean, no reparameterization sampling).
# --------------------------------------------------------------------------------------
def odevae_forward(params, x, t_obs, t_unobs=None):
    n_obs = t_obs.shape[0]
    t_all = jnp.concatenate([t_obs, t_unobs], axis=0) if t_unobs is not None else t_obs

    T_obs, B, D = x.shape
    T_all = t_all.shape[0]
    L = params['w1z'].shape[0]
    O = params['wh2o'].shape[1]

    # Tiny host-side prep (a few fused XLA element-wise ops on <100 floats): the
    # first_difference of t_obs and the row-major flattening of x. The reference's
    # flipped/concatenated (T, B, D+1) GRU input is never materialized -- the kernel
    # folds the time column into a broadcast term and consumes the sequence in reverse.
    t_diff = jnp.concatenate([jnp.zeros_like(t_obs[:1]), t_obs[1:] - t_obs[:-1]], axis=0)
    xf = x.reshape(T_obs * B, D).astype(jnp.float32)
    tdf = t_diff.reshape(T_obs * B, 1).astype(jnp.float32)

    w_args = [params[k] for k in _WEIGHT_KEYS]

    xs_flat, zs_flat, z0_mean, z0_log_var = pl.pallas_call(
        odevae_kernel,
        out_shape=(
            jax.ShapeDtypeStruct((T_all * B, O), jnp.float32),   # xs (lane-packed rows)
            jax.ShapeDtypeStruct((T_all * B, L), jnp.float32),   # zs (lane-packed rows)
            jax.ShapeDtypeStruct((B, L), jnp.float32),           # z0_mean
            jax.ShapeDtypeStruct((B, L), jnp.float32),           # z0_log_var
        ),
    )(xf, tdf, t_all.astype(jnp.float32), *w_args)

    x_hat_all = xs_flat.reshape(T_all, B, O)
    z_hat_all = zs_flat.reshape(T_all, B, L)
    x_unobs_hat = x_hat_all[n_obs:]
    z_hat_hat = z_hat_all[n_obs:]
    return x_unobs_hat, x_hat_all, z0_mean, z0_log_var, z_hat_all, z_hat_hat


# --------------------------------------------------------------------------------------
# Deterministic parameter construction (synthetic, no checkpoint loading).
# Weights are generated in the PyTorch parameterization and split into the per-gate /
# per-head layout the kernel consumes.
# --------------------------------------------------------------------------------------
def init_params(key, obs_dim, hidden_dim, latent_dim):
    D, H, L = obs_dim, hidden_dim, latent_dim
    ks = jax.random.split(key, 16)

    def w(k, shape, scale=0.1):
        return (scale * jax.random.normal(k, shape)).astype(jnp.float32)

    p = {}
    # RNNEncoder: GRU(input_dim + 1, H), transposed weights (in, 3H), gate order r, z, n.
    wih = w(ks[0], (D + 1, 3 * H))
    whh = w(ks[1], (H, 3 * H))
    bih = w(ks[2], (1, 3 * H))
    bhh = w(ks[3], (1, 3 * H))
    for gi, g in enumerate('rzn'):
        sl = slice(gi * H, (gi + 1) * H)
        p[f'wx{g}'] = wih[:D, sl]          # x part of weight_ih       (D, H)
        p[f'wt{g}'] = wih[D:, sl]          # t_diff column of weight_ih (1, H)
        p[f'wh{g}'] = whh[:, sl]           # weight_hh                 (H, H)
        p[f'bi{g}'] = bih[:, sl]
        p[f'bh{g}'] = bhh[:, sl]
    # RNNEncoder: hidden2latent Linear(H, 2L), split into mean / log-var halves.
    wl = w(ks[4], (H, 2 * L))
    bl = w(ks[5], (1, 2 * L))
    p['wlm'], p['wlv'] = wl[:, :L], wl[:, L:]
    p['blm'], p['blv'] = bl[:, :L], bl[:, L:]
    # MLPODEF layer 1: Linear(L + 1, H) + LayerNorm(H); time column split off as w1t.
    w1 = w(ks[6], (L + 1, H))
    p['w1z'], p['w1t'] = w1[:L], w1[L:L + 1]
    p['b1'] = w(ks[7], (1, H))
    p['g1'] = jnp.ones((1, H), jnp.float32)
    p['be1'] = jnp.zeros((1, H), jnp.float32)
    # MLPODEF layer 2: Linear(H, L) + LayerNorm(L)
    p['w2'] = w(ks[8], (H, L))
    p['b2'] = w(ks[9], (1, L))
    p['g2'] = jnp.ones((1, L), jnp.float32)
    p['be2'] = jnp.zeros((1, L), jnp.float32)
    # NODEDecoder: latent2hidden Linear(L, H), hidden2output Linear(H, obs_dim)
    p['wl2h'] = w(ks[10], (L, H))
    p['bl2h'] = w(ks[11], (1, H))
    p['wh2o'] = w(ks[12], (H, D))
    p['bh2o'] = w(ks[13], (1, D))
    return p


if __name__ == "__main__":
    key = jax.random.PRNGKey(0)
    obs_dim, hidden_dim, latent_dim = 4, 32, 8
    B, T_obs, T_unobs = 2, 8, 4

    k_param, k_x, k_t1, k_t2 = jax.random.split(key, 4)
    params = init_params(k_param, obs_dim, hidden_dim, latent_dim)

    x = jax.random.normal(k_x, (T_obs, B, obs_dim), dtype=jnp.float32)
    # monotonically increasing observation / prediction timestamps
    t_obs = jnp.cumsum(
        0.05 + 0.1 * jnp.abs(jax.random.normal(k_t1, (T_obs, B, 1))), axis=0
    ).astype(jnp.float32)
    t_unobs = (t_obs[-1:] + jnp.cumsum(
        0.05 + 0.1 * jnp.abs(jax.random.normal(k_t2, (T_unobs, B, 1))), axis=0
    )).astype(jnp.float32)

    fwd = jax.jit(odevae_forward)
    outs = fwd(params, x, t_obs, t_unobs)
    outs = jax.block_until_ready(outs)

    x_unobs_hat, x_hat_all, z0_mean, z0_log_var, z_hat_all, z_hat_hat = outs
    assert x_unobs_hat.shape == (T_unobs, B, obs_dim)
    assert x_hat_all.shape == (T_obs + T_unobs, B, obs_dim)
    assert z0_mean.shape == (B, latent_dim) and z0_log_var.shape == (B, latent_dim)
    assert z_hat_all.shape == (T_obs + T_unobs, B, latent_dim)
    assert z_hat_hat.shape == (T_unobs, B, latent_dim)
    assert all(jnp.all(jnp.isfinite(o)) for o in outs)

    print("KERNEL_OK")
</pallas_src>

<mosaic_0001>
module attributes {stable_mosaic.version = 11 : i64} {
  func.func @odevae_kernel(%arg0: memref<16x4xf32, #tpu.memory_space<vmem>>, %arg1: memref<16x1xf32, #tpu.memory_space<vmem>>, %arg2: memref<12x2x1xf32, #tpu.memory_space<vmem>>, %arg3: memref<4x32xf32, #tpu.memory_space<vmem>>, %arg4: memref<4x32xf32, #tpu.memory_space<vmem>>, %arg5: memref<4x32xf32, #tpu.memory_space<vmem>>, %arg6: memref<1x32xf32, #tpu.memory_space<vmem>>, %arg7: memref<1x32xf32, #tpu.memory_space<vmem>>, %arg8: memref<1x32xf32, #tpu.memory_space<vmem>>, %arg9: memref<32x32xf32, #tpu.memory_space<vmem>>, %arg10: memref<32x32xf32, #tpu.memory_space<vmem>>, %arg11: memref<32x32xf32, #tpu.memory_space<vmem>>, %arg12: memref<1x32xf32, #tpu.memory_space<vmem>>, %arg13: memref<1x32xf32, #tpu.memory_space<vmem>>, %arg14: memref<1x32xf32, #tpu.memory_space<vmem>>, %arg15: memref<1x32xf32, #tpu.memory_space<vmem>>, %arg16: memref<1x32xf32, #tpu.memory_space<vmem>>, %arg17: memref<1x32xf32, #tpu.memory_space<vmem>>, %arg18: memref<32x8xf32, #tpu.memory_space<vmem>>, %arg19: memref<1x8xf32, #tpu.memory_space<vmem>>, %arg20: memref<32x8xf32, #tpu.memory_space<vmem>>, %arg21: memref<1x8xf32, #tpu.memory_space<vmem>>, %arg22: memref<8x32xf32, #tpu.memory_space<vmem>>, %arg23: memref<1x32xf32, #tpu.memory_space<vmem>>, %arg24: memref<1x32xf32, #tpu.memory_space<vmem>>, %arg25: memref<1x32xf32, #tpu.memory_space<vmem>>, %arg26: memref<1x32xf32, #tpu.memory_space<vmem>>, %arg27: memref<32x8xf32, #tpu.memory_space<vmem>>, %arg28: memref<1x8xf32, #tpu.memory_space<vmem>>, %arg29: memref<1x8xf32, #tpu.memory_space<vmem>>, %arg30: memref<1x8xf32, #tpu.memory_space<vmem>>, %arg31: memref<8x32xf32, #tpu.memory_space<vmem>>, %arg32: memref<1x32xf32, #tpu.memory_space<vmem>>, %arg33: memref<32x4xf32, #tpu.memory_space<vmem>>, %arg34: memref<1x4xf32, #tpu.memory_space<vmem>>, %arg35: memref<24x4xf32, #tpu.memory_space<vmem>>, %arg36: memref<24x8xf32, #tpu.memory_space<vmem>>, %arg37: memref<2x8xf32, #tpu.memory_space<vmem>>, %arg38: memref<2x8xf32, #tpu.memory_space<vmem>>) attributes {dimension_semantics = [], scalar_prefetch = 0 : i64, scratch_operands = 0 : i64, tpu.core_type = #tpu.core_type<tc>} {
    %c0 = arith.constant 0 : index
    %c0_0 = arith.constant 0 : index
    %0 = vector.load %arg0[%c0, %c0_0] : memref<16x4xf32, #tpu.memory_space<vmem>>, vector<16x4xf32>
    %c0_1 = arith.constant 0 : index
    %c0_2 = arith.constant 0 : index
    %1 = vector.load %arg1[%c0_1, %c0_2] : memref<16x1xf32, #tpu.memory_space<vmem>>, vector<16x1xf32>
    %c0_3 = arith.constant 0 : index
    %c0_4 = arith.constant 0 : index
    %2 = vector.load %arg3[%c0_3, %c0_4] : memref<4x32xf32, #tpu.memory_space<vmem>>, vector<4x32xf32>
    %cst = arith.constant dense<0.000000e+00> : vector<16x32xf32>
    %3 = tpu.matmul %0, %2, %cst {dimension_numbers = #tpu.dot_dimension_numbers<[1], [0], [0], [1], [0, 0, 1, 1], [], []>} : vector<16x4xf32>, vector<4x32xf32>, vector<16x32xf32> -> vector<16x32xf32>
    %c0_5 = arith.constant 0 : index
    %c0_6 = arith.constant 0 : index
    %4 = vector.load %arg6[%c0_5, %c0_6] : memref<1x32xf32, #tpu.memory_space<vmem>>, vector<1x32xf32>
    %5 = vector.broadcast %1 : vector<16x1xf32> to vector<16x32xf32>
    %6 = vector.broadcast %4 : vector<1x32xf32> to vector<16x32xf32>
    %7 = arith.mulf %5, %6 : vector<16x32xf32>
    %8 = arith.addf %3, %7 : vector<16x32xf32>
    %c0_7 = arith.constant 0 : index
    %c0_8 = arith.constant 0 : index
    %9 = vector.load %arg12[%c0_7, %c0_8] : memref<1x32xf32, #tpu.memory_space<vmem>>, vector<1x32xf32>
    %10 = vector.broadcast %9 : vector<1x32xf32> to vector<16x32xf32>
    %11 = arith.addf %8, %10 : vector<16x32xf32>
    %c0_9 = arith.constant 0 : index
    %c0_10 = arith.constant 0 : index
    %12 = vector.load %arg4[%c0_9, %c0_10] : memref<4x32xf32, #tpu.memory_space<vmem>>, vector<4x32xf32>
    %cst_11 = arith.constant dense<0.000000e+00> : vector<16x32xf32>
    %13 = tpu.matmul %0, %12, %cst_11 {dimension_numbers = #tpu.dot_dimension_numbers<[1], [0], [0], [1], [0, 0, 1, 1], [], []>} : vector<16x4xf32>, vector<4x32xf32>, vector<16x32xf32> -> vector<16x32xf32>
    %c0_12 = arith.constant 0 : index
    %c0_13 = arith.constant 0 : index
    %14 = vector.load %arg7[%c0_12, %c0_13] : memref<1x32xf32, #tpu.memory_space<vmem>>, vector<1x32xf32>
    %15 = vector.broadcast %1 : vector<16x1xf32> to vector<16x32xf32>
    %16 = vector.broadcast %14 : vector<1x32xf32> to vector<16x32xf32>
    %17 = arith.mulf %15, %16 : vector<16x32xf32>
    %18 = arith.addf %13, %17 : vector<16x32xf32>
    %c0_14 = arith.constant 0 : index
    %c0_15 = arith.constant 0 : index
    %19 = vector.load %arg13[%c0_14, %c0_15] : memref<1x32xf32, #tpu.memory_space<vmem>>, vector<1x32xf32>
    %20 = vector.broadcast %19 : vector<1x32xf32> to vector<16x32xf32>
    %21 = arith.addf %18, %20 : vector<16x32xf32>
    %c0_16 = arith.constant 0 : index
    %c0_17 = arith.constant 0 : index
    %22 = vector.load %arg5[%c0_16, %c0_17] : memref<4x32xf32, #tpu.memory_space<vmem>>, vector<4x32xf32>
    %cst_18 = arith.constant dense<0.000000e+00> : vector<16x32xf32>
    %23 = tpu.matmul %0, %22, %cst_18 {dimension_numbers = #tpu.dot_dimension_numbers<[1], [0], [0], [1], [0, 0, 1, 1], [], []>} : vector<16x4xf32>, vector<4x32xf32>, vector<16x32xf32> -> vector<16x32xf32>
    %c0_19 = arith.constant 0 : index
    %c0_20 = arith.constant 0 : index
    %24 = vector.load %arg8[%c0_19, %c0_20] : memref<1x32xf32, #tpu.memory_space<vmem>>, vector<1x32xf32>
    %25 = vector.broadcast %1 : vector<16x1xf32> to vector<16x32xf32>
    %26 = vector.broadcast %24 : vector<1x32xf32> to vector<16x32xf32>
    %27 = arith.mulf %25, %26 : vector<16x32xf32>
    %28 = arith.addf %23, %27 : vector<16x32xf32>
    %c0_21 = arith.constant 0 : index
    %c0_22 = arith.constant 0 : index
    %29 = vector.load %arg14[%c0_21, %c0_22] : memref<1x32xf32, #tpu.memory_space<vmem>>, vector<1x32xf32>
    %30 = vector.broadcast %29 : vector<1x32xf32> to vector<16x32xf32>
    %31 = arith.addf %28, %30 : vector<16x32xf32>
    %c0_23 = arith.constant 0 : index
    %c0_24 = arith.constant 0 : index
    %32 = vector.load %arg9[%c0_23, %c0_24] : memref<32x32xf32, #tpu.memory_space<vmem>>, vector<32x32xf32>
    %c0_25 = arith.constant 0 : index
    %c0_26 = arith.constant 0 : index
    %33 = vector.load %arg10[%c0_25, %c0_26] : memref<32x32xf32, #tpu.memory_space<vmem>>, vector<32x32xf32>
    %c0_27 = arith.constant 0 : index
    %c0_28 = arith.constant 0 : index
    %34 = vector.load %arg11[%c0_27, %c0_28] : memref<32x32xf32, #tpu.memory_space<vmem>>, vector<32x32xf32>
    %c0_29 = arith.constant 0 : index
    %c0_30 = arith.constant 0 : index
    %35 = vector.load %arg15[%c0_29, %c0_30] : memref<1x32xf32, #tpu.memory_space<vmem>>, vector<1x32xf32>
    %c0_31 = arith.constant 0 : index
    %c0_32 = arith.constant 0 : index
    %36 = vector.load %arg16[%c0_31, %c0_32] : memref<1x32xf32, #tpu.memory_space<vmem>>, vector<1x32xf32>
    %c0_33 = arith.constant 0 : index
    %c0_34 = arith.constant 0 : index
    %37 = vector.load %arg17[%c0_33, %c0_34] : memref<1x32xf32, #tpu.memory_space<vmem>>, vector<1x32xf32>
    %cst_35 = arith.constant 0.000000e+00 : f32
    %38 = vector.broadcast %cst_35 : f32 to vector<2x32xf32>
    %39 = vector.extract_strided_slice %11 {offsets = [14, 0], sizes = [2, 32], strides = [1, 1]} : vector<16x32xf32> to vector<2x32xf32>
    %cst_36 = arith.constant dense<0.000000e+00> : vector<2x32xf32>
    %40 = tpu.matmul %38, %32, %cst_36 {dimension_numbers = #tpu.dot_dimension_numbers<[1], [0], [0], [1], [0, 0, 1, 1], [], []>} : vector<2x32xf32>, vector<32x32xf32>, vector<2x32xf32> -> vector<2x32xf32>
    %41 = arith.addf %39, %40 : vector<2x32xf32>
    %42 = vector.broadcast %35 : vector<1x32xf32> to vector<2x32xf32>
    %43 = arith.addf %41, %42 : vector<2x32xf32>
    %44 = arith.negf %43 : vector<2x32xf32>
    %45 = math.exp %44 : vector<2x32xf32>
    %cst_37 = arith.constant 1.000000e+00 : f32
    %46 = vector.broadcast %cst_37 : f32 to vector<2x32xf32>
    %47 = arith.addf %46, %45 : vector<2x32xf32>
    %48 = arith.divf %46, %47 : vector<2x32xf32>
    %49 = vector.extract_strided_slice %21 {offsets = [14, 0], sizes = [2, 32], strides = [1, 1]} : vector<16x32xf32> to vector<2x32xf32>
    %cst_38 = arith.constant dense<0.000000e+00> : vector<2x32xf32>
    %50 = tpu.matmul %38, %33, %cst_38 {dimension_numbers = #tpu.dot_dimension_numbers<[1], [0], [0], [1], [0, 0, 1, 1], [], []>} : vector<2x32xf32>, vector<32x32xf32>, vector<2x32xf32> -> vector<2x32xf32>
    %51 = arith.addf %49, %50 : vector<2x32xf32>
    %52 = vector.broadcast %36 : vector<1x32xf32> to vector<2x32xf32>
    %53 = arith.addf %51, %52 : vector<2x32xf32>
    %54 = arith.negf %53 : vector<2x32xf32>
    %55 = math.exp %54 : vector<2x32xf32>
    %cst_39 = arith.constant 1.000000e+00 : f32
    %56 = vector.broadcast %cst_39 : f32 to vector<2x32xf32>
    %57 = arith.addf %56, %55 : vector<2x32xf32>
    %58 = arith.divf %56, %57 : vector<2x32xf32>
    %59 = vector.extract_strided_slice %31 {offsets = [14, 0], sizes = [2, 32], strides = [1, 1]} : vector<16x32xf32> to vector<2x32xf32>
    %cst_40 = arith.constant dense<0.000000e+00> : vector<2x32xf32>
    %60 = tpu.matmul %38, %34, %cst_40 {dimension_numbers = #tpu.dot_dimension_numbers<[1], [0], [0], [1], [0, 0, 1, 1], [], []>} : vector<2x32xf32>, vector<32x32xf32>, vector<2x32xf32> -> vector<2x32xf32>
    %61 = vector.broadcast %37 : vector<1x32xf32> to vector<2x32xf32>
    %62 = arith.addf %60, %61 : vector<2x32xf32>
    %63 = arith.mulf %48, %62 : vector<2x32xf32>
    %64 = arith.addf %59, %63 : vector<2x32xf32>
    %65 = math.tanh %64 : vector<2x32xf32>
    %cst_41 = arith.constant 1.000000e+00 : f32
    %66 = vector.broadcast %cst_41 : f32 to vector<2x32xf32>
    %67 = arith.subf %66, %58 : vector<2x32xf32>
    %68 = arith.mulf %67, %65 : vector<2x32xf32>
    %69 = arith.mulf %58, %38 : vector<2x32xf32>
    %70 = arith.addf %68, %69 : vector<2x32xf32>
    %71 = vector.extract_strided_slice %11 {offsets = [12, 0], sizes = [2, 32], strides = [1, 1]} : vector<16x32xf32> to vector<2x32xf32>
    %cst_42 = arith.constant dense<0.000000e+00> : vector<2x32xf32>
    %72 = tpu.matmul %70, %32, %cst_42 {dimension_numbers = #tpu.dot_dimension_numbers<[1], [0], [0], [1], [0, 0, 1, 1], [], []>} : vector<2x32xf32>, vector<32x32xf32>, vector<2x32xf32> -> vector<2x32xf32>
    %73 = arith.addf %71, %72 : vector<2x32xf32>
    %74 = vector.broadcast %35 : vector<1x32xf32> to vector<2x32xf32>
    %75 = arith.addf %73, %74 : vector<2x32xf32>
    %76 = arith.negf %75 : vector<2x32xf32>
    %77 = math.exp %76 : vector<2x32xf32>
    %cst_43 = arith.constant 1.000000e+00 : f32
    %78 = vector.broadcast %cst_43 : f32 to vector<2x32xf32>
    %79 = arith.addf %78, %77 : vector<2x32xf32>
    %80 = arith.divf %78, %79 : vector<2x32xf32>
    %81 = vector.extract_strided_slice %21 {offsets = [12, 0], sizes = [2, 32], strides = [1, 1]} : vector<16x32xf32> to vector<2x32xf32>
    %cst_44 = arith.constant dense<0.000000e+00> : vector<2x32xf32>
    %82 = tpu.matmul %70, %33, %cst_44 {dimension_numbers = #tpu.dot_dimension_numbers<[1], [0], [0], [1], [0, 0, 1, 1], [], []>} : vector<2x32xf32>, vector<32x32xf32>, vector<2x32xf32> -> vector<2x32xf32>
    %83 = arith.addf %81, %82 : vector<2x32xf32>
    %84 = vector.broadcast %36 : vector<1x32xf32> to vector<2x32xf32>
    %85 = arith.addf %83, %84 : vector<2x32xf32>
    %86 = arith.negf %85 : vector<2x32xf32>
    %87 = math.exp %86 : vector<2x32xf32>
    %cst_45 = arith.constant 1.000000e+00 : f32
    %88 = vector.broadcast %cst_45 : f32 to vector<2x32xf32>
    %89 = arith.addf %88, %87 : vector<2x32xf32>
    %90 = arith.divf %88, %89 : vector<2x32xf32>
    %91 = vector.extract_strided_slice %31 {offsets = [12, 0], sizes = [2, 32], strides = [1, 1]} : vector<16x32xf32> to vector<2x32xf32>
    %cst_46 = arith.constant dense<0.000000e+00> : vector<2x32xf32>
    %92 = tpu.matmul %70, %34, %cst_46 {dimension_numbers = #tpu.dot_dimension_numbers<[1], [0], [0], [1], [0, 0, 1, 1], [], []>} : vector<2x32xf32>, vector<32x32xf32>, vector<2x32xf32> -> vector<2x32xf32>
    %93 = vector.broadcast %37 : vector<1x32xf32> to vector<2x32xf32>
    %94 = arith.addf %92, %93 : vector<2x32xf32>
    %95 = arith.mulf %80, %94 : vector<2x32xf32>
    %96 = arith.addf %91, %95 : vector<2x32xf32>
    %97 = math.tanh %96 : vector<2x32xf32>
    %cst_47 = arith.constant 1.000000e+00 : f32
    %98 = vector.broadcast %cst_47 : f32 to vector<2x32xf32>
    %99 = arith.subf %98, %90 : vector<2x32xf32>
    %100 = arith.mulf %99, %97 : vector<2x32xf32>
    %101 = arith.mulf %90, %70 : vector<2x32xf32>
    %102 = arith.addf %100, %101 : vector<2x32xf32>
    %103 = vector.extract_strided_slice %11 {offsets = [10, 0], sizes = [2, 32], strides = [1, 1]} : vector<16x32xf32> to vector<2x32xf32>
    %cst_48 = arith.constant dense<0.000000e+00> : vector<2x32xf32>
    %104 = tpu.matmul %102, %32, %cst_48 {dimension_numbers = #tpu.dot_dimension_numbers<[1], [0], [0], [1], [0, 0, 1, 1], [], []>} : vector<2x32xf32>, vector<32x32xf32>, vector<2x32xf32> -> vector<2x32xf32>
    %105 = arith.addf %103, %104 : vector<2x32xf32>
    %106 = vector.broadcast %35 : vector<1x32xf32> to vector<2x32xf32>
    %107 = arith.addf %105, %106 : vector<2x32xf32>
    %108 = arith.negf %107 : vector<2x32xf32>
    %109 = math.exp %108 : vector<2x32xf32>
    %cst_49 = arith.constant 1.000000e+00 : f32
    %110 = vector.broadcast %cst_49 : f32 to vector<2x32xf32>
    %111 = arith.addf %110, %109 : vector<2x32xf32>
    %112 = arith.divf %110, %111 : vector<2x32xf32>
    %113 = vector.extract_strided_slice %21 {offsets = [10, 0], sizes = [2, 32], strides = [1, 1]} : vector<16x32xf32> to vector<2x32xf32>
    %cst_50 = arith.constant dense<0.000000e+00> : vector<2x32xf32>
    %114 = tpu.matmul %102, %33, %cst_50 {dimension_numbers = #tpu.dot_dimension_numbers<[1], [0], [0], [1], [0, 0, 1, 1], [], []>} : vector<2x32xf32>, vector<32x32xf32>, vector<2x32xf32> -> vector<2x32xf32>
    %115 = arith.addf %113, %114 : vector<2x32xf32>
    %116 = vector.broadcast %36 : vector<1x32xf32> to vector<2x32xf32>
    %117 = arith.addf %115, %116 : vector<2x32xf32>
    %118 = arith.negf %117 : vector<2x32xf32>
    %119 = math.exp %118 : vector<2x32xf32>
    %cst_51 = arith.constant 1.000000e+00 : f32
    %120 = vector.broadcast %cst_51 : f32 to vector<2x32xf32>
    %121 = arith.addf %120, %119 : vector<2x32xf32>
    %122 = arith.divf %120, %121 : vector<2x32xf32>
    %123 = vector.extract_strided_slice %31 {offsets = [10, 0], sizes = [2, 32], strides = [1, 1]} : vector<16x32xf32> to vector<2x32xf32>
    %cst_52 = arith.constant dense<0.000000e+00> : vector<2x32xf32>
    %124 = tpu.matmul %102, %34, %cst_52 {dimension_numbers = #tpu.dot_dimension_numbers<[1], [0], [0], [1], [0, 0, 1, 1], [], []>} : vector<2x32xf32>, vector<32x32xf32>, vector<2x32xf32> -> vector<2x32xf32>
    %125 = vector.broadcast %37 : vector<1x32xf32> to vector<2x32xf32>
    %126 = arith.addf %124, %125 : vector<2x32xf32>
    %127 = arith.mulf %112, %126 : vector<2x32xf32>
    %128 = arith.addf %123, %127 : vector<2x32xf32>
    %129 = math.tanh %128 : vector<2x32xf32>
    %cst_53 = arith.constant 1.000000e+00 : f32
    %130 = vector.broadcast %cst_53 : f32 to vector<2x32xf32>
    %131 = arith.subf %130, %122 : vector<2x32xf32>
    %132 = arith.mulf %131, %129 : vector<2x32xf32>
    %133 = arith.mulf %122, %102 : vector<2x32xf32>
    %134 = arith.addf %132, %133 : vector<2x32xf32>
    %135 = vector.extract_strided_slice %11 {offsets = [8, 0], sizes = [2, 32], strides = [1, 1]} : vector<16x32xf32> to vector<2x32xf32>
    %cst_54 = arith.constant dense<0.000000e+00> : vector<2x32xf32>
    %136 = tpu.matmul %134, %32, %cst_54 {dimension_numbers = #tpu.dot_dimension_numbers<[1], [0], [0], [1], [0, 0, 1, 1], [], []>} : vector<2x32xf32>, vector<32x32xf32>, vector<2x32xf32> -> vector<2x32xf32>
    %137 = arith.addf %135, %136 : vector<2x32xf32>
    %138 = vector.broadcast %35 : vector<1x32xf32> to vector<2x32xf32>
    %139 = arith.addf %137, %138 : vector<2x32xf32>
    %140 = arith.negf %139 : vector<2x32xf32>
    %141 = math.exp %140 : vector<2x32xf32>
    %cst_55 = arith.constant 1.000000e+00 : f32
    %142 = vector.broadcast %cst_55 : f32 to vector<2x32xf32>
    %143 = arith.addf %142, %141 : vector<2x32xf32>
    %144 = arith.divf %142, %143 : vector<2x32xf32>
    %145 = vector.extract_strided_slice %21 {offsets = [8, 0], sizes = [2, 32], strides = [1, 1]} : vector<16x32xf32> to vector<2x32xf32>
    %cst_56 = arith.constant dense<0.000000e+00> : vector<2x32xf32>
    %146 = tpu.matmul %134, %33, %cst_56 {dimension_numbers = #tpu.dot_dimension_numbers<[1], [0], [0], [1], [0, 0, 1, 1], [], []>} : vector<2x32xf32>, vector<32x32xf32>, vector<2x32xf32> -> vector<2x32xf32>
    %147 = arith.addf %145, %146 : vector<2x32xf32>
    %148 = vector.broadcast %36 : vector<1x32xf32> to vector<2x32xf32>
    %149 = arith.addf %147, %148 : vector<2x32xf32>
    %150 = arith.negf %149 : vector<2x32xf32>
    %151 = math.exp %150 : vector<2x32xf32>
    %cst_57 = arith.constant 1.000000e+00 : f32
    %152 = vector.broadcast %cst_57 : f32 to vector<2x32xf32>
    %153 = arith.addf %152, %151 : vector<2x32xf32>
    %154 = arith.divf %152, %153 : vector<2x32xf32>
    %155 = vector.extract_strided_slice %31 {offsets = [8, 0], sizes = [2, 32], strides = [1, 1]} : vector<16x32xf32> to vector<2x32xf32>
    %cst_58 = arith.constant dense<0.000000e+00> : vector<2x32xf32>
    %156 = tpu.matmul %134, %34, %cst_58 {dimension_numbers = #tpu.dot_dimension_numbers<[1], [0], [0], [1], [0, 0, 1, 1], [], []>} : vector<2x32xf32>, vector<32x32xf32>, vector<2x32xf32> -> vector<2x32xf32>
    %157 = vector.broadcast %37 : vector<1x32xf32> to vector<2x32xf32>
    %158 = arith.addf %156, %157 : vector<2x32xf32>
    %159 = arith.mulf %144, %158 : vector<2x32xf32>
    %160 = arith.addf %155, %159 : vector<2x32xf32>
    %161 = math.tanh %160 : vector<2x32xf32>
    %cst_59 = arith.constant 1.000000e+00 : f32
    %162 = vector.broadcast %cst_59 : f32 to vector<2x32xf32>
    %163 = arith.subf %162, %154 : vector<2x32xf32>
    %164 = arith.mulf %163, %161 : vector<2x32xf32>
    %165 = arith.mulf %154, %134 : vector<2x32xf32>
    %166 = arith.addf %164, %165 : vector<2x32xf32>
    %167 = vector.extract_strided_slice %11 {offsets = [6, 0], sizes = [2, 32], strides = [1, 1]} : vector<16x32xf32> to vector<2x32xf32>
    %cst_60 = arith.constant dense<0.000000e+00> : vector<2x32xf32>
    %168 = tpu.matmul %166, %32, %cst_60 {dimension_numbers = #tpu.dot_dimension_numbers<[1], [0], [0], [1], [0, 0, 1, 1], [], []>} : vector<2x32xf32>, vector<32x32xf32>, vector<2x32xf32> -> vector<2x32xf32>
    %169 = arith.addf %167, %168 : vector<2x32xf32>
    %170 = vector.broadcast %35 : vector<1x32xf32> to vector<2x32xf32>
    %171 = arith.addf %169, %170 : vector<2x32xf32>
    %172 = arith.negf %171 : vector<2x32xf32>
    %173 = math.exp %172 : vector<2x32xf32>
    %cst_61 = arith.constant 1.000000e+00 : f32
    %174 = vector.broadcast %cst_61 : f32 to vector<2x32xf32>
    %175 = arith.addf %174, %173 : vector<2x32xf32>
    %176 = arith.divf %174, %175 : vector<2x32xf32>
    %177 = vector.extract_strided_slice %21 {offsets = [6, 0], sizes = [2, 32], strides = [1, 1]} : vector<16x32xf32> to vector<2x32xf32>
    %cst_62 = arith.constant dense<0.000000e+00> : vector<2x32xf32>
    %178 = tpu.matmul %166, %33, %cst_62 {dimension_numbers = #tpu.dot_dimension_numbers<[1], [0], [0], [1], [0, 0, 1, 1], [], []>} : vector<2x32xf32>, vector<32x32xf32>, vector<2x32xf32> -> vector<2x32xf32>
    %179 = arith.addf %177, %178 : vector<2x32xf32>
    %180 = vector.broadcast %36 : vector<1x32xf32> to vector<2x32xf32>
    %181 = arith.addf %179, %180 : vector<2x32xf32>
    %182 = arith.negf %181 : vector<2x32xf32>
    %183 = math.exp %182 : vector<2x32xf32>
    %cst_63 = arith.constant 1.000000e+00 : f32
    %184 = vector.broadcast %cst_63 : f32 to vector<2x32xf32>
    %185 = arith.addf %184, %183 : vector<2x32xf32>
    %186 = arith.divf %184, %185 : vector<2x32xf32>
    %187 = vector.extract_strided_slice %31 {offsets = [6, 0], sizes = [2, 32], strides = [1, 1]} : vector<16x32xf32> to vector<2x32xf32>
    %cst_64 = arith.constant dense<0.000000e+00> : vector<2x32xf32>
    %188 = tpu.matmul %166, %34, %cst_64 {dimension_numbers = #tpu.dot_dimension_numbers<[1], [0], [0], [1], [0, 0, 1, 1], [], []>} : vector<2x32xf32>, vector<32x32xf32>, vector<2x32xf32> -> vector<2x32xf32>
    %189 = vector.broadcast %37 : vector<1x32xf32> to vector<2x32xf32>
    %190 = arith.addf %188, %189 : vector<2x32xf32>
    %191 = arith.mulf %176, %190 : vector<2x32xf32>
    %192 = arith.addf %187, %191 : vector<2x32xf32>
    %193 = math.tanh %192 : vector<2x32xf32>
    %cst_65 = arith.constant 1.000000e+00 : f32
    %194 = vector.broadcast %cst_65 : f32 to vector<2x32xf32>
    %195 = arith.subf %194, %186 : vector<2x32xf32>
    %196 = arith.mulf %195, %193 : vector<2x32xf32>
    %197 = arith.mulf %186, %166 : vector<2x32xf32>
    %198 = arith.addf %196, %197 : vector<2x32xf32>
    %199 = vector.extract_strided_slice %11 {offsets = [4, 0], sizes = [2, 32], strides = [1, 1]} : vector<16x32xf32> to vector<2x32xf32>
    %cst_66 = arith.constant dense<0.000000e+00> : vector<2x32xf32>
    %200 = tpu.matmul %198, %32, %cst_66 {dimension_numbers = #tpu.dot_dimension_numbers<[1], [0], [0], [1], [0, 0, 1, 1], [], []>} : vector<2x32xf32>, vector<32x32xf32>, vector<2x32xf32> -> vector<2x32xf32>
    %201 = arith.addf %199, %200 : vector<2x32xf32>
    %202 = vector.broadcast %35 : vector<1x32xf32> to vector<2x32xf32>
    %203 = arith.addf %201, %202 : vector<2x32xf32>
    %204 = arith.negf %203 : vector<2x32xf32>
    %205 = math.exp %204 : vector<2x32xf32>
    %cst_67 = arith.constant 1.000000e+00 : f32
    %206 = vector.broadcast %cst_67 : f32 to vector<2x32xf32>
    %207 = arith.addf %206, %205 : vector<2x32xf32>
    %208 = arith.divf %206, %207 : vector<2x32xf32>
    %209 = vector.extract_strided_slice %21 {offsets = [4, 0], sizes = [2, 32], strides = [1, 1]} : vector<16x32xf32> to vector<2x32xf32>
    %cst_68 = arith.constant dense<0.000000e+00> : vector<2x32xf32>
    %210 = tpu.matmul %198, %33, %cst_68 {dimension_numbers = #tpu.dot_dimension_numbers<[1], [0], [0], [1], [0, 0, 1, 1], [], []>} : vector<2x32xf32>, vector<32x32xf32>, vector<2x32xf32> -> vector<2x32xf32>
    %211 = arith.addf %209, %210 : vector<2x32xf32>
    %212 = vector.broadcast %36 : vector<1x32xf32> to vector<2x32xf32>
    %213 = arith.addf %211, %212 : vector<2x32xf32>
    %214 = arith.negf %213 : vector<2x32xf32>
    %215 = math.exp %214 : vector<2x32xf32>
    %cst_69 = arith.constant 1.000000e+00 : f32
    %216 = vector.broadcast %cst_69 : f32 to vector<2x32xf32>
    %217 = arith.addf %216, %215 : vector<2x32xf32>
    %218 = arith.divf %216, %217 : vector<2x32xf32>
    %219 = vector.extract_strided_slice %31 {offsets = [4, 0], sizes = [2, 32], strides = [1, 1]} : vector<16x32xf32> to vector<2x32xf32>
    %cst_70 = arith.constant dense<0.000000e+00> : vector<2x32xf32>
    %220 = tpu.matmul %198, %34, %cst_70 {dimension_numbers = #tpu.dot_dimension_numbers<[1], [0], [0], [1], [0, 0, 1, 1], [], []>} : vector<2x32xf32>, vector<32x32xf32>, vector<2x32xf32> -> vector<2x32xf32>
    %221 = vector.broadcast %37 : vector<1x32xf32> to vector<2x32xf32>
    %222 = arith.addf %220, %221 : vector<2x32xf32>
    %223 = arith.mulf %208, %222 : vector<2x32xf32>
    %224 = arith.addf %219, %223 : vector<2x32xf32>
    %225 = math.tanh %224 : vector<2x32xf32>
    %cst_71 = arith.constant 1.000000e+00 : f32
    %226 = vector.broadcast %cst_71 : f32 to vector<2x32xf32>
    %227 = arith.subf %226, %218 : vector<2x32xf32>
    %228 = arith.mulf %227, %225 : vector<2x32xf32>
    %229 = arith.mulf %218, %198 : vector<2x32xf32>
    %230 = arith.addf %228, %229 : vector<2x32xf32>
    %231 = vector.extract_strided_slice %11 {offsets = [2, 0], sizes = [2, 32], strides = [1, 1]} : vector<16x32xf32> to vector<2x32xf32>
    %cst_72 = arith.constant dense<0.000000e+00> : vector<2x32xf32>
    %232 = tpu.matmul %230, %32, %cst_72 {dimension_numbers = #tpu.dot_dimension_numbers<[1], [0], [0], [1], [0, 0, 1, 1], [], []>} : vector<2x32xf32>, vector<32x32xf32>, vector<2x32xf32> -> vector<2x32xf32>
    %233 = arith.addf %231, %232 : vector<2x32xf32>
    %234 = vector.broadcast %35 : vector<1x32xf32> to vector<2x32xf32>
    %235 = arith.addf %233, %234 : vector<2x32xf32>
    %236 = arith.negf %235 : vector<2x32xf32>
    %237 = math.exp %236 : vector<2x32xf32>
    %cst_73 = arith.constant 1.000000e+00 : f32
    %238 = vector.broadcast %cst_73 : f32 to vector<2x32xf32>
    %239 = arith.addf %238, %237 : vector<2x32xf32>
    %240 = arith.divf %238, %239 : vector<2x32xf32>
    %241 = vector.extract_strided_slice %21 {offsets = [2, 0], sizes = [2, 32], strides = [1, 1]} : vector<16x32xf32> to vector<2x32xf32>
    %cst_74 = arith.constant dense<0.000000e+00> : vector<2x32xf32>
    %242 = tpu.matmul %230, %33, %cst_74 {dimension_numbers = #tpu.dot_dimension_numbers<[1], [0], [0], [1], [0, 0, 1, 1], [], []>} : vector<2x32xf32>, vector<32x32xf32>, vector<2x32xf32> -> vector<2x32xf32>
    %243 = arith.addf %241, %242 : vector<2x32xf32>
    %244 = vector.broadcast %36 : vector<1x32xf32> to vector<2x32xf32>
    %245 = arith.addf %243, %244 : vector<2x32xf32>
    %246 = arith.negf %245 : vector<2x32xf32>
    %247 = math.exp %246 : vector<2x32xf32>
    %cst_75 = arith.constant 1.000000e+00 : f32
    %248 = vector.broadcast %cst_75 : f32 to vector<2x32xf32>
    %249 = arith.addf %248, %247 : vector<2x32xf32>
    %250 = arith.divf %248, %249 : vector<2x32xf32>
    %251 = vector.extract_strided_slice %31 {offsets = [2, 0], sizes = [2, 32], strides = [1, 1]} : vector<16x32xf32> to vector<2x32xf32>
    %cst_76 = arith.constant dense<0.000000e+00> : vector<2x32xf32>
    %252 = tpu.matmul %230, %34, %cst_76 {dimension_numbers = #tpu.dot_dimension_numbers<[1], [0], [0], [1], [0, 0, 1, 1], [], []>} : vector<2x32xf32>, vector<32x32xf32>, vector<2x32xf32> -> vector<2x32xf32>
    %253 = vector.broadcast %37 : vector<1x32xf32> to vector<2x32xf32>
    %254 = arith.addf %252, %253 : vector<2x32xf32>
    %255 = arith.mulf %240, %254 : vector<2x32xf32>
    %256 = arith.addf %251, %255 : vector<2x32xf32>
    %257 = math.tanh %256 : vector<2x32xf32>
    %cst_77 = arith.constant 1.000000e+00 : f32
    %258 = vector.broadcast %cst_77 : f32 to vector<2x32xf32>
    %259 = arith.subf %258, %250 : vector<2x32xf32>
    %260 = arith.mulf %259, %257 : vector<2x32xf32>
    %261 = arith.mulf %250, %230 : vector<2x32xf32>
    %262 = arith.addf %260, %261 : vector<2x32xf32>
    %263 = vector.extract_strided_slice %11 {offsets = [0, 0], sizes = [2, 32], strides = [1, 1]} : vector<16x32xf32> to vector<2x32xf32>
    %cst_78 = arith.constant dense<0.000000e+00> : vector<2x32xf32>
    %264 = tpu.matmul %262, %32, %cst_78 {dimension_numbers = #tpu.dot_dimension_numbers<[1], [0], [0], [1], [0, 0, 1, 1], [], []>} : vector<2x32xf32>, vector<32x32xf32>, vector<2x32xf32> -> vector<2x32xf32>
    %265 = arith.addf %263, %264 : vector<2x32xf32>
    %266 = vector.broadcast %35 : vector<1x32xf32> to vector<2x32xf32>
    %267 = arith.addf %265, %266 : vector<2x32xf32>
    %268 = arith.negf %267 : vector<2x32xf32>
    %269 = math.exp %268 : vector<2x32xf32>
    %cst_79 = arith.constant 1.000000e+00 : f32
    %270 = vector.broadcast %cst_79 : f32 to vector<2x32xf32>
    %271 = arith.addf %270, %269 : vector<2x32xf32>
    %272 = arith.divf %270, %271 : vector<2x32xf32>
    %273 = vector.extract_strided_slice %21 {offsets = [0, 0], sizes = [2, 32], strides = [1, 1]} : vector<16x32xf32> to vector<2x32xf32>
    %cst_80 = arith.constant dense<0.000000e+00> : vector<2x32xf32>
    %274 = tpu.matmul %262, %33, %cst_80 {dimension_numbers = #tpu.dot_dimension_numbers<[1], [0], [0], [1], [0, 0, 1, 1], [], []>} : vector<2x32xf32>, vector<32x32xf32>, vector<2x32xf32> -> vector<2x32xf32>
    %275 = arith.addf %273, %274 : vector<2x32xf32>
    %276 = vector.broadcast %36 : vector<1x32xf32> to vector<2x32xf32>
    %277 = arith.addf %275, %276 : vector<2x32xf32>
    %278 = arith.negf %277 : vector<2x32xf32>
    %279 = math.exp %278 : vector<2x32xf32>
    %cst_81 = arith.constant 1.000000e+00 : f32
    %280 = vector.broadcast %cst_81 : f32 to vector<2x32xf32>
    %281 = arith.addf %280, %279 : vector<2x32xf32>
    %282 = arith.divf %280, %281 : vector<2x32xf32>
    %283 = vector.extract_strided_slice %31 {offsets = [0, 0], sizes = [2, 32], strides = [1, 1]} : vector<16x32xf32> to vector<2x32xf32>
    %cst_82 = arith.constant dense<0.000000e+00> : vector<2x32xf32>
    %284 = tpu.matmul %262, %34, %cst_82 {dimension_numbers = #tpu.dot_dimension_numbers<[1], [0], [0], [1], [0, 0, 1, 1], [], []>} : vector<2x32xf32>, vector<32x32xf32>, vector<2x32xf32> -> vector<2x32xf32>
    %285 = vector.broadcast %37 : vector<1x32xf32> to vector<2x32xf32>
    %286 = arith.addf %284, %285 : vector<2x32xf32>
    %287 = arith.mulf %272, %286 : vector<2x32xf32>
    %288 = arith.addf %283, %287 : vector<2x32xf32>
    %289 = math.tanh %288 : vector<2x32xf32>
    %cst_83 = arith.constant 1.000000e+00 : f32
    %290 = vector.broadcast %cst_83 : f32 to vector<2x32xf32>
    %291 = arith.subf %290, %282 : vector<2x32xf32>
    %292 = arith.mulf %291, %289 : vector<2x32xf32>
    %293 = arith.mulf %282, %262 : vector<2x32xf32>
    %294 = arith.addf %292, %293 : vector<2x32xf32>
    %cst_84 = arith.constant 1.000000e-01 : f32
    %295 = vector.broadcast %cst_84 : f32 to vector<2x32xf32>
    %296 = arith.mulf %295, %294 : vector<2x32xf32>
    %297 = arith.maximumf %294, %296 : vector<2x32xf32>
    %c0_85 = arith.constant 0 : index
    %c0_86 = arith.constant 0 : index
    %298 = vector.load %arg18[%c0_85, %c0_86] : memref<32x8xf32, #tpu.memory_space<vmem>>, vector<32x8xf32>
    %cst_87 = arith.constant dense<0.000000e+00> : vector<2x8xf32>
    %299 = tpu.matmul %297, %298, %cst_87 {dimension_numbers = #tpu.dot_dimension_numbers<[1], [0], [0], [1], [0, 0, 1, 1], [], []>} : vector<2x32xf32>, vector<32x8xf32>, vector<2x8xf32> -> vector<2x8xf32>
    %c0_88 = arith.constant 0 : index
    %c0_89 = arith.constant 0 : index
    %300 = vector.load %arg19[%c0_88, %c0_89] : memref<1x8xf32, #tpu.memory_space<vmem>>, vector<1x8xf32>
    %301 = vector.broadcast %300 : vector<1x8xf32> to vector<2x8xf32>
    %302 = arith.addf %299, %301 : vector<2x8xf32>
    %c0_90 = arith.constant 0 : index
    %c0_91 = arith.constant 0 : index
    %303 = vector.load %arg20[%c0_90, %c0_91] : memref<32x8xf32, #tpu.memory_space<vmem>>, vector<32x8xf32>
    %cst_92 = arith.constant dense<0.000000e+00> : vector<2x8xf32>
    %304 = tpu.matmul %297, %303, %cst_92 {dimension_numbers = #tpu.dot_dimension_numbers<[1], [0], [0], [1], [0, 0, 1, 1], [], []>} : vector<2x32xf32>, vector<32x8xf32>, vector<2x8xf32> -> vector<2x8xf32>
    %c0_93 = arith.constant 0 : index
    %c0_94 = arith.constant 0 : index
    %305 = vector.load %arg21[%c0_93, %c0_94] : memref<1x8xf32, #tpu.memory_space<vmem>>, vector<1x8xf32>
    %306 = vector.broadcast %305 : vector<1x8xf32> to vector<2x8xf32>
    %307 = arith.addf %304, %306 : vector<2x8xf32>
    %c0_95 = arith.constant 0 : index
    %c0_96 = arith.constant 0 : index
    %308 = vector.load %arg37[%c0_95, %c0_96] : memref<2x8xf32, #tpu.memory_space<vmem>>, vector<2x8xf32>
    tpu.vector_store %arg37[%c0_95, %c0_96], %302 {strides = array<i32>} : memref<2x8xf32, #tpu.memory_space<vmem>>, vector<2x8xf32>,
    %c0_97 = arith.constant 0 : index
    %c0_98 = arith.constant 0 : index
    %309 = vector.load %arg38[%c0_97, %c0_98] : memref<2x8xf32, #tpu.memory_space<vmem>>, vector<2x8xf32>
    tpu.vector_store %arg38[%c0_97, %c0_98], %307 {strides = array<i32>} : memref<2x8xf32, #tpu.memory_space<vmem>>, vector<2x8xf32>,
    %c0_99 = arith.constant 0 : index
    %c0_100 = arith.constant 0 : index
    %310 = vector.load %arg22[%c0_99, %c0_100] : memref<8x32xf32, #tpu.memory_space<vmem>>, vector<8x32xf32>
    %c0_101 = arith.constant 0 : index
    %c0_102 = arith.constant 0 : index
    %311 = vector.load %arg23[%c0_101, %c0_102] : memref<1x32xf32, #tpu.memory_space<vmem>>, vector<1x32xf32>
    %c0_103 = arith.constant 0 : index
    %c0_104 = arith.constant 0 : index
    %312 = vector.load %arg24[%c0_103, %c0_104] : memref<1x32xf32, #tpu.memory_space<vmem>>, vector<1x32xf32>
    %c0_105 = arith.constant 0 : index
    %c0_106 = arith.constant 0 : index
    %313 = vector.load %arg25[%c0_105, %c0_106] : memref<1x32xf32, #tpu.memory_space<vmem>>, vector<1x32xf32>
    %c0_107 = arith.constant 0 : index
    %c0_108 = arith.constant 0 : index
    %314 = vector.load %arg26[%c0_107, %c0_108] : memref<1x32xf32, #tpu.memory_space<vmem>>, vector<1x32xf32>
    %c0_109 = arith.constant 0 : index
    %c0_110 = arith.constant 0 : index
    %315 = vector.load %arg27[%c0_109, %c0_110] : memref<32x8xf32, #tpu.memory_space<vmem>>, vector<32x8xf32>
    %c0_111 = arith.constant 0 : index
    %c0_112 = arith.constant 0 : index
    %316 = vector.load %arg28[%c0_111, %c0_112] : memref<1x8xf32, #tpu.memory_space<vmem>>, vector<1x8xf32>
    %c0_113 = arith.constant 0 : index
    %c0_114 = arith.constant 0 : index
    %317 = vector.load %arg29[%c0_113, %c0_114] : memref<1x8xf32, #tpu.memory_space<vmem>>, vector<1x8xf32>
    %c0_115 = arith.constant 0 : index
    %c0_116 = arith.constant 0 : index
    %318 = vector.load %arg30[%c0_115, %c0_116] : memref<1x8xf32, #tpu.memory_space<vmem>>, vector<1x8xf32>
    %cst_117 = arith.constant 0.000000e+00 : f32
    %319 = vector.broadcast %cst_117 : f32 to vector<2x1xf32>
    %c0_118 = arith.constant 0 : index
    %c0_119 = arith.constant 0 : index
    %c0_120 = arith.constant 0 : index
    %320 = vector.load %arg2[%c0_118, %c0_119, %c0_120] : memref<12x2x1xf32, #tpu.memory_space<vmem>>, vector<1x2x1xf32>
    %321 = vector.shape_cast %320 : vector<1x2x1xf32> to vector<2x1xf32>
    %322 = arith.subf %321, %319 : vector<2x1xf32>
    %cst_121 = arith.constant dense<0.000000e+00> : vector<2x32xf32>
    %323 = tpu.matmul %302, %310, %cst_121 {dimension_numbers = #tpu.dot_dimension_numbers<[1], [0], [0], [1], [0, 0, 1, 1], [], []>} : vector<2x8xf32>, vector<8x32xf32>, vector<2x32xf32> -> vector<2x32xf32>
    %324 = vector.broadcast %319 : vector<2x1xf32> to vector<2x32xf32>
    %325 = vector.broadcast %311 : vector<1x32xf32> to vector<2x32xf32>
    %326 = arith.mulf %324, %325 : vector<2x32xf32>
    %327 = arith.addf %323, %326 : vector<2x32xf32>
    %328 = vector.broadcast %312 : vector<1x32xf32> to vector<2x32xf32>
    %329 = arith.addf %327, %328 : vector<2x32xf32>
    %cst_122 = arith.constant dense<0.000000e+00> : vector<2xf32>
    %330 = vector.multi_reduction <add>, %329, %cst_122 [1] : vector<2x32xf32> to vector<2xf32>
    %331 = vector.shape_cast %330 : vector<2xf32> to vector<2x1xf32>
    %cst_123 = arith.constant 3.200000e+01 : f32
    %332 = vector.broadcast %cst_123 : f32 to vector<2x1xf32>
    %333 = arith.divf %331, %332 : vector<2x1xf32>
    %334 = vector.broadcast %333 : vector<2x1xf32> to vector<2x32xf32>
    %335 = arith.subf %329, %334 : vector<2x32xf32>
    %336 = arith.mulf %335, %335 : vector<2x32xf32>
    %cst_124 = arith.constant dense<0.000000e+00> : vector<2xf32>
    %337 = vector.multi_reduction <add>, %336, %cst_124 [1] : vector<2x32xf32> to vector<2xf32>
    %338 = vector.shape_cast %337 : vector<2xf32> to vector<2x1xf32>
    %cst_125 = arith.constant 3.200000e+01 : f32
    %339 = vector.broadcast %cst_125 : f32 to vector<2x1xf32>
    %340 = arith.divf %338, %339 : vector<2x1xf32>
    %341 = vector.broadcast %333 : vector<2x1xf32> to vector<2x32xf32>
    %342 = arith.subf %329, %341 : vector<2x32xf32>
    %cst_126 = arith.constant 9.99999974E-6 : f32
    %343 = vector.broadcast %cst_126 : f32 to vector<2x1xf32>
    %344 = arith.addf %340, %343 : vector<2x1xf32>
    %345 = math.rsqrt %344 : vector<2x1xf32>
    %346 = vector.broadcast %345 : vector<2x1xf32> to vector<2x32xf32>
    %347 = arith.mulf %342, %346 : vector<2x32xf32>
    %348 = vector.broadcast %313 : vector<1x32xf32> to vector<2x32xf32>
    %349 = arith.mulf %347, %348 : vector<2x32xf32>
    %350 = vector.broadcast %314 : vector<1x32xf32> to vector<2x32xf32>
    %351 = arith.addf %349, %350 : vector<2x32xf32>
    %cst_127 = arith.constant 1.000000e-01 : f32
    %352 = vector.broadcast %cst_127 : f32 to vector<2x32xf32>
    %353 = arith.mulf %352, %351 : vector<2x32xf32>
    %354 = arith.maximumf %351, %353 : vector<2x32xf32>
    %cst_128 = arith.constant dense<0.000000e+00> : vector<2x8xf32>
    %355 = tpu.matmul %354, %315, %cst_128 {dimension_numbers = #tpu.dot_dimension_numbers<[1], [0], [0], [1], [0, 0, 1, 1], [], []>} : vector<2x32xf32>, vector<32x8xf32>, vector<2x8xf32> -> vector<2x8xf32>
    %356 = vector.broadcast %316 : vector<1x8xf32> to vector<2x8xf32>
    %357 = arith.addf %355, %356 : vector<2x8xf32>
    %cst_129 = arith.constant dense<0.000000e+00> : vector<2xf32>
    %358 = vector.multi_reduction <add>, %357, %cst_129 [1] : vector<2x8xf32> to vector<2xf32>
    %359 = vector.shape_cast %358 : vector<2xf32> to vector<2x1xf32>
    %cst_130 = arith.constant 8.000000e+00 : f32
    %360 = vector.broadcast %cst_130 : f32 to vector<2x1xf32>
    %361 = arith.divf %359, %360 : vector<2x1xf32>
    %362 = vector.broadcast %361 : vector<2x1xf32> to vector<2x8xf32>
    %363 = arith.subf %357, %362 : vector<2x8xf32>
    %364 = arith.mulf %363, %363 : vector<2x8xf32>
    %cst_131 = arith.constant dense<0.000000e+00> : vector<2xf32>
    %365 = vector.multi_reduction <add>, %364, %cst_131 [1] : vector<2x8xf32> to vector<2xf32>
    %366 = vector.shape_cast %365 : vector<2xf32> to vector<2x1xf32>
    %cst_132 = arith.constant 8.000000e+00 : f32
    %367 = vector.broadcast %cst_132 : f32 to vector<2x1xf32>
    %368 = arith.divf %366, %367 : vector<2x1xf32>
    %369 = vector.broadcast %361 : vector<2x1xf32> to vector<2x8xf32>
    %370 = arith.subf %357, %369 : vector<2x8xf32>
    %cst_133 = arith.constant 9.99999974E-6 : f32
    %371 = vector.broadcast %cst_133 : f32 to vector<2x1xf32>
    %372 = arith.addf %368, %371 : vector<2x1xf32>
    %373 = math.rsqrt %372 : vector<2x1xf32>
    %374 = vector.broadcast %373 : vector<2x1xf32> to vector<2x8xf32>
    %375 = arith.mulf %370, %374 : vector<2x8xf32>
    %376 = vector.broadcast %317 : vector<1x8xf32> to vector<2x8xf32>
    %377 = arith.mulf %375, %376 : vector<2x8xf32>
    %378 = vector.broadcast %318 : vector<1x8xf32> to vector<2x8xf32>
    %379 = arith.addf %377, %378 : vector<2x8xf32>
    %cst_134 = arith.constant 1.000000e-01 : f32
    %380 = vector.broadcast %cst_134 : f32 to vector<2x8xf32>
    %381 = arith.mulf %380, %379 : vector<2x8xf32>
    %382 = arith.maximumf %379, %381 : vector<2x8xf32>
    %383 = vector.broadcast %322 : vector<2x1xf32> to vector<2x8xf32>
    %384 = arith.mulf %383, %382 : vector<2x8xf32>
    %385 = arith.addf %302, %384 : vector<2x8xf32>
    %c0_135 = arith.constant 0 : index
    %c0_136 = arith.constant 0 : index
    %386 = vector.load %arg36[%c0_135, %c0_136] : memref<24x8xf32, #tpu.memory_space<vmem>>, vector<2x8xf32>
    tpu.vector_store %arg36[%c0_135, %c0_136], %385 {strides = array<i32>} : memref<24x8xf32, #tpu.memory_space<vmem>>, vector<2x8xf32>,
    %c0_137 = arith.constant 0 : index
    %c0_138 = arith.constant 0 : index
    %c0_139 = arith.constant 0 : index
    %387 = vector.load %arg2[%c0_137, %c0_138, %c0_139] : memref<12x2x1xf32, #tpu.memory_space<vmem>>, vector<1x2x1xf32>
    %388 = vector.shape_cast %387 : vector<1x2x1xf32> to vector<2x1xf32>
    %c1 = arith.constant 1 : index
    %c0_140 = arith.constant 0 : index
    %c0_141 = arith.constant 0 : index
    %389 = vector.load %arg2[%c1, %c0_140, %c0_141] : memref<12x2x1xf32, #tpu.memory_space<vmem>>, vector<1x2x1xf32>
    %390 = vector.shape_cast %389 : vector<1x2x1xf32> to vector<2x1xf32>
    %391 = arith.subf %390, %388 : vector<2x1xf32>
    %cst_142 = arith.constant dense<0.000000e+00> : vector<2x32xf32>
    %392 = tpu.matmul %385, %310, %cst_142 {dimension_numbers = #tpu.dot_dimension_numbers<[1], [0], [0], [1], [0, 0, 1, 1], [], []>} : vector<2x8xf32>, vector<8x32xf32>, vector<2x32xf32> -> vector<2x32xf32>
    %393 = vector.broadcast %388 : vector<2x1xf32> to vector<2x32xf32>
    %394 = vector.broadcast %311 : vector<1x32xf32> to vector<2x32xf32>
    %395 = arith.mulf %393, %394 : vector<2x32xf32>
    %396 = arith.addf %392, %395 : vector<2x32xf32>
    %397 = vector.broadcast %312 : vector<1x32xf32> to vector<2x32xf32>
    %398 = arith.addf %396, %397 : vector<2x32xf32>
    %cst_143 = arith.constant dense<0.000000e+00> : vector<2xf32>
    %399 = vector.multi_reduction <add>, %398, %cst_143 [1] : vector<2x32xf32> to vector<2xf32>
    %400 = vector.shape_cast %399 : vector<2xf32> to vector<2x1xf32>
    %cst_144 = arith.constant 3.200000e+01 : f32
    %401 = vector.broadcast %cst_144 : f32 to vector<2x1xf32>
    %402 = arith.divf %400, %401 : vector<2x1xf32>
    %403 = vector.broadcast %402 : vector<2x1xf32> to vector<2x32xf32>
    %404 = arith.subf %398, %403 : vector<2x32xf32>
    %405 = arith.mulf %404, %404 : vector<2x32xf32>
    %cst_145 = arith.constant dense<0.000000e+00> : vector<2xf32>
    %406 = vector.multi_reduction <add>, %405, %cst_145 [1] : vector<2x32xf32> to vector<2xf32>
    %407 = vector.shape_cast %406 : vector<2xf32> to vector<2x1xf32>
    %cst_146 = arith.constant 3.200000e+01 : f32
    %408 = vector.broadcast %cst_146 : f32 to vector<2x1xf32>
    %409 = arith.divf %407, %408 : vector<2x1xf32>
    %410 = vector.broadcast %402 : vector<2x1xf32> to vector<2x32xf32>
    %411 = arith.subf %398, %410 : vector<2x32xf32>
    %cst_147 = arith.constant 9.99999974E-6 : f32
    %412 = vector.broadcast %cst_147 : f32 to vector<2x1xf32>
    %413 = arith.addf %409, %412 : vector<2x1xf32>
    %414 = math.rsqrt %413 : vector<2x1xf32>
    %415 = vector.broadcast %414 : vector<2x1xf32> to vector<2x32xf32>
    %416 = arith.mulf %411, %415 : vector<2x32xf32>
    %417 = vector.broadcast %313 : vector<1x32xf32> to vector<2x32xf32>
    %418 = arith.mulf %416, %417 : vector<2x32xf32>
    %419 = vector.broadcast %314 : vector<1x32xf32> to vector<2x32xf32>
    %420 = arith.addf %418, %419 : vector<2x32xf32>
    %cst_148 = arith.constant 1.000000e-01 : f32
    %421 = vector.broadcast %cst_148 : f32 to vector<2x32xf32>
    %422 = arith.mulf %421, %420 : vector<2x32xf32>
    %423 = arith.maximumf %420, %422 : vector<2x32xf32>
    %cst_149 = arith.constant dense<0.000000e+00> : vector<2x8xf32>
    %424 = tpu.matmul %423, %315, %cst_149 {dimension_numbers = #tpu.dot_dimension_numbers<[1], [0], [0], [1], [0, 0, 1, 1], [], []>} : vector<2x32xf32>, vector<32x8xf32>, vector<2x8xf32> -> vector<2x8xf32>
    %425 = vector.broadcast %316 : vector<1x8xf32> to vector<2x8xf32>
    %426 = arith.addf %424, %425 : vector<2x8xf32>
    %cst_150 = arith.constant dense<0.000000e+00> : vector<2xf32>
    %427 = vector.multi_reduction <add>, %426, %cst_150 [1] : vector<2x8xf32> to vector<2xf32>
    %428 = vector.shape_cast %427 : vector<2xf32> to vector<2x1xf32>
    %cst_151 = arith.constant 8.000000e+00 : f32
    %429 = vector.broadcast %cst_151 : f32 to vector<2x1xf32>
    %430 = arith.divf %428, %429 : vector<2x1xf32>
    %431 = vector.broadcast %430 : vector<2x1xf32> to vector<2x8xf32>
    %432 = arith.subf %426, %431 : vector<2x8xf32>
    %433 = arith.mulf %432, %432 : vector<2x8xf32>
    %cst_152 = arith.constant dense<0.000000e+00> : vector<2xf32>
    %434 = vector.multi_reduction <add>, %433, %cst_152 [1] : vector<2x8xf32> to vector<2xf32>
    %435 = vector.shape_cast %434 : vector<2xf32> to vector<2x1xf32>
    %cst_153 = arith.constant 8.000000e+00 : f32
    %436 = vector.broadcast %cst_153 : f32 to vector<2x1xf32>
    %437 = arith.divf %435, %436 : vector<2x1xf32>
    %438 = vector.broadcast %430 : vector<2x1xf32> to vector<2x8xf32>
    %439 = arith.subf %426, %438 : vector<2x8xf32>
    %cst_154 = arith.constant 9.99999974E-6 : f32
    %440 = vector.broadcast %cst_154 : f32 to vector<2x1xf32>
    %441 = arith.addf %437, %440 : vector<2x1xf32>
    %442 = math.rsqrt %441 : vector<2x1xf32>
    %443 = vector.broadcast %442 : vector<2x1xf32> to vector<2x8xf32>
    %444 = arith.mulf %439, %443 : vector<2x8xf32>
    %445 = vector.broadcast %317 : vector<1x8xf32> to vector<2x8xf32>
    %446 = arith.mulf %444, %445 : vector<2x8xf32>
    %447 = vector.broadcast %318 : vector<1x8xf32> to vector<2x8xf32>
    %448 = arith.addf %446, %447 : vector<2x8xf32>
    %cst_155 = arith.constant 1.000000e-01 : f32
    %449 = vector.broadcast %cst_155 : f32 to vector<2x8xf32>
    %450 = arith.mulf %449, %448 : vector<2x8xf32>
    %451 = arith.maximumf %448, %450 : vector<2x8xf32>
    %452 = vector.broadcast %391 : vector<2x1xf32> to vector<2x8xf32>
    %453 = arith.mulf %452, %451 : vector<2x8xf32>
    %454 = arith.addf %385, %453 : vector<2x8xf32>
    %c2 = arith.constant 2 : index
    %c0_156 = arith.constant 0 : index
    %455 = vector.load %arg36[%c2, %c0_156] : memref<24x8xf32, #tpu.memory_space<vmem>>, vector<2x8xf32>
    tpu.vector_store %arg36[%c2, %c0_156], %454 {strides = array<i32>} : memref<24x8xf32, #tpu.memory_space<vmem>>, vector<2x8xf32>,
    %c1_157 = arith.constant 1 : index
    %c0_158 = arith.constant 0 : index
    %c0_159 = arith.constant 0 : index
    %456 = vector.load %arg2[%c1_157, %c0_158, %c0_159] : memref<12x2x1xf32, #tpu.memory_space<vmem>>, vector<1x2x1xf32>
    %457 = vector.shape_cast %456 : vector<1x2x1xf32> to vector<2x1xf32>
    %c2_160 = arith.constant 2 : index
    %c0_161 = arith.constant 0 : index
    %c0_162 = arith.constant 0 : index
    %458 = vector.load %arg2[%c2_160, %c0_161, %c0_162] : memref<12x2x1xf32, #tpu.memory_space<vmem>>, vector<1x2x1xf32>
    %459 = vector.shape_cast %458 : vector<1x2x1xf32> to vector<2x1xf32>
    %460 = arith.subf %459, %457 : vector<2x1xf32>
    %cst_163 = arith.constant dense<0.000000e+00> : vector<2x32xf32>
    %461 = tpu.matmul %454, %310, %cst_163 {dimension_numbers = #tpu.dot_dimension_numbers<[1], [0], [0], [1], [0, 0, 1, 1], [], []>} : vector<2x8xf32>, vector<8x32xf32>, vector<2x32xf32> -> vector<2x32xf32>
    %462 = vector.broadcast %457 : vector<2x1xf32> to vector<2x32xf32>
    %463 = vector.broadcast %311 : vector<1x32xf32> to vector<2x32xf32>
    %464 = arith.mulf %462, %463 : vector<2x32xf32>
    %465 = arith.addf %461, %464 : vector<2x32xf32>
    %466 = vector.broadcast %312 : vector<1x32xf32> to vector<2x32xf32>
    %467 = arith.addf %465, %466 : vector<2x32xf32>
    %cst_164 = arith.constant dense<0.000000e+00> : vector<2xf32>
    %468 = vector.multi_reduction <add>, %467, %cst_164 [1] : vector<2x32xf32> to vector<2xf32>
    %469 = vector.shape_cast %468 : vector<2xf32> to vector<2x1xf32>
    %cst_165 = arith.constant 3.200000e+01 : f32
    %470 = vector.broadcast %cst_165 : f32 to vector<2x1xf32>
    %471 = arith.divf %469, %470 : vector<2x1xf32>
    %472 = vector.broadcast %471 : vector<2x1xf32> to vector<2x32xf32>
    %473 = arith.subf %467, %472 : vector<2x32xf32>
    %474 = arith.mulf %473, %473 : vector<2x32xf32>
    %cst_166 = arith.constant dense<0.000000e+00> : vector<2xf32>
    %475 = vector.multi_reduction <add>, %474, %cst_166 [1] : vector<2x32xf32> to vector<2xf32>
    %476 = vector.shape_cast %475 : vector<2xf32> to vector<2x1xf32>
    %cst_167 = arith.constant 3.200000e+01 : f32
    %477 = vector.broadcast %cst_167 : f32 to vector<2x1xf32>
    %478 = arith.divf %476, %477 : vector<2x1xf32>
    %479 = vector.broadcast %471 : vector<2x1xf32> to vector<2x32xf32>
    %480 = arith.subf %467, %479 : vector<2x32xf32>
    %cst_168 = arith.constant 9.99999974E-6 : f32
    %481 = vector.broadcast %cst_168 : f32 to vector<2x1xf32>
    %482 = arith.addf %478, %481 : vector<2x1xf32>
    %483 = math.rsqrt %482 : vector<2x1xf32>
    %484 = vector.broadcast %483 : vector<2x1xf32> to vector<2x32xf32>
    %485 = arith.mulf %480, %484 : vector<2x32xf32>
    %486 = vector.broadcast %313 : vector<1x32xf32> to vector<2x32xf32>
    %487 = arith.mulf %485, %486 : vector<2x32xf32>
    %488 = vector.broadcast %314 : vector<1x32xf32> to vector<2x32xf32>
    %489 = arith.addf %487, %488 : vector<2x32xf32>
    %cst_169 = arith.constant 1.000000e-01 : f32
    %490 = vector.broadcast %cst_169 : f32 to vector<2x32xf32>
    %491 = arith.mulf %490, %489 : vector<2x32xf32>
    %492 = arith.maximumf %489, %491 : vector<2x32xf32>
    %cst_170 = arith.constant dense<0.000000e+00> : vector<2x8xf32>
    %493 = tpu.matmul %492, %315, %cst_170 {dimension_numbers = #tpu.dot_dimension_numbers<[1], [0], [0], [1], [0, 0, 1, 1], [], []>} : vector<2x32xf32>, vector<32x8xf32>, vector<2x8xf32> -> vector<2x8xf32>
    %494 = vector.broadcast %316 : vector<1x8xf32> to vector<2x8xf32>
    %495 = arith.addf %493, %494 : vector<2x8xf32>
    %cst_171 = arith.constant dense<0.000000e+00> : vector<2xf32>
    %496 = vector.multi_reduction <add>, %495, %cst_171 [1] : vector<2x8xf32> to vector<2xf32>
    %497 = vector.shape_cast %496 : vector<2xf32> to vector<2x1xf32>
    %cst_172 = arith.constant 8.000000e+00 : f32
    %498 = vector.broadcast %cst_172 : f32 to vector<2x1xf32>
    %499 = arith.divf %497, %498 : vector<2x1xf32>
    %500 = vector.broadcast %499 : vector<2x1xf32> to vector<2x8xf32>
    %501 = arith.subf %495, %500 : vector<2x8xf32>
    %502 = arith.mulf %501, %501 : vector<2x8xf32>
    %cst_173 = arith.constant dense<0.000000e+00> : vector<2xf32>
    %503 = vector.multi_reduction <add>, %502, %cst_173 [1] : vector<2x8xf32> to vector<2xf32>
    %504 = vector.shape_cast %503 : vector<2xf32> to vector<2x1xf32>
    %cst_174 = arith.constant 8.000000e+00 : f32
    %505 = vector.broadcast %cst_174 : f32 to vector<2x1xf32>
    %506 = arith.divf %504, %505 : vector<2x1xf32>
    %507 = vector.broadcast %499 : vector<2x1xf32> to vector<2x8xf32>
    %508 = arith.subf %495, %507 : vector<2x8xf32>
    %cst_175 = arith.constant 9.99999974E-6 : f32
    %509 = vector.broadcast %cst_175 : f32 to vector<2x1xf32>
    %510 = arith.addf %506, %509 : vector<2x1xf32>
    %511 = math.rsqrt %510 : vector<2x1xf32>
    %512 = vector.broadcast %511 : vector<2x1xf32> to vector<2x8xf32>
    %513 = arith.mulf %508, %512 : vector<2x8xf32>
    %514 = vector.broadcast %317 : vector<1x8xf32> to vector<2x8xf32>
    %515 = arith.mulf %513, %514 : vector<2x8xf32>
    %516 = vector.broadcast %318 : vector<1x8xf32> to vector<2x8xf32>
    %517 = arith.addf %515, %516 : vector<2x8xf32>
    %cst_176 = arith.constant 1.000000e-01 : f32
    %518 = vector.broadcast %cst_176 : f32 to vector<2x8xf32>
    %519 = arith.mulf %518, %517 : vector<2x8xf32>
    %520 = arith.maximumf %517, %519 : vector<2x8xf32>
    %521 = vector.broadcast %460 : vector<2x1xf32> to vector<2x8xf32>
    %522 = arith.mulf %521, %520 : vector<2x8xf32>
    %523 = arith.addf %454, %522 : vector<2x8xf32>
    %c4 = arith.constant 4 : index
    %c0_177 = arith.constant 0 : index
    %524 = vector.load %arg36[%c4, %c0_177] : memref<24x8xf32, #tpu.memory_space<vmem>>, vector<2x8xf32>
    tpu.vector_store %arg36[%c4, %c0_177], %523 {strides = array<i32>} : memref<24x8xf32, #tpu.memory_space<vmem>>, vector<2x8xf32>,
    %c2_178 = arith.constant 2 : index
    %c0_179 = arith.constant 0 : index
    %c0_180 = arith.constant 0 : index
    %525 = vector.load %arg2[%c2_178, %c0_179, %c0_180] : memref<12x2x1xf32, #tpu.memory_space<vmem>>, vector<1x2x1xf32>
    %526 = vector.shape_cast %525 : vector<1x2x1xf32> to vector<2x1xf32>
    %c3 = arith.constant 3 : index
    %c0_181 = arith.constant 0 : index
    %c0_182 = arith.constant 0 : index
    %527 = vector.load %arg2[%c3, %c0_181, %c0_182] : memref<12x2x1xf32, #tpu.memory_space<vmem>>, vector<1x2x1xf32>
    %528 = vector.shape_cast %527 : vector<1x2x1xf32> to vector<2x1xf32>
    %529 = arith.subf %528, %526 : vector<2x1xf32>
    %cst_183 = arith.constant dense<0.000000e+00> : vector<2x32xf32>
    %530 = tpu.matmul %523, %310, %cst_183 {dimension_numbers = #tpu.dot_dimension_numbers<[1], [0], [0], [1], [0, 0, 1, 1], [], []>} : vector<2x8xf32>, vector<8x32xf32>, vector<2x32xf32> -> vector<2x32xf32>
    %531 = vector.broadcast %526 : vector<2x1xf32> to vector<2x32xf32>
    %532 = vector.broadcast %311 : vector<1x32xf32> to vector<2x32xf32>
    %533 = arith.mulf %531, %532 : vector<2x32xf32>
    %534 = arith.addf %530, %533 : vector<2x32xf32>
    %535 = vector.broadcast %312 : vector<1x32xf32> to vector<2x32xf32>
    %536 = arith.addf %534, %535 : vector<2x32xf32>
    %cst_184 = arith.constant dense<0.000000e+00> : vector<2xf32>
    %537 = vector.multi_reduction <add>, %536, %cst_184 [1] : vector<2x32xf32> to vector<2xf32>
    %538 = vector.shape_cast %537 : vector<2xf32> to vector<2x1xf32>
    %cst_185 = arith.constant 3.200000e+01 : f32
    %539 = vector.broadcast %cst_185 : f32 to vector<2x1xf32>
    %540 = arith.divf %538, %539 : vector<2x1xf32>
    %541 = vector.broadcast %540 : vector<2x1xf32> to vector<2x32xf32>
    %542 = arith.subf %536, %541 : vector<2x32xf32>
    %543 = arith.mulf %542, %542 : vector<2x32xf32>
    %cst_186 = arith.constant dense<0.000000e+00> : vector<2xf32>
    %544 = vector.multi_reduction <add>, %543, %cst_186 [1] : vector<2x32xf32> to vector<2xf32>
    %545 = vector.shape_cast %544 : vector<2xf32> to vector<2x1xf32>
    %cst_187 = arith.constant 3.200000e+01 : f32
    %546 = vector.broadcast %cst_187 : f32 to vector<2x1xf32>
    %547 = arith.divf %545, %546 : vector<2x1xf32>
    %548 = vector.broadcast %540 : vector<2x1xf32> to vector<2x32xf32>
    %549 = arith.subf %536, %548 : vector<2x32xf32>
    %cst_188 = arith.constant 9.99999974E-6 : f32
    %550 = vector.broadcast %cst_188 : f32 to vector<2x1xf32>
    %551 = arith.addf %547, %550 : vector<2x1xf32>
    %552 = math.rsqrt %551 : vector<2x1xf32>
    %553 = vector.broadcast %552 : vector<2x1xf32> to vector<2x32xf32>
    %554 = arith.mulf %549, %553 : vector<2x32xf32>
    %555 = vector.broadcast %313 : vector<1x32xf32> to vector<2x32xf32>
    %556 = arith.mulf %554, %555 : vector<2x32xf32>
    %557 = vector.broadcast %314 : vector<1x32xf32> to vector<2x32xf32>
    %558 = arith.addf %556, %557 : vector<2x32xf32>
    %cst_189 = arith.constant 1.000000e-01 : f32
    %559 = vector.broadcast %cst_189 : f32 to vector<2x32xf32>
    %560 = arith.mulf %559, %558 : vector<2x32xf32>
    %561 = arith.maximumf %558, %560 : vector<2x32xf32>
    %cst_190 = arith.constant dense<0.000000e+00> : vector<2x8xf32>
    %562 = tpu.matmul %561, %315, %cst_190 {dimension_numbers = #tpu.dot_dimension_numbers<[1], [0], [0], [1], [0, 0, 1, 1], [], []>} : vector<2x32xf32>, vector<32x8xf32>, vector<2x8xf32> -> vector<2x8xf32>
    %563 = vector.broadcast %316 : vector<1x8xf32> to vector<2x8xf32>
    %564 = arith.addf %562, %563 : vector<2x8xf32>
    %cst_191 = arith.constant dense<0.000000e+00> : vector<2xf32>
    %565 = vector.multi_reduction <add>, %564, %cst_191 [1] : vector<2x8xf32> to vector<2xf32>
    %566 = vector.shape_cast %565 : vector<2xf32> to vector<2x1xf32>
    %cst_192 = arith.constant 8.000000e+00 : f32
    %567 = vector.broadcast %cst_192 : f32 to vector<2x1xf32>
    %568 = arith.divf %566, %567 : vector<2x1xf32>
    %569 = vector.broadcast %568 : vector<2x1xf32> to vector<2x8xf32>
    %570 = arith.subf %564, %569 : vector<2x8xf32>
    %571 = arith.mulf %570, %570 : vector<2x8xf32>
    %cst_193 = arith.constant dense<0.000000e+00> : vector<2xf32>
    %572 = vector.multi_reduction <add>, %571, %cst_193 [1] : vector<2x8xf32> to vector<2xf32>
    %573 = vector.shape_cast %572 : vector<2xf32> to vector<2x1xf32>
    %cst_194 = arith.constant 8.000000e+00 : f32
    %574 = vector.broadcast %cst_194 : f32 to vector<2x1xf32>
    %575 = arith.divf %573, %574 : vector<2x1xf32>
    %576 = vector.broadcast %568 : vector<2x1xf32> to vector<2x8xf32>
    %577 = arith.subf %564, %576 : vector<2x8xf32>
    %cst_195 = arith.constant 9.99999974E-6 : f32
    %578 = vector.broadcast %cst_195 : f32 to vector<2x1xf32>
    %579 = arith.addf %575, %578 : vector<2x1xf32>
    %580 = math.rsqrt %579 : vector<2x1xf32>
    %581 = vector.broadcast %580 : vector<2x1xf32> to vector<2x8xf32>
    %582 = arith.mulf %577, %581 : vector<2x8xf32>
    %583 = vector.broadcast %317 : vector<1x8xf32> to vector<2x8xf32>
    %584 = arith.mulf %582, %583 : vector<2x8xf32>
    %585 = vector.broadcast %318 : vector<1x8xf32> to vector<2x8xf32>
    %586 = arith.addf %584, %585 : vector<2x8xf32>
    %cst_196 = arith.constant 1.000000e-01 : f32
    %587 = vector.broadcast %cst_196 : f32 to vector<2x8xf32>
    %588 = arith.mulf %587, %586 : vector<2x8xf32>
    %589 = arith.maximumf %586, %588 : vector<2x8xf32>
    %590 = vector.broadcast %529 : vector<2x1xf32> to vector<2x8xf32>
    %591 = arith.mulf %590, %589 : vector<2x8xf32>
    %592 = arith.addf %523, %591 : vector<2x8xf32>
    %c6 = arith.constant 6 : index
    %c0_197 = arith.constant 0 : index
    %593 = vector.load %arg36[%c6, %c0_197] : memref<24x8xf32, #tpu.memory_space<vmem>>, vector<2x8xf32>
    tpu.vector_store %arg36[%c6, %c0_197], %592 {strides = array<i32>} : memref<24x8xf32, #tpu.memory_space<vmem>>, vector<2x8xf32>,
    %c3_198 = arith.constant 3 : index
    %c0_199 = arith.constant 0 : index
    %c0_200 = arith.constant 0 : index
    %594 = vector.load %arg2[%c3_198, %c0_199, %c0_200] : memref<12x2x1xf32, #tpu.memory_space<vmem>>, vector<1x2x1xf32>
    %595 = vector.shape_cast %594 : vector<1x2x1xf32> to vector<2x1xf32>
    %c4_201 = arith.constant 4 : index
    %c0_202 = arith.constant 0 : index
    %c0_203 = arith.constant 0 : index
    %596 = vector.load %arg2[%c4_201, %c0_202, %c0_203] : memref<12x2x1xf32, #tpu.memory_space<vmem>>, vector<1x2x1xf32>
    %597 = vector.shape_cast %596 : vector<1x2x1xf32> to vector<2x1xf32>
    %598 = arith.subf %597, %595 : vector<2x1xf32>
    %cst_204 = arith.constant dense<0.000000e+00> : vector<2x32xf32>
    %599 = tpu.matmul %592, %310, %cst_204 {dimension_numbers = #tpu.dot_dimension_numbers<[1], [0], [0], [1], [0, 0, 1, 1], [], []>} : vector<2x8xf32>, vector<8x32xf32>, vector<2x32xf32> -> vector<2x32xf32>
    %600 = vector.broadcast %595 : vector<2x1xf32> to vector<2x32xf32>
    %601 = vector.broadcast %311 : vector<1x32xf32> to vector<2x32xf32>
    %602 = arith.mulf %600, %601 : vector<2x32xf32>
    %603 = arith.addf %599, %602 : vector<2x32xf32>
    %604 = vector.broadcast %312 : vector<1x32xf32> to vector<2x32xf32>
    %605 = arith.addf %603, %604 : vector<2x32xf32>
    %cst_205 = arith.constant dense<0.000000e+00> : vector<2xf32>
    %606 = vector.multi_reduction <add>, %605, %cst_205 [1] : vector<2x32xf32> to vector<2xf32>
    %607 = vector.shape_cast %606 : vector<2xf32> to vector<2x1xf32>
    %cst_206 = arith.constant 3.200000e+01 : f32
    %608 = vector.broadcast %cst_206 : f32 to vector<2x1xf32>
    %609 = arith.divf %607, %608 : vector<2x1xf32>
    %610 = vector.broadcast %609 : vector<2x1xf32> to vector<2x32xf32>
    %611 = arith.subf %605, %610 : vector<2x32xf32>
    %612 = arith.mulf %611, %611 : vector<2x32xf32>
    %cst_207 = arith.constant dense<0.000000e+00> : vector<2xf32>
    %613 = vector.multi_reduction <add>, %612, %cst_207 [1] : vector<2x32xf32> to vector<2xf32>
    %614 = vector.shape_cast %613 : vector<2xf32> to vector<2x1xf32>
    %cst_208 = arith.constant 3.200000e+01 : f32
    %615 = vector.broadcast %cst_208 : f32 to vector<2x1xf32>
    %616 = arith.divf %614, %615 : vector<2x1xf32>
    %617 = vector.broadcast %609 : vector<2x1xf32> to vector<2x32xf32>
    %618 = arith.subf %605, %617 : vector<2x32xf32>
    %cst_209 = arith.constant 9.99999974E-6 : f32
    %619 = vector.broadcast %cst_209 : f32 to vector<2x1xf32>
    %620 = arith.addf %616, %619 : vector<2x1xf32>
    %621 = math.rsqrt %620 : vector<2x1xf32>
    %622 = vector.broadcast %621 : vector<2x1xf32> to vector<2x32xf32>
    %623 = arith.mulf %618, %622 : vector<2x32xf32>
    %624 = vector.broadcast %313 : vector<1x32xf32> to vector<2x32xf32>
    %625 = arith.mulf %623, %624 : vector<2x32xf32>
    %626 = vector.broadcast %314 : vector<1x32xf32> to vector<2x32xf32>
    %627 = arith.addf %625, %626 : vector<2x32xf32>
    %cst_210 = arith.constant 1.000000e-01 : f32
    %628 = vector.broadcast %cst_210 : f32 to vector<2x32xf32>
    %629 = arith.mulf %628, %627 : vector<2x32xf32>
    %630 = arith.maximumf %627, %629 : vector<2x32xf32>
    %cst_211 = arith.constant dense<0.000000e+00> : vector<2x8xf32>
    %631 = tpu.matmul %630, %315, %cst_211 {dimension_numbers = #tpu.dot_dimension_numbers<[1], [0], [0], [1], [0, 0, 1, 1], [], []>} : vector<2x32xf32>, vector<32x8xf32>, vector<2x8xf32> -> vector<2x8xf32>
    %632 = vector.broadcast %316 : vector<1x8xf32> to vector<2x8xf32>
    %633 = arith.addf %631, %632 : vector<2x8xf32>
    %cst_212 = arith.constant dense<0.000000e+00> : vector<2xf32>
    %634 = vector.multi_reduction <add>, %633, %cst_212 [1] : vector<2x8xf32> to vector<2xf32>
    %635 = vector.shape_cast %634 : vector<2xf32> to vector<2x1xf32>
    %cst_213 = arith.constant 8.000000e+00 : f32
    %636 = vector.broadcast %cst_213 : f32 to vector<2x1xf32>
    %637 = arith.divf %635, %636 : vector<2x1xf32>
    %638 = vector.broadcast %637 : vector<2x1xf32> to vector<2x8xf32>
    %639 = arith.subf %633, %638 : vector<2x8xf32>
    %640 = arith.mulf %639, %639 : vector<2x8xf32>
    %cst_214 = arith.constant dense<0.000000e+00> : vector<2xf32>
    %641 = vector.multi_reduction <add>, %640, %cst_214 [1] : vector<2x8xf32> to vector<2xf32>
    %642 = vector.shape_cast %641 : vector<2xf32> to vector<2x1xf32>
    %cst_215 = arith.constant 8.000000e+00 : f32
    %643 = vector.broadcast %cst_215 : f32 to vector<2x1xf32>
    %644 = arith.divf %642, %643 : vector<2x1xf32>
    %645 = vector.broadcast %637 : vector<2x1xf32> to vector<2x8xf32>
    %646 = arith.subf %633, %645 : vector<2x8xf32>
    %cst_216 = arith.constant 9.99999974E-6 : f32
    %647 = vector.broadcast %cst_216 : f32 to vector<2x1xf32>
    %648 = arith.addf %644, %647 : vector<2x1xf32>
    %649 = math.rsqrt %648 : vector<2x1xf32>
    %650 = vector.broadcast %649 : vector<2x1xf32> to vector<2x8xf32>
    %651 = arith.mulf %646, %650 : vector<2x8xf32>
    %652 = vector.broadcast %317 : vector<1x8xf32> to vector<2x8xf32>
    %653 = arith.mulf %651, %652 : vector<2x8xf32>
    %654 = vector.broadcast %318 : vector<1x8xf32> to vector<2x8xf32>
    %655 = arith.addf %653, %654 : vector<2x8xf32>
    %cst_217 = arith.constant 1.000000e-01 : f32
    %656 = vector.broadcast %cst_217 : f32 to vector<2x8xf32>
    %657 = arith.mulf %656, %655 : vector<2x8xf32>
    %658 = arith.maximumf %655, %657 : vector<2x8xf32>
    %659 = vector.broadcast %598 : vector<2x1xf32> to vector<2x8xf32>
    %660 = arith.mulf %659, %658 : vector<2x8xf32>
    %661 = arith.addf %592, %660 : vector<2x8xf32>
    %c8 = arith.constant 8 : index
    %c0_218 = arith.constant 0 : index
    %662 = vector.load %arg36[%c8, %c0_218] : memref<24x8xf32, #tpu.memory_space<vmem>>, vector<2x8xf32>
    tpu.vector_store %arg36[%c8, %c0_218], %661 {strides = array<i32>} : memref<24x8xf32, #tpu.memory_space<vmem>>, vector<2x8xf32>,
    %c4_219 = arith.constant 4 : index
    %c0_220 = arith.constant 0 : index
    %c0_221 = arith.constant 0 : index
    %663 = vector.load %arg2[%c4_219, %c0_220, %c0_221] : memref<12x2x1xf32, #tpu.memory_space<vmem>>, vector<1x2x1xf32>
    %664 = vector.shape_cast %663 : vector<1x2x1xf32> to vector<2x1xf32>
    %c5 = arith.constant 5 : index
    %c0_222 = arith.constant 0 : index
    %c0_223 = arith.constant 0 : index
    %665 = vector.load %arg2[%c5, %c0_222, %c0_223] : memref<12x2x1xf32, #tpu.memory_space<vmem>>, vector<1x2x1xf32>
    %666 = vector.shape_cast %665 : vector<1x2x1xf32> to vector<2x1xf32>
    %667 = arith.subf %666, %664 : vector<2x1xf32>
    %cst_224 = arith.constant dense<0.000000e+00> : vector<2x32xf32>
    %668 = tpu.matmul %661, %310, %cst_224 {dimension_numbers = #tpu.dot_dimension_numbers<[1], [0], [0], [1], [0, 0, 1, 1], [], []>} : vector<2x8xf32>, vector<8x32xf32>, vector<2x32xf32> -> vector<2x32xf32>
    %669 = vector.broadcast %664 : vector<2x1xf32> to vector<2x32xf32>
    %670 = vector.broadcast %311 : vector<1x32xf32> to vector<2x32xf32>
    %671 = arith.mulf %669, %670 : vector<2x32xf32>
    %672 = arith.addf %668, %671 : vector<2x32xf32>
    %673 = vector.broadcast %312 : vector<1x32xf32> to vector<2x32xf32>
    %674 = arith.addf %672, %673 : vector<2x32xf32>
    %cst_225 = arith.constant dense<0.000000e+00> : vector<2xf32>
    %675 = vector.multi_reduction <add>, %674, %cst_225 [1] : vector<2x32xf32> to vector<2xf32>
    %676 = vector.shape_cast %675 : vector<2xf32> to vector<2x1xf32>
    %cst_226 = arith.constant 3.200000e+01 : f32
    %677 = vector.broadcast %cst_226 : f32 to vector<2x1xf32>
    %678 = arith.divf %676, %677 : vector<2x1xf32>
    %679 = vector.broadcast %678 : vector<2x1xf32> to vector<2x32xf32>
    %680 = arith.subf %674, %679 : vector<2x32xf32>
    %681 = arith.mulf %680, %680 : vector<2x32xf32>
    %cst_227 = arith.constant dense<0.000000e+00> : vector<2xf32>
    %682 = vector.multi_reduction <add>, %681, %cst_227 [1] : vector<2x32xf32> to vector<2xf32>
    %683 = vector.shape_cast %682 : vector<2xf32> to vector<2x1xf32>
    %cst_228 = arith.constant 3.200000e+01 : f32
    %684 = vector.broadcast %cst_228 : f32 to vector<2x1xf32>
    %685 = arith.divf %683, %684 : vector<2x1xf32>
    %686 = vector.broadcast %678 : vector<2x1xf32> to vector<2x32xf32>
    %687 = arith.subf %674, %686 : vector<2x32xf32>
    %cst_229 = arith.constant 9.99999974E-6 : f32
    %688 = vector.broadcast %cst_229 : f32 to vector<2x1xf32>
    %689 = arith.addf %685, %688 : vector<2x1xf32>
    %690 = math.rsqrt %689 : vector<2x1xf32>
    %691 = vector.broadcast %690 : vector<2x1xf32> to vector<2x32xf32>
    %692 = arith.mulf %687, %691 : vector<2x32xf32>
    %693 = vector.broadcast %313 : vector<1x32xf32> to vector<2x32xf32>
    %694 = arith.mulf %692, %693 : vector<2x32xf32>
    %695 = vector.broadcast %314 : vector<1x32xf32> to vector<2x32xf32>
    %696 = arith.addf %694, %695 : vector<2x32xf32>
    %cst_230 = arith.constant 1.000000e-01 : f32
    %697 = vector.broadcast %cst_230 : f32 to vector<2x32xf32>
    %698 = arith.mulf %697, %696 : vector<2x32xf32>
    %699 = arith.maximumf %696, %698 : vector<2x32xf32>
    %cst_231 = arith.constant dense<0.000000e+00> : vector<2x8xf32>
    %700 = tpu.matmul %699, %315, %cst_231 {dimension_numbers = #tpu.dot_dimension_numbers<[1], [0], [0], [1], [0, 0, 1, 1], [], []>} : vector<2x32xf32>, vector<32x8xf32>, vector<2x8xf32> -> vector<2x8xf32>
    %701 = vector.broadcast %316 : vector<1x8xf32> to vector<2x8xf32>
    %702 = arith.addf %700, %701 : vector<2x8xf32>
    %cst_232 = arith.constant dense<0.000000e+00> : vector<2xf32>
    %703 = vector.multi_reduction <add>, %702, %cst_232 [1] : vector<2x8xf32> to vector<2xf32>
    %704 = vector.shape_cast %703 : vector<2xf32> to vector<2x1xf32>
    %cst_233 = arith.constant 8.000000e+00 : f32
    %705 = vector.broadcast %cst_233 : f32 to vector<2x1xf32>
    %706 = arith.divf %704, %705 : vector<2x1xf32>
    %707 = vector.broadcast %706 : vector<2x1xf32> to vector<2x8xf32>
    %708 = arith.subf %702, %707 : vector<2x8xf32>
    %709 = arith.mulf %708, %708 : vector<2x8xf32>
    %cst_234 = arith.constant dense<0.000000e+00> : vector<2xf32>
    %710 = vector.multi_reduction <add>, %709, %cst_234 [1] : vector<2x8xf32> to vector<2xf32>
    %711 = vector.shape_cast %710 : vector<2xf32> to vector<2x1xf32>
    %cst_235 = arith.constant 8.000000e+00 : f32
    %712 = vector.broadcast %cst_235 : f32 to vector<2x1xf32>
    %713 = arith.divf %711, %712 : vector<2x1xf32>
    %714 = vector.broadcast %706 : vector<2x1xf32> to vector<2x8xf32>
    %715 = arith.subf %702, %714 : vector<2x8xf32>
    %cst_236 = arith.constant 9.99999974E-6 : f32
    %716 = vector.broadcast %cst_236 : f32 to vector<2x1xf32>
    %717 = arith.addf %713, %716 : vector<2x1xf32>
    %718 = math.rsqrt %717 : vector<2x1xf32>
    %719 = vector.broadcast %718 : vector<2x1xf32> to vector<2x8xf32>
    %720 = arith.mulf %715, %719 : vector<2x8xf32>
    %721 = vector.broadcast %317 : vector<1x8xf32> to vector<2x8xf32>
    %722 = arith.mulf %720, %721 : vector<2x8xf32>
    %723 = vector.broadcast %318 : vector<1x8xf32> to vector<2x8xf32>
    %724 = arith.addf %722, %723 : vector<2x8xf32>
    %cst_237 = arith.constant 1.000000e-01 : f32
    %725 = vector.broadcast %cst_237 : f32 to vector<2x8xf32>
    %726 = arith.mulf %725, %724 : vector<2x8xf32>
    %727 = arith.maximumf %724, %726 : vector<2x8xf32>
    %728 = vector.broadcast %667 : vector<2x1xf32> to vector<2x8xf32>
    %729 = arith.mulf %728, %727 : vector<2x8xf32>
    %730 = arith.addf %661, %729 : vector<2x8xf32>
    %c10 = arith.constant 10 : index
    %c0_238 = arith.constant 0 : index
    %731 = vector.load %arg36[%c10, %c0_238] : memref<24x8xf32, #tpu.memory_space<vmem>>, vector<2x8xf32>
    tpu.vector_store %arg36[%c10, %c0_238], %730 {strides = array<i32>} : memref<24x8xf32, #tpu.memory_space<vmem>>, vector<2x8xf32>,
    %c5_239 = arith.constant 5 : index
    %c0_240 = arith.constant 0 : index
    %c0_241 = arith.constant 0 : index
    %732 = vector.load %arg2[%c5_239, %c0_240, %c0_241] : memref<12x2x1xf32, #tpu.memory_space<vmem>>, vector<1x2x1xf32>
    %733 = vector.shape_cast %732 : vector<1x2x1xf32> to vector<2x1xf32>
    %c6_242 = arith.constant 6 : index
    %c0_243 = arith.constant 0 : index
    %c0_244 = arith.constant 0 : index
    %734 = vector.load %arg2[%c6_242, %c0_243, %c0_244] : memref<12x2x1xf32, #tpu.memory_space<vmem>>, vector<1x2x1xf32>
    %735 = vector.shape_cast %734 : vector<1x2x1xf32> to vector<2x1xf32>
    %736 = arith.subf %735, %733 : vector<2x1xf32>
    %cst_245 = arith.constant dense<0.000000e+00> : vector<2x32xf32>
    %737 = tpu.matmul %730, %310, %cst_245 {dimension_numbers = #tpu.dot_dimension_numbers<[1], [0], [0], [1], [0, 0, 1, 1], [], []>} : vector<2x8xf32>, vector<8x32xf32>, vector<2x32xf32> -> vector<2x32xf32>
    %738 = vector.broadcast %733 : vector<2x1xf32> to vector<2x32xf32>
    %739 = vector.broadcast %311 : vector<1x32xf32> to vector<2x32xf32>
    %740 = arith.mulf %738, %739 : vector<2x32xf32>
    %741 = arith.addf %737, %740 : vector<2x32xf32>
    %742 = vector.broadcast %312 : vector<1x32xf32> to vector<2x32xf32>
    %743 = arith.addf %741, %742 : vector<2x32xf32>
    %cst_246 = arith.constant dense<0.000000e+00> : vector<2xf32>
    %744 = vector.multi_reduction <add>, %743, %cst_246 [1] : vector<2x32xf32> to vector<2xf32>
    %745 = vector.shape_cast %744 : vector<2xf32> to vector<2x1xf32>
    %cst_247 = arith.constant 3.200000e+01 : f32
    %746 = vector.broadcast %cst_247 : f32 to vector<2x1xf32>
    %747 = arith.divf %745, %746 : vector<2x1xf32>
    %748 = vector.broadcast %747 : vector<2x1xf32> to vector<2x32xf32>
    %749 = arith.subf %743, %748 : vector<2x32xf32>
    %750 = arith.mulf %749, %749 : vector<2x32xf32>
    %cst_248 = arith.constant dense<0.000000e+00> : vector<2xf32>
    %751 = vector.multi_reduction <add>, %750, %cst_248 [1] : vector<2x32xf32> to vector<2xf32>
    %752 = vector.shape_cast %751 : vector<2xf32> to vector<2x1xf32>
    %cst_249 = arith.constant 3.200000e+01 : f32
    %753 = vector.broadcast %cst_249 : f32 to vector<2x1xf32>
    %754 = arith.divf %752, %753 : vector<2x1xf32>
    %755 = vector.broadcast %747 : vector<2x1xf32> to vector<2x32xf32>
    %756 = arith.subf %743, %755 : vector<2x32xf32>
    %cst_250 = arith.constant 9.99999974E-6 : f32
    %757 = vector.broadcast %cst_250 : f32 to vector<2x1xf32>
    %758 = arith.addf %754, %757 : vector<2x1xf32>
    %759 = math.rsqrt %758 : vector<2x1xf32>
    %760 = vector.broadcast %759 : vector<2x1xf32> to vector<2x32xf32>
    %761 = arith.mulf %756, %760 : vector<2x32xf32>
    %762 = vector.broadcast %313 : vector<1x32xf32> to vector<2x32xf32>
    %763 = arith.mulf %761, %762 : vector<2x32xf32>
    %764 = vector.broadcast %314 : vector<1x32xf32> to vector<2x32xf32>
    %765 = arith.addf %763, %764 : vector<2x32xf32>
    %cst_251 = arith.constant 1.000000e-01 : f32
    %766 = vector.broadcast %cst_251 : f32 to vector<2x32xf32>
    %767 = arith.mulf %766, %765 : vector<2x32xf32>
    %768 = arith.maximumf %765, %767 : vector<2x32xf32>
    %cst_252 = arith.constant dense<0.000000e+00> : vector<2x8xf32>
    %769 = tpu.matmul %768, %315, %cst_252 {dimension_numbers = #tpu.dot_dimension_numbers<[1], [0], [0], [1], [0, 0, 1, 1], [], []>} : vector<2x32xf32>, vector<32x8xf32>, vector<2x8xf32> -> vector<2x8xf32>
    %770 = vector.broadcast %316 : vector<1x8xf32> to vector<2x8xf32>
    %771 = arith.addf %769, %770 : vector<2x8xf32>
    %cst_253 = arith.constant dense<0.000000e+00> : vector<2xf32>
    %772 = vector.multi_reduction <add>, %771, %cst_253 [1] : vector<2x8xf32> to vector<2xf32>
    %773 = vector.shape_cast %772 : vector<2xf32> to vector<2x1xf32>
    %cst_254 = arith.constant 8.000000e+00 : f32
    %774 = vector.broadcast %cst_254 : f32 to vector<2x1xf32>
    %775 = arith.divf %773, %774 : vector<2x1xf32>
    %776 = vector.broadcast %775 : vector<2x1xf32> to vector<2x8xf32>
    %777 = arith.subf %771, %776 : vector<2x8xf32>
    %778 = arith.mulf %777, %777 : vector<2x8xf32>
    %cst_255 = arith.constant dense<0.000000e+00> : vector<2xf32>
    %779 = vector.multi_reduction <add>, %778, %cst_255 [1] : vector<2x8xf32> to vector<2xf32>
    %780 = vector.shape_cast %779 : vector<2xf32> to vector<2x1xf32>
    %cst_256 = arith.constant 8.000000e+00 : f32
    %781 = vector.broadcast %cst_256 : f32 to vector<2x1xf32>
    %782 = arith.divf %780, %781 : vector<2x1xf32>
    %783 = vector.broadcast %775 : vector<2x1xf32> to vector<2x8xf32>
    %784 = arith.subf %771, %783 : vector<2x8xf32>
    %cst_257 = arith.constant 9.99999974E-6 : f32
    %785 = vector.broadcast %cst_257 : f32 to vector<2x1xf32>
    %786 = arith.addf %782, %785 : vector<2x1xf32>
    %787 = math.rsqrt %786 : vector<2x1xf32>
    %788 = vector.broadcast %787 : vector<2x1xf32> to vector<2x8xf32>
    %789 = arith.mulf %784, %788 : vector<2x8xf32>
    %790 = vector.broadcast %317 : vector<1x8xf32> to vector<2x8xf32>
    %791 = arith.mulf %789, %790 : vector<2x8xf32>
    %792 = vector.broadcast %318 : vector<1x8xf32> to vector<2x8xf32>
    %793 = arith.addf %791, %792 : vector<2x8xf32>
    %cst_258 = arith.constant 1.000000e-01 : f32
    %794 = vector.broadcast %cst_258 : f32 to vector<2x8xf32>
    %795 = arith.mulf %794, %793 : vector<2x8xf32>
    %796 = arith.maximumf %793, %795 : vector<2x8xf32>
    %797 = vector.broadcast %736 : vector<2x1xf32> to vector<2x8xf32>
    %798 = arith.mulf %797, %796 : vector<2x8xf32>
    %799 = arith.addf %730, %798 : vector<2x8xf32>
    %c12 = arith.constant 12 : index
    %c0_259 = arith.constant 0 : index
    %800 = vector.load %arg36[%c12, %c0_259] : memref<24x8xf32, #tpu.memory_space<vmem>>, vector<2x8xf32>
    tpu.vector_store %arg36[%c12, %c0_259], %799 {strides = array<i32>} : memref<24x8xf32, #tpu.memory_space<vmem>>, vector<2x8xf32>,
    %c6_260 = arith.constant 6 : index
    %c0_261 = arith.constant 0 : index
    %c0_262 = arith.constant 0 : index
    %801 = vector.load %arg2[%c6_260, %c0_261, %c0_262] : memref<12x2x1xf32, #tpu.memory_space<vmem>>, vector<1x2x1xf32>
    %802 = vector.shape_cast %801 : vector<1x2x1xf32> to vector<2x1xf32>
    %c7 = arith.constant 7 : index
    %c0_263 = arith.constant 0 : index
    %c0_264 = arith.constant 0 : index
    %803 = vector.load %arg2[%c7, %c0_263, %c0_264] : memref<12x2x1xf32, #tpu.memory_space<vmem>>, vector<1x2x1xf32>
    %804 = vector.shape_cast %803 : vector<1x2x1xf32> to vector<2x1xf32>
    %805 = arith.subf %804, %802 : vector<2x1xf32>
    %cst_265 = arith.constant dense<0.000000e+00> : vector<2x32xf32>
    %806 = tpu.matmul %799, %310, %cst_265 {dimension_numbers = #tpu.dot_dimension_numbers<[1], [0], [0], [1], [0, 0, 1, 1], [], []>} : vector<2x8xf32>, vector<8x32xf32>, vector<2x32xf32> -> vector<2x32xf32>
    %807 = vector.broadcast %802 : vector<2x1xf32> to vector<2x32xf32>
    %808 = vector.broadcast %311 : vector<1x32xf32> to vector<2x32xf32>
    %809 = arith.mulf %807, %808 : vector<2x32xf32>
    %810 = arith.addf %806, %809 : vector<2x32xf32>
    %811 = vector.broadcast %312 : vector<1x32xf32> to vector<2x32xf32>
    %812 = arith.addf %810, %811 : vector<2x32xf32>
    %cst_266 = arith.constant dense<0.000000e+00> : vector<2xf32>
    %813 = vector.multi_reduction <add>, %812, %cst_266 [1] : vector<2x32xf32> to vector<2xf32>
    %814 = vector.shape_cast %813 : vector<2xf32> to vector<2x1xf32>
    %cst_267 = arith.constant 3.200000e+01 : f32
    %815 = vector.broadcast %cst_267 : f32 to vector<2x1xf32>
    %816 = arith.divf %814, %815 : vector<2x1xf32>
    %817 = vector.broadcast %816 : vector<2x1xf32> to vector<2x32xf32>
    %818 = arith.subf %812, %817 : vector<2x32xf32>
    %819 = arith.mulf %818, %818 : vector<2x32xf32>
    %cst_268 = arith.constant dense<0.000000e+00> : vector<2xf32>
    %820 = vector.multi_reduction <add>, %819, %cst_268 [1] : vector<2x32xf32> to vector<2xf32>
    %821 = vector.shape_cast %820 : vector<2xf32> to vector<2x1xf32>
    %cst_269 = arith.constant 3.200000e+01 : f32
    %822 = vector.broadcast %cst_269 : f32 to vector<2x1xf32>
    %823 = arith.divf %821, %822 : vector<2x1xf32>
    %824 = vector.broadcast %816 : vector<2x1xf32> to vector<2x32xf32>
    %825 = arith.subf %812, %824 : vector<2x32xf32>
    %cst_270 = arith.constant 9.99999974E-6 : f32
    %826 = vector.broadcast %cst_270 : f32 to vector<2x1xf32>
    %827 = arith.addf %823, %826 : vector<2x1xf32>
    %828 = math.rsqrt %827 : vector<2x1xf32>
    %829 = vector.broadcast %828 : vector<2x1xf32> to vector<2x32xf32>
    %830 = arith.mulf %825, %829 : vector<2x32xf32>
    %831 = vector.broadcast %313 : vector<1x32xf32> to vector<2x32xf32>
    %832 = arith.mulf %830, %831 : vector<2x32xf32>
    %833 = vector.broadcast %314 : vector<1x32xf32> to vector<2x32xf32>
    %834 = arith.addf %832, %833 : vector<2x32xf32>
    %cst_271 = arith.constant 1.000000e-01 : f32
    %835 = vector.broadcast %cst_271 : f32 to vector<2x32xf32>
    %836 = arith.mulf %835, %834 : vector<2x32xf32>
    %837 = arith.maximumf %834, %836 : vector<2x32xf32>
    %cst_272 = arith.constant dense<0.000000e+00> : vector<2x8xf32>
    %838 = tpu.matmul %837, %315, %cst_272 {dimension_numbers = #tpu.dot_dimension_numbers<[1], [0], [0], [1], [0, 0, 1, 1], [], []>} : vector<2x32xf32>, vector<32x8xf32>, vector<2x8xf32> -> vector<2x8xf32>
    %839 = vector.broadcast %316 : vector<1x8xf32> to vector<2x8xf32>
    %840 = arith.addf %838, %839 : vector<2x8xf32>
    %cst_273 = arith.constant dense<0.000000e+00> : vector<2xf32>
    %841 = vector.multi_reduction <add>, %840, %cst_273 [1] : vector<2x8xf32> to vector<2xf32>
    %842 = vector.shape_cast %841 : vector<2xf32> to vector<2x1xf32>
    %cst_274 = arith.constant 8.000000e+00 : f32
    %843 = vector.broadcast %cst_274 : f32 to vector<2x1xf32>
    %844 = arith.divf %842, %843 : vector<2x1xf32>
    %845 = vector.broadcast %844 : vector<2x1xf32> to vector<2x8xf32>
    %846 = arith.subf %840, %845 : vector<2x8xf32>
    %847 = arith.mulf %846, %846 : vector<2x8xf32>
    %cst_275 = arith.constant dense<0.000000e+00> : vector<2xf32>
    %848 = vector.multi_reduction <add>, %847, %cst_275 [1] : vector<2x8xf32> to vector<2xf32>
    %849 = vector.shape_cast %848 : vector<2xf32> to vector<2x1xf32>
    %cst_276 = arith.constant 8.000000e+00 : f32
    %850 = vector.broadcast %cst_276 : f32 to vector<2x1xf32>
    %851 = arith.divf %849, %850 : vector<2x1xf32>
    %852 = vector.broadcast %844 : vector<2x1xf32> to vector<2x8xf32>
    %853 = arith.subf %840, %852 : vector<2x8xf32>
    %cst_277 = arith.constant 9.99999974E-6 : f32
    %854 = vector.broadcast %cst_277 : f32 to vector<2x1xf32>
    %855 = arith.addf %851, %854 : vector<2x1xf32>
    %856 = math.rsqrt %855 : vector<2x1xf32>
    %857 = vector.broadcast %856 : vector<2x1xf32> to vector<2x8xf32>
    %858 = arith.mulf %853, %857 : vector<2x8xf32>
    %859 = vector.broadcast %317 : vector<1x8xf32> to vector<2x8xf32>
    %860 = arith.mulf %858, %859 : vector<2x8xf32>
    %861 = vector.broadcast %318 : vector<1x8xf32> to vector<2x8xf32>
    %862 = arith.addf %860, %861 : vector<2x8xf32>
    %cst_278 = arith.constant 1.000000e-01 : f32
    %863 = vector.broadcast %cst_278 : f32 to vector<2x8xf32>
    %864 = arith.mulf %863, %862 : vector<2x8xf32>
    %865 = arith.maximumf %862, %864 : vector<2x8xf32>
    %866 = vector.broadcast %805 : vector<2x1xf32> to vector<2x8xf32>
    %867 = arith.mulf %866, %865 : vector<2x8xf32>
    %868 = arith.addf %799, %867 : vector<2x8xf32>
    %c14 = arith.constant 14 : index
    %c0_279 = arith.constant 0 : index
    %869 = vector.load %arg36[%c14, %c0_279] : memref<24x8xf32, #tpu.memory_space<vmem>>, vector<2x8xf32>
    tpu.vector_store %arg36[%c14, %c0_279], %868 {strides = array<i32>} : memref<24x8xf32, #tpu.memory_space<vmem>>, vector<2x8xf32>,
    %c7_280 = arith.constant 7 : index
    %c0_281 = arith.constant 0 : index
    %c0_282 = arith.constant 0 : index
    %870 = vector.load %arg2[%c7_280, %c0_281, %c0_282] : memref<12x2x1xf32, #tpu.memory_space<vmem>>, vector<1x2x1xf32>
    %871 = vector.shape_cast %870 : vector<1x2x1xf32> to vector<2x1xf32>
    %c8_283 = arith.constant 8 : index
    %c0_284 = arith.constant 0 : index
    %c0_285 = arith.constant 0 : index
    %872 = vector.load %arg2[%c8_283, %c0_284, %c0_285] : memref<12x2x1xf32, #tpu.memory_space<vmem>>, vector<1x2x1xf32>
    %873 = vector.shape_cast %872 : vector<1x2x1xf32> to vector<2x1xf32>
    %874 = arith.subf %873, %871 : vector<2x1xf32>
    %cst_286 = arith.constant dense<0.000000e+00> : vector<2x32xf32>
    %875 = tpu.matmul %868, %310, %cst_286 {dimension_numbers = #tpu.dot_dimension_numbers<[1], [0], [0], [1], [0, 0, 1, 1], [], []>} : vector<2x8xf32>, vector<8x32xf32>, vector<2x32xf32> -> vector<2x32xf32>
    %876 = vector.broadcast %871 : vector<2x1xf32> to vector<2x32xf32>
    %877 = vector.broadcast %311 : vector<1x32xf32> to vector<2x32xf32>
    %878 = arith.mulf %876, %877 : vector<2x32xf32>
    %879 = arith.addf %875, %878 : vector<2x32xf32>
    %880 = vector.broadcast %312 : vector<1x32xf32> to vector<2x32xf32>
    %881 = arith.addf %879, %880 : vector<2x32xf32>
    %cst_287 = arith.constant dense<0.000000e+00> : vector<2xf32>
    %882 = vector.multi_reduction <add>, %881, %cst_287 [1] : vector<2x32xf32> to vector<2xf32>
    %883 = vector.shape_cast %882 : vector<2xf32> to vector<2x1xf32>
    %cst_288 = arith.constant 3.200000e+01 : f32
    %884 = vector.broadcast %cst_288 : f32 to vector<2x1xf32>
    %885 = arith.divf %883, %884 : vector<2x1xf32>
    %886 = vector.broadcast %885 : vector<2x1xf32> to vector<2x32xf32>
    %887 = arith.subf %881, %886 : vector<2x32xf32>
    %888 = arith.mulf %887, %887 : vector<2x32xf32>
    %cst_289 = arith.constant dense<0.000000e+00> : vector<2xf32>
    %889 = vector.multi_reduction <add>, %888, %cst_289 [1] : vector<2x32xf32> to vector<2xf32>
    %890 = vector.shape_cast %889 : vector<2xf32> to vector<2x1xf32>
    %cst_290 = arith.constant 3.200000e+01 : f32
    %891 = vector.broadcast %cst_290 : f32 to vector<2x1xf32>
    %892 = arith.divf %890, %891 : vector<2x1xf32>
    %893 = vector.broadcast %885 : vector<2x1xf32> to vector<2x32xf32>
    %894 = arith.subf %881, %893 : vector<2x32xf32>
    %cst_291 = arith.constant 9.99999974E-6 : f32
    %895 = vector.broadcast %cst_291 : f32 to vector<2x1xf32>
    %896 = arith.addf %892, %895 : vector<2x1xf32>
    %897 = math.rsqrt %896 : vector<2x1xf32>
    %898 = vector.broadcast %897 : vector<2x1xf32> to vector<2x32xf32>
    %899 = arith.mulf %894, %898 : vector<2x32xf32>
    %900 = vector.broadcast %313 : vector<1x32xf32> to vector<2x32xf32>
    %901 = arith.mulf %899, %900 : vector<2x32xf32>
    %902 = vector.broadcast %314 : vector<1x32xf32> to vector<2x32xf32>
    %903 = arith.addf %901, %902 : vector<2x32xf32>
    %cst_292 = arith.constant 1.000000e-01 : f32
    %904 = vector.broadcast %cst_292 : f32 to vector<2x32xf32>
    %905 = arith.mulf %904, %903 : vector<2x32xf32>
    %906 = arith.maximumf %903, %905 : vector<2x32xf32>
    %cst_293 = arith.constant dense<0.000000e+00> : vector<2x8xf32>
    %907 = tpu.matmul %906, %315, %cst_293 {dimension_numbers = #tpu.dot_dimension_numbers<[1], [0], [0], [1], [0, 0, 1, 1], [], []>} : vector<2x32xf32>, vector<32x8xf32>, vector<2x8xf32> -> vector<2x8xf32>
    %908 = vector.broadcast %316 : vector<1x8xf32> to vector<2x8xf32>
    %909 = arith.addf %907, %908 : vector<2x8xf32>
    %cst_294 = arith.constant dense<0.000000e+00> : vector<2xf32>
    %910 = vector.multi_reduction <add>, %909, %cst_294 [1] : vector<2x8xf32> to vector<2xf32>
    %911 = vector.shape_cast %910 : vector<2xf32> to vector<2x1xf32>
    %cst_295 = arith.constant 8.000000e+00 : f32
    %912 = vector.broadcast %cst_295 : f32 to vector<2x1xf32>
    %913 = arith.divf %911, %912 : vector<2x1xf32>
    %914 = vector.broadcast %913 : vector<2x1xf32> to vector<2x8xf32>
    %915 = arith.subf %909, %914 : vector<2x8xf32>
    %916 = arith.mulf %915, %915 : vector<2x8xf32>
    %cst_296 = arith.constant dense<0.000000e+00> : vector<2xf32>
    %917 = vector.multi_reduction <add>, %916, %cst_296 [1] : vector<2x8xf32> to vector<2xf32>
    %918 = vector.shape_cast %917 : vector<2xf32> to vector<2x1xf32>
    %cst_297 = arith.constant 8.000000e+00 : f32
    %919 = vector.broadcast %cst_297 : f32 to vector<2x1xf32>
    %920 = arith.divf %918, %919 : vector<2x1xf32>
    %921 = vector.broadcast %913 : vector<2x1xf32> to vector<2x8xf32>
    %922 = arith.subf %909, %921 : vector<2x8xf32>
    %cst_298 = arith.constant 9.99999974E-6 : f32
    %923 = vector.broadcast %cst_298 : f32 to vector<2x1xf32>
    %924 = arith.addf %920, %923 : vector<2x1xf32>
    %925 = math.rsqrt %924 : vector<2x1xf32>
    %926 = vector.broadcast %925 : vector<2x1xf32> to vector<2x8xf32>
    %927 = arith.mulf %922, %926 : vector<2x8xf32>
    %928 = vector.broadcast %317 : vector<1x8xf32> to vector<2x8xf32>
    %929 = arith.mulf %927, %928 : vector<2x8xf32>
    %930 = vector.broadcast %318 : vector<1x8xf32> to vector<2x8xf32>
    %931 = arith.addf %929, %930 : vector<2x8xf32>
    %cst_299 = arith.constant 1.000000e-01 : f32
    %932 = vector.broadcast %cst_299 : f32 to vector<2x8xf32>
    %933 = arith.mulf %932, %931 : vector<2x8xf32>
    %934 = arith.maximumf %931, %933 : vector<2x8xf32>
    %935 = vector.broadcast %874 : vector<2x1xf32> to vector<2x8xf32>
    %936 = arith.mulf %935, %934 : vector<2x8xf32>
    %937 = arith.addf %868, %936 : vector<2x8xf32>
    %c16 = arith.constant 16 : index
    %c0_300 = arith.constant 0 : index
    %938 = vector.load %arg36[%c16, %c0_300] : memref<24x8xf32, #tpu.memory_space<vmem>>, vector<2x8xf32>
    tpu.vector_store %arg36[%c16, %c0_300], %937 {strides = array<i32>} : memref<24x8xf32, #tpu.memory_space<vmem>>, vector<2x8xf32>,
    %c8_301 = arith.constant 8 : index
    %c0_302 = arith.constant 0 : index
    %c0_303 = arith.constant 0 : index
    %939 = vector.load %arg2[%c8_301, %c0_302, %c0_303] : memref<12x2x1xf32, #tpu.memory_space<vmem>>, vector<1x2x1xf32>
    %940 = vector.shape_cast %939 : vector<1x2x1xf32> to vector<2x1xf32>
    %c9 = arith.constant 9 : index
    %c0_304 = arith.constant 0 : index
    %c0_305 = arith.constant 0 : index
    %941 = vector.load %arg2[%c9, %c0_304, %c0_305] : memref<12x2x1xf32, #tpu.memory_space<vmem>>, vector<1x2x1xf32>
    %942 = vector.shape_cast %941 : vector<1x2x1xf32> to vector<2x1xf32>
    %943 = arith.subf %942, %940 : vector<2x1xf32>
    %cst_306 = arith.constant dense<0.000000e+00> : vector<2x32xf32>
    %944 = tpu.matmul %937, %310, %cst_306 {dimension_numbers = #tpu.dot_dimension_numbers<[1], [0], [0], [1], [0, 0, 1, 1], [], []>} : vector<2x8xf32>, vector<8x32xf32>, vector<2x32xf32> -> vector<2x32xf32>
    %945 = vector.broadcast %940 : vector<2x1xf32> to vector<2x32xf32>
    %946 = vector.broadcast %311 : vector<1x32xf32> to vector<2x32xf32>
    %947 = arith.mulf %945, %946 : vector<2x32xf32>
    %948 = arith.addf %944, %947 : vector<2x32xf32>
    %949 = vector.broadcast %312 : vector<1x32xf32> to vector<2x32xf32>
    %950 = arith.addf %948, %949 : vector<2x32xf32>
    %cst_307 = arith.constant dense<0.000000e+00> : vector<2xf32>
    %951 = vector.multi_reduction <add>, %950, %cst_307 [1] : vector<2x32xf32> to vector<2xf32>
    %952 = vector.shape_cast %951 : vector<2xf32> to vector<2x1xf32>
    %cst_308 = arith.constant 3.200000e+01 : f32
    %953 = vector.broadcast %cst_308 : f32 to vector<2x1xf32>
    %954 = arith.divf %952, %953 : vector<2x1xf32>
    %955 = vector.broadcast %954 : vector<2x1xf32> to vector<2x32xf32>
    %956 = arith.subf %950, %955 : vector<2x32xf32>
    %957 = arith.mulf %956, %956 : vector<2x32xf32>
    %cst_309 = arith.constant dense<0.000000e+00> : vector<2xf32>
    %958 = vector.multi_reduction <add>, %957, %cst_309 [1] : vector<2x32xf32> to vector<2xf32>
    %959 = vector.shape_cast %958 : vector<2xf32> to vector<2x1xf32>
    %cst_310 = arith.constant 3.200000e+01 : f32
    %960 = vector.broadcast %cst_310 : f32 to vector<2x1xf32>
    %961 = arith.divf %959, %960 : vector<2x1xf32>
    %962 = vector.broadcast %954 : vector<2x1xf32> to vector<2x32xf32>
    %963 = arith.subf %950, %962 : vector<2x32xf32>
    %cst_311 = arith.constant 9.99999974E-6 : f32
    %964 = vector.broadcast %cst_311 : f32 to vector<2x1xf32>
    %965 = arith.addf %961, %964 : vector<2x1xf32>
    %966 = math.rsqrt %965 : vector<2x1xf32>
    %967 = vector.broadcast %966 : vector<2x1xf32> to vector<2x32xf32>
    %968 = arith.mulf %963, %967 : vector<2x32xf32>
    %969 = vector.broadcast %313 : vector<1x32xf32> to vector<2x32xf32>
    %970 = arith.mulf %968, %969 : vector<2x32xf32>
    %971 = vector.broadcast %314 : vector<1x32xf32> to vector<2x32xf32>
    %972 = arith.addf %970, %971 : vector<2x32xf32>
    %cst_312 = arith.constant 1.000000e-01 : f32
    %973 = vector.broadcast %cst_312 : f32 to vector<2x32xf32>
    %974 = arith.mulf %973, %972 : vector<2x32xf32>
    %975 = arith.maximumf %972, %974 : vector<2x32xf32>
    %cst_313 = arith.constant dense<0.000000e+00> : vector<2x8xf32>
    %976 = tpu.matmul %975, %315, %cst_313 {dimension_numbers = #tpu.dot_dimension_numbers<[1], [0], [0], [1], [0, 0, 1, 1], [], []>} : vector<2x32xf32>, vector<32x8xf32>, vector<2x8xf32> -> vector<2x8xf32>
    %977 = vector.broadcast %316 : vector<1x8xf32> to vector<2x8xf32>
    %978 = arith.addf %976, %977 : vector<2x8xf32>
    %cst_314 = arith.constant dense<0.000000e+00> : vector<2xf32>
    %979 = vector.multi_reduction <add>, %978, %cst_314 [1] : vector<2x8xf32> to vector<2xf32>
    %980 = vector.shape_cast %979 : vector<2xf32> to vector<2x1xf32>
    %cst_315 = arith.constant 8.000000e+00 : f32
    %981 = vector.broadcast %cst_315 : f32 to vector<2x1xf32>
    %982 = arith.divf %980, %981 : vector<2x1xf32>
    %983 = vector.broadcast %982 : vector<2x1xf32> to vector<2x8xf32>
    %984 = arith.subf %978, %983 : vector<2x8xf32>
    %985 = arith.mulf %984, %984 : vector<2x8xf32>
    %cst_316 = arith.constant dense<0.000000e+00> : vector<2xf32>
    %986 = vector.multi_reduction <add>, %985, %cst_316 [1] : vector<2x8xf32> to vector<2xf32>
    %987 = vector.shape_cast %986 : vector<2xf32> to vector<2x1xf32>
    %cst_317 = arith.constant 8.000000e+00 : f32
    %988 = vector.broadcast %cst_317 : f32 to vector<2x1xf32>
    %989 = arith.divf %987, %988 : vector<2x1xf32>
    %990 = vector.broadcast %982 : vector<2x1xf32> to vector<2x8xf32>
    %991 = arith.subf %978, %990 : vector<2x8xf32>
    %cst_318 = arith.constant 9.99999974E-6 : f32
    %992 = vector.broadcast %cst_318 : f32 to vector<2x1xf32>
    %993 = arith.addf %989, %992 : vector<2x1xf32>
    %994 = math.rsqrt %993 : vector<2x1xf32>
    %995 = vector.broadcast %994 : vector<2x1xf32> to vector<2x8xf32>
    %996 = arith.mulf %991, %995 : vector<2x8xf32>
    %997 = vector.broadcast %317 : vector<1x8xf32> to vector<2x8xf32>
    %998 = arith.mulf %996, %997 : vector<2x8xf32>
    %999 = vector.broadcast %318 : vector<1x8xf32> to vector<2x8xf32>
    %1000 = arith.addf %998, %999 : vector<2x8xf32>
    %cst_319 = arith.constant 1.000000e-01 : f32
    %1001 = vector.broadcast %cst_319 : f32 to vector<2x8xf32>
    %1002 = arith.mulf %1001, %1000 : vector<2x8xf32>
    %1003 = arith.maximumf %1000, %1002 : vector<2x8xf32>
    %1004 = vector.broadcast %943 : vector<2x1xf32> to vector<2x8xf32>
    %1005 = arith.mulf %1004, %1003 : vector<2x8xf32>
    %1006 = arith.addf %937, %1005 : vector<2x8xf32>
    %c18 = arith.constant 18 : index
    %c0_320 = arith.constant 0 : index
    %1007 = vector.load %arg36[%c18, %c0_320] : memref<24x8xf32, #tpu.memory_space<vmem>>, vector<2x8xf32>
    tpu.vector_store %arg36[%c18, %c0_320], %1006 {strides = array<i32>} : memref<24x8xf32, #tpu.memory_space<vmem>>, vector<2x8xf32>,
    %c9_321 = arith.constant 9 : index
    %c0_322 = arith.constant 0 : index
    %c0_323 = arith.constant 0 : index
    %1008 = vector.load %arg2[%c9_321, %c0_322, %c0_323] : memref<12x2x1xf32, #tpu.memory_space<vmem>>, vector<1x2x1xf32>
    %1009 = vector.shape_cast %1008 : vector<1x2x1xf32> to vector<2x1xf32>
    %c10_324 = arith.constant 10 : index
    %c0_325 = arith.constant 0 : index
    %c0_326 = arith.constant 0 : index
    %1010 = vector.load %arg2[%c10_324, %c0_325, %c0_326] : memref<12x2x1xf32, #tpu.memory_space<vmem>>, vector<1x2x1xf32>
    %1011 = vector.shape_cast %1010 : vector<1x2x1xf32> to vector<2x1xf32>
    %1012 = arith.subf %1011, %1009 : vector<2x1xf32>
    %cst_327 = arith.constant dense<0.000000e+00> : vector<2x32xf32>
    %1013 = tpu.matmul %1006, %310, %cst_327 {dimension_numbers = #tpu.dot_dimension_numbers<[1], [0], [0], [1], [0, 0, 1, 1], [], []>} : vector<2x8xf32>, vector<8x32xf32>, vector<2x32xf32> -> vector<2x32xf32>
    %1014 = vector.broadcast %1009 : vector<2x1xf32> to vector<2x32xf32>
    %1015 = vector.broadcast %311 : vector<1x32xf32> to vector<2x32xf32>
    %1016 = arith.mulf %1014, %1015 : vector<2x32xf32>
    %1017 = arith.addf %1013, %1016 : vector<2x32xf32>
    %1018 = vector.broadcast %312 : vector<1x32xf32> to vector<2x32xf32>
    %1019 = arith.addf %1017, %1018 : vector<2x32xf32>
    %cst_328 = arith.constant dense<0.000000e+00> : vector<2xf32>
    %1020 = vector.multi_reduction <add>, %1019, %cst_328 [1] : vector<2x32xf32> to vector<2xf32>
    %1021 = vector.shape_cast %1020 : vector<2xf32> to vector<2x1xf32>
    %cst_329 = arith.constant 3.200000e+01 : f32
    %1022 = vector.broadcast %cst_329 : f32 to vector<2x1xf32>
    %1023 = arith.divf %1021, %1022 : vector<2x1xf32>
    %1024 = vector.broadcast %1023 : vector<2x1xf32> to vector<2x32xf32>
    %1025 = arith.subf %1019, %1024 : vector<2x32xf32>
    %1026 = arith.mulf %1025, %1025 : vector<2x32xf32>
    %cst_330 = arith.constant dense<0.000000e+00> : vector<2xf32>
    %1027 = vector.multi_reduction <add>, %1026, %cst_330 [1] : vector<2x32xf32> to vector<2xf32>
    %1028 = vector.shape_cast %1027 : vector<2xf32> to vector<2x1xf32>
    %cst_331 = arith.constant 3.200000e+01 : f32
    %1029 = vector.broadcast %cst_331 : f32 to vector<2x1xf32>
    %1030 = arith.divf %1028, %1029 : vector<2x1xf32>
    %1031 = vector.broadcast %1023 : vector<2x1xf32> to vector<2x32xf32>
    %1032 = arith.subf %1019, %1031 : vector<2x32xf32>
    %cst_332 = arith.constant 9.99999974E-6 : f32
    %1033 = vector.broadcast %cst_332 : f32 to vector<2x1xf32>
    %1034 = arith.addf %1030, %1033 : vector<2x1xf32>
    %1035 = math.rsqrt %1034 : vector<2x1xf32>
    %1036 = vector.broadcast %1035 : vector<2x1xf32> to vector<2x32xf32>
    %1037 = arith.mulf %1032, %1036 : vector<2x32xf32>
    %1038 = vector.broadcast %313 : vector<1x32xf32> to vector<2x32xf32>
    %1039 = arith.mulf %1037, %1038 : vector<2x32xf32>
    %1040 = vector.broadcast %314 : vector<1x32xf32> to vector<2x32xf32>
    %1041 = arith.addf %1039, %1040 : vector<2x32xf32>
    %cst_333 = arith.constant 1.000000e-01 : f32
    %1042 = vector.broadcast %cst_333 : f32 to vector<2x32xf32>
    %1043 = arith.mulf %1042, %1041 : vector<2x32xf32>
    %1044 = arith.maximumf %1041, %1043 : vector<2x32xf32>
    %cst_334 = arith.constant dense<0.000000e+00> : vector<2x8xf32>
    %1045 = tpu.matmul %1044, %315, %cst_334 {dimension_numbers = #tpu.dot_dimension_numbers<[1], [0], [0], [1], [0, 0, 1, 1], [], []>} : vector<2x32xf32>, vector<32x8xf32>, vector<2x8xf32> -> vector<2x8xf32>
    %1046 = vector.broadcast %316 : vector<1x8xf32> to vector<2x8xf32>
    %1047 = arith.addf %1045, %1046 : vector<2x8xf32>
    %cst_335 = arith.constant dense<0.000000e+00> : vector<2xf32>
    %1048 = vector.multi_reduction <add>, %1047, %cst_335 [1] : vector<2x8xf32> to vector<2xf32>
    %1049 = vector.shape_cast %1048 : vector<2xf32> to vector<2x1xf32>
    %cst_336 = arith.constant 8.000000e+00 : f32
    %1050 = vector.broadcast %cst_336 : f32 to vector<2x1xf32>
    %1051 = arith.divf %1049, %1050 : vector<2x1xf32>
    %1052 = vector.broadcast %1051 : vector<2x1xf32> to vector<2x8xf32>
    %1053 = arith.subf %1047, %1052 : vector<2x8xf32>
    %1054 = arith.mulf %1053, %1053 : vector<2x8xf32>
    %cst_337 = arith.constant dense<0.000000e+00> : vector<2xf32>
    %1055 = vector.multi_reduction <add>, %1054, %cst_337 [1] : vector<2x8xf32> to vector<2xf32>
    %1056 = vector.shape_cast %1055 : vector<2xf32> to vector<2x1xf32>
    %cst_338 = arith.constant 8.000000e+00 : f32
    %1057 = vector.broadcast %cst_338 : f32 to vector<2x1xf32>
    %1058 = arith.divf %1056, %1057 : vector<2x1xf32>
    %1059 = vector.broadcast %1051 : vector<2x1xf32> to vector<2x8xf32>
    %1060 = arith.subf %1047, %1059 : vector<2x8xf32>
    %cst_339 = arith.constant 9.99999974E-6 : f32
    %1061 = vector.broadcast %cst_339 : f32 to vector<2x1xf32>
    %1062 = arith.addf %1058, %1061 : vector<2x1xf32>
    %1063 = math.rsqrt %1062 : vector<2x1xf32>
    %1064 = vector.broadcast %1063 : vector<2x1xf32> to vector<2x8xf32>
    %1065 = arith.mulf %1060, %1064 : vector<2x8xf32>
    %1066 = vector.broadcast %317 : vector<1x8xf32> to vector<2x8xf32>
    %1067 = arith.mulf %1065, %1066 : vector<2x8xf32>
    %1068 = vector.broadcast %318 : vector<1x8xf32> to vector<2x8xf32>
    %1069 = arith.addf %1067, %1068 : vector<2x8xf32>
    %cst_340 = arith.constant 1.000000e-01 : f32
    %1070 = vector.broadcast %cst_340 : f32 to vector<2x8xf32>
    %1071 = arith.mulf %1070, %1069 : vector<2x8xf32>
    %1072 = arith.maximumf %1069, %1071 : vector<2x8xf32>
    %1073 = vector.broadcast %1012 : vector<2x1xf32> to vector<2x8xf32>
    %1074 = arith.mulf %1073, %1072 : vector<2x8xf32>
    %1075 = arith.addf %1006, %1074 : vector<2x8xf32>
    %c20 = arith.constant 20 : index
    %c0_341 = arith.constant 0 : index
    %1076 = vector.load %arg36[%c20, %c0_341] : memref<24x8xf32, #tpu.memory_space<vmem>>, vector<2x8xf32>
    tpu.vector_store %arg36[%c20, %c0_341], %1075 {strides = array<i32>} : memref<24x8xf32, #tpu.memory_space<vmem>>, vector<2x8xf32>,
    %c10_342 = arith.constant 10 : index
    %c0_343 = arith.constant 0 : index
    %c0_344 = arith.constant 0 : index
    %1077 = vector.load %arg2[%c10_342, %c0_343, %c0_344] : memref<12x2x1xf32, #tpu.memory_space<vmem>>, vector<1x2x1xf32>
    %1078 = vector.shape_cast %1077 : vector<1x2x1xf32> to vector<2x1xf32>
    %c11 = arith.constant 11 : index
    %c0_345 = arith.constant 0 : index
    %c0_346 = arith.constant 0 : index
    %1079 = vector.load %arg2[%c11, %c0_345, %c0_346] : memref<12x2x1xf32, #tpu.memory_space<vmem>>, vector<1x2x1xf32>
    %1080 = vector.shape_cast %1079 : vector<1x2x1xf32> to vector<2x1xf32>
    %1081 = arith.subf %1080, %1078 : vector<2x1xf32>
    %cst_347 = arith.constant dense<0.000000e+00> : vector<2x32xf32>
    %1082 = tpu.matmul %1075, %310, %cst_347 {dimension_numbers = #tpu.dot_dimension_numbers<[1], [0], [0], [1], [0, 0, 1, 1], [], []>} : vector<2x8xf32>, vector<8x32xf32>, vector<2x32xf32> -> vector<2x32xf32>
    %1083 = vector.broadcast %1078 : vector<2x1xf32> to vector<2x32xf32>
    %1084 = vector.broadcast %311 : vector<1x32xf32> to vector<2x32xf32>
    %1085 = arith.mulf %1083, %1084 : vector<2x32xf32>
    %1086 = arith.addf %1082, %1085 : vector<2x32xf32>
    %1087 = vector.broadcast %312 : vector<1x32xf32> to vector<2x32xf32>
    %1088 = arith.addf %1086, %1087 : vector<2x32xf32>
    %cst_348 = arith.constant dense<0.000000e+00> : vector<2xf32>
    %1089 = vector.multi_reduction <add>, %1088, %cst_348 [1] : vector<2x32xf32> to vector<2xf32>
    %1090 = vector.shape_cast %1089 : vector<2xf32> to vector<2x1xf32>
    %cst_349 = arith.constant 3.200000e+01 : f32
    %1091 = vector.broadcast %cst_349 : f32 to vector<2x1xf32>
    %1092 = arith.divf %1090, %1091 : vector<2x1xf32>
    %1093 = vector.broadcast %1092 : vector<2x1xf32> to vector<2x32xf32>
    %1094 = arith.subf %1088, %1093 : vector<2x32xf32>
    %1095 = arith.mulf %1094, %1094 : vector<2x32xf32>
    %cst_350 = arith.constant dense<0.000000e+00> : vector<2xf32>
    %1096 = vector.multi_reduction <add>, %1095, %cst_350 [1] : vector<2x32xf32> to vector<2xf32>
    %1097 = vector.shape_cast %1096 : vector<2xf32> to vector<2x1xf32>
    %cst_351 = arith.constant 3.200000e+01 : f32
    %1098 = vector.broadcast %cst_351 : f32 to vector<2x1xf32>
    %1099 = arith.divf %1097, %1098 : vector<2x1xf32>
    %1100 = vector.broadcast %1092 : vector<2x1xf32> to vector<2x32xf32>
    %1101 = arith.subf %1088, %1100 : vector<2x32xf32>
    %cst_352 = arith.constant 9.99999974E-6 : f32
    %1102 = vector.broadcast %cst_352 : f32 to vector<2x1xf32>
    %1103 = arith.addf %1099, %1102 : vector<2x1xf32>
    %1104 = math.rsqrt %1103 : vector<2x1xf32>
    %1105 = vector.broadcast %1104 : vector<2x1xf32> to vector<2x32xf32>
    %1106 = arith.mulf %1101, %1105 : vector<2x32xf32>
    %1107 = vector.broadcast %313 : vector<1x32xf32> to vector<2x32xf32>
    %1108 = arith.mulf %1106, %1107 : vector<2x32xf32>
    %1109 = vector.broadcast %314 : vector<1x32xf32> to vector<2x32xf32>
    %1110 = arith.addf %1108, %1109 : vector<2x32xf32>
    %cst_353 = arith.constant 1.000000e-01 : f32
    %1111 = vector.broadcast %cst_353 : f32 to vector<2x32xf32>
    %1112 = arith.mulf %1111, %1110 : vector<2x32xf32>
    %1113 = arith.maximumf %1110, %1112 : vector<2x32xf32>
    %cst_354 = arith.constant dense<0.000000e+00> : vector<2x8xf32>
    %1114 = tpu.matmul %1113, %315, %cst_354 {dimension_numbers = #tpu.dot_dimension_numbers<[1], [0], [0], [1], [0, 0, 1, 1], [], []>} : vector<2x32xf32>, vector<32x8xf32>, vector<2x8xf32> -> vector<2x8xf32>
    %1115 = vector.broadcast %316 : vector<1x8xf32> to vector<2x8xf32>
    %1116 = arith.addf %1114, %1115 : vector<2x8xf32>
    %cst_355 = arith.constant dense<0.000000e+00> : vector<2xf32>
    %1117 = vector.multi_reduction <add>, %1116, %cst_355 [1] : vector<2x8xf32> to vector<2xf32>
    %1118 = vector.shape_cast %1117 : vector<2xf32> to vector<2x1xf32>
    %cst_356 = arith.constant 8.000000e+00 : f32
    %1119 = vector.broadcast %cst_356 : f32 to vector<2x1xf32>
    %1120 = arith.divf %1118, %1119 : vector<2x1xf32>
    %1121 = vector.broadcast %1120 : vector<2x1xf32> to vector<2x8xf32>
    %1122 = arith.subf %1116, %1121 : vector<2x8xf32>
    %1123 = arith.mulf %1122, %1122 : vector<2x8xf32>
    %cst_357 = arith.constant dense<0.000000e+00> : vector<2xf32>
    %1124 = vector.multi_reduction <add>, %1123, %cst_357 [1] : vector<2x8xf32> to vector<2xf32>
    %1125 = vector.shape_cast %1124 : vector<2xf32> to vector<2x1xf32>
    %cst_358 = arith.constant 8.000000e+00 : f32
    %1126 = vector.broadcast %cst_358 : f32 to vector<2x1xf32>
    %1127 = arith.divf %1125, %1126 : vector<2x1xf32>
    %1128 = vector.broadcast %1120 : vector<2x1xf32> to vector<2x8xf32>
    %1129 = arith.subf %1116, %1128 : vector<2x8xf32>
    %cst_359 = arith.constant 9.99999974E-6 : f32
    %1130 = vector.broadcast %cst_359 : f32 to vector<2x1xf32>
    %1131 = arith.addf %1127, %1130 : vector<2x1xf32>
    %1132 = math.rsqrt %1131 : vector<2x1xf32>
    %1133 = vector.broadcast %1132 : vector<2x1xf32> to vector<2x8xf32>
    %1134 = arith.mulf %1129, %1133 : vector<2x8xf32>
    %1135 = vector.broadcast %317 : vector<1x8xf32> to vector<2x8xf32>
    %1136 = arith.mulf %1134, %1135 : vector<2x8xf32>
    %1137 = vector.broadcast %318 : vector<1x8xf32> to vector<2x8xf32>
    %1138 = arith.addf %1136, %1137 : vector<2x8xf32>
    %cst_360 = arith.constant 1.000000e-01 : f32
    %1139 = vector.broadcast %cst_360 : f32 to vector<2x8xf32>
    %1140 = arith.mulf %1139, %1138 : vector<2x8xf32>
    %1141 = arith.maximumf %1138, %1140 : vector<2x8xf32>
    %1142 = vector.broadcast %1081 : vector<2x1xf32> to vector<2x8xf32>
    %1143 = arith.mulf %1142, %1141 : vector<2x8xf32>
    %1144 = arith.addf %1075, %1143 : vector<2x8xf32>
    %c22 = arith.constant 22 : index
    %c0_361 = arith.constant 0 : index
    %1145 = vector.load %arg36[%c22, %c0_361] : memref<24x8xf32, #tpu.memory_space<vmem>>, vector<2x8xf32>
    tpu.vector_store %arg36[%c22, %c0_361], %1144 {strides = array<i32>} : memref<24x8xf32, #tpu.memory_space<vmem>>, vector<2x8xf32>,
    %c0_362 = arith.constant 0 : index
    %c0_363 = arith.constant 0 : index
    %1146 = vector.load %arg36[%c0_362, %c0_363] : memref<24x8xf32, #tpu.memory_space<vmem>>, vector<24x8xf32>
    %c0_364 = arith.constant 0 : index
    %c0_365 = arith.constant 0 : index
    %1147 = vector.load %arg31[%c0_364, %c0_365] : memref<8x32xf32, #tpu.memory_space<vmem>>, vector<8x32xf32>
    %cst_366 = arith.constant dense<0.000000e+00> : vector<24x32xf32>
    %1148 = tpu.matmul %1146, %1147, %cst_366 {dimension_numbers = #tpu.dot_dimension_numbers<[1], [0], [0], [1], [0, 0, 1, 1], [], []>} : vector<24x8xf32>, vector<8x32xf32>, vector<24x32xf32> -> vector<24x32xf32>
    %c0_367 = arith.constant 0 : index
    %c0_368 = arith.constant 0 : index
    %1149 = vector.load %arg32[%c0_367, %c0_368] : memref<1x32xf32, #tpu.memory_space<vmem>>, vector<1x32xf32>
    %1150 = vector.broadcast %1149 : vector<1x32xf32> to vector<24x32xf32>
    %1151 = arith.addf %1148, %1150 : vector<24x32xf32>
    %cst_369 = arith.constant 1.000000e-01 : f32
    %1152 = vector.broadcast %cst_369 : f32 to vector<24x32xf32>
    %1153 = arith.mulf %1152, %1151 : vector<24x32xf32>
    %1154 = arith.maximumf %1151, %1153 : vector<24x32xf32>
    %c0_370 = arith.constant 0 : index
    %c0_371 = arith.constant 0 : index
    %1155 = vector.load %arg33[%c0_370, %c0_371] : memref<32x4xf32, #tpu.memory_space<vmem>>, vector<32x4xf32>
    %cst_372 = arith.constant dense<0.000000e+00> : vector<24x4xf32>
    %1156 = tpu.matmul %1154, %1155, %cst_372 {dimension_numbers = #tpu.dot_dimension_numbers<[1], [0], [0], [1], [0, 0, 1, 1], [], []>} : vector<24x32xf32>, vector<32x4xf32>, vector<24x4xf32> -> vector<24x4xf32>
    %c0_373 = arith.constant 0 : index
    %c0_374 = arith.constant 0 : index
    %1157 = vector.load %arg34[%c0_373, %c0_374] : memref<1x4xf32, #tpu.memory_space<vmem>>, vector<1x4xf32>
    %1158 = vector.broadcast %1157 : vector<1x4xf32> to vector<24x4xf32>
    %1159 = arith.addf %1156, %1158 : vector<24x4xf32>
    %c0_375 = arith.constant 0 : index
    %c0_376 = arith.constant 0 : index
    %1160 = vector.load %arg35[%c0_375, %c0_376] : memref<24x4xf32, #tpu.memory_space<vmem>>, vector<24x4xf32>
    tpu.vector_store %arg35[%c0_375, %c0_376], %1159 {strides = array<i32>} : memref<24x4xf32, #tpu.memory_space<vmem>>, vector<24x4xf32>,
    return
  }
}

</mosaic_0001>

<bundles_post_ra>
// kernel: odevae_forward.1
= control target key start
LH: loop header
LB: loop body
LE: loop exit
PB: predicated region body
PF: predicated region fallthrough
CT: control target
= control target key end

     0   :  { %s6456_s6 = smov 1   ;;  %s6457_s10 = smov 2   ;;  %s7739_s0 = inlined_call_operand.smem [shape: u32[39], index: -1, kind: input, shape index: {}] }
   0x1   :  { %s6507_s5 = sld [smem:[%s7739_s0]]   ;;  %s6458_s14 = smov 3  }
   0x2   :  { %s6512_s9 = sld [smem:[%s7739_s0 + %s6456_s6]]   ;;  %s6459_s18 = smov 4  }
   0x3   :  { %s6517_s13 = sld [smem:[%s7739_s0 + %s6457_s10]]   ;;  %s6460_s22 = smov 5  }
   0x4   :  { %s6522_s17 = sld [smem:[%s7739_s0 + %s6458_s14]]   ;;  %s6461_s26 = smov 6  }
   0x5   :  { %s6527_s21 = sld [smem:[%s7739_s0 + %s6459_s18]]   ;;  %s6462_s30 = smov 7  }
   0x6   :  { %s6532_s25 = sld [smem:[%s7739_s0 + %s6460_s22]]   ;;  %s6463_s4 = smov 8  }
   0x7   :  { %s6537_s29 = sld [smem:[%s7739_s0 + %s6461_s26]]   ;;  %s6464_s10 = smov 9  }
   0x8   :  { %s6542_s3 = sld [smem:[%s7739_s0 + %s6462_s30]]   ;;  %s6465_s15 = smov 10  }
   0x9   :  { %7753 = sst [smem:[#allocation8_spill]] %s6517_s13  ;;  %s6466_s20 = smov 11  }
   0xa   :  { %s6547_s8 = sld [smem:[%s7739_s0 + %s6463_s4]]   ;;  %s6467_s26 = smov 12  }
   0xb   :  { %s6552_s14 = sld [smem:[%s7739_s0 + %s6464_s10]]   ;;  %s6468_s1 = smov 13  }
   0xc   :  { %s6557_s19 = sld [smem:[%s7739_s0 + %s6465_s15]]   ;;  %s6469_s7 = smov 14  }
   0xd   :  { %s6562_s24 = sld [smem:[%s7739_s0 + %s6466_s20]]   ;;  %s6470_s15 = smov 15  }
   0xe   :  { %s6567_s30 = sld [smem:[%s7739_s0 + %s6467_s26]]   ;;  %s6471_s22 = smov 16  }
   0xf   :  { %s6572_s6 = sld [smem:[%s7739_s0 + %s6468_s1]]   ;;  %s6472_s28 = smov 17  }
  0x10   :  { %s6577_s12 = sld [smem:[%s7739_s0 + %s6469_s7]]   ;;  %s6473_s7 = smov 18  }
  0x11   :  { %s6582_s20 = sld [smem:[%s7739_s0 + %s6470_s15]]   ;;  %s6474_s15 = smov 19  }
  0x12   :  { %s6587_s27 = sld [smem:[%s7739_s0 + %s6471_s22]]   ;;  %s6475_s22 = smov 20  }
  0x13   :  { %s6592_s4 = sld [smem:[%s7739_s0 + %s6472_s28]]   ;;  %s6476_s28 = smov 21  }
  0x14   :  { %s6597_s13 = sld [smem:[%s7739_s0 + %s6473_s7]]   ;;  %s6477_s7 = smov 22  }
  0x17   :  { %7754 = sst [smem:[#allocation9_spill]] %s6582_s20 }
  0x18   :  { %7755 = sst [smem:[#allocation10_spill]] %s6587_s27 }
  0x19   :  { %7756 = sst [smem:[#allocation11_spill]] %s6592_s4 }
  0x1a   :  { %7757 = sst [smem:[#allocation12_spill]] %s6597_s13 }
  0x1b   :  { %s6602_s20 = sld [smem:[%s7739_s0 + %s6474_s15]]   ;;  %s6478_s15 = smov 23  }
  0x1c   :  { %s6607_s27 = sld [smem:[%s7739_s0 + %s6475_s22]]   ;;  %s6479_s22 = smov 24  }
  0x1d   :  { %s6612_s4 = sld [smem:[%s7739_s0 + %s6476_s28]]   ;;  %s6480_s28 = smov 25  }
  0x1e   :  { %s6617_s13 = sld [smem:[%s7739_s0 + %s6477_s7]]   ;;  %s6481_s7 = smov 26  }
  0x21   :  { %7758 = sst [smem:[#allocation13_spill]] %s6602_s20 }
  0x22   :  { %7759 = sst [smem:[#allocation14_spill]] %s6607_s27 }
  0x23   :  { %7760 = sst [smem:[#allocation15_spill]] %s6612_s4 }
  0x24   :  { %7761 = sst [smem:[#allocation16_spill]] %s6617_s13 }
  0x25   :  { %s6622_s20 = sld [smem:[%s7739_s0 + %s6478_s15]]   ;;  %s6482_s15 = smov 27  }
  0x26   :  { %s6627_s27 = sld [smem:[%s7739_s0 + %s6479_s22]]   ;;  %s6483_s22 = smov 28  }
  0x27   :  { %s6632_s4 = sld [smem:[%s7739_s0 + %s6480_s28]]   ;;  %s6484_s28 = smov 29  }
  0x28   :  { %s6637_s13 = sld [smem:[%s7739_s0 + %s6481_s7]]   ;;  %s6485_s7 = smov 30  }
  0x2b   :  { %7762 = sst [smem:[#allocation17_spill]] %s6622_s20 }
  0x2c   :  { %7763 = sst [smem:[#allocation18_spill]] %s6627_s27 }
  0x2d   :  { %7764 = sst [smem:[#allocation19_spill]] %s6632_s4 }
  0x2e   :  { %7765 = sst [smem:[#allocation20_spill]] %s6637_s13 }
  0x2f   :  { %s6642_s20 = sld [smem:[%s7739_s0 + %s6482_s15]]   ;;  %s6486_s15 = smov 31  }
  0x30   :  { %s6647_s27 = sld [smem:[%s7739_s0 + %s6483_s22]]   ;;  %s6487_s22 = smov 32  }
  0x31   :  { %s6652_s4 = sld [smem:[%s7739_s0 + %s6484_s28]]   ;;  %s6488_s28 = smov 33  }
  0x32   :  { %s6657_s13 = sld [smem:[%s7739_s0 + %s6485_s7]]   ;;  %s6489_s7 = smov 34  }
  0x35   :  { %7766 = sst [smem:[#allocation21_spill]] %s6642_s20 }
  0x36   :  { %7767 = sst [smem:[#allocation22_spill]] %s6647_s27 }
  0x37   :  { %7768 = sst [smem:[#allocation23_spill]] %s6652_s4 }
  0x38   :  { %7769 = sst [smem:[#allocation24_spill]] %s6657_s13 }
  0x39   :  { %s6662_s20 = sld [smem:[%s7739_s0 + %s6486_s15]]   ;;  %s6490_s15 = smov 35  }
  0x3a   :  { %s6667_s27 = sld [smem:[%s7739_s0 + %s6487_s22]]   ;;  %s6491_s22 = smov 36  }
  0x3b   :  { %s6672_s4 = sld [smem:[%s7739_s0 + %s6488_s28]]   ;;  %s6492_s28 = smov 37  }
  0x3c   :  { %s6677_s13 = sld [smem:[%s7739_s0 + %s6489_s7]]   ;;  %s6493_s7 = smov 38  }
  0x3f   :  { %7770 = sst [smem:[#allocation25_spill]] %s6662_s20 }
  0x40   :  { %7771 = sst [smem:[#allocation26_spill]] %s6667_s27 }
  0x41   :  { %7772 = sst [smem:[#allocation27_spill]] %s6672_s4 }
  0x42   :  { %7773 = sst [smem:[#allocation28_spill]] %s6677_s13 }
  0x43   :  { %s6682_s20 = sld [smem:[%s7739_s0 + %s6490_s15]]  }
  0x44   :  { %s6687_s27 = sld [smem:[%s7739_s0 + %s6491_s22]]  }
  0x45   :  { %s6692_s4 = sld [smem:[%s7739_s0 + %s6492_s28]]  }
  0x46   :  { %s6697_s13 = sld [smem:[%s7739_s0 + %s6493_s7]]  }
  0x47   :  { %83 = vsyncpa [#allocation3], 0  ;;  %v159_v0 = vld [vmem:[%s6522_s17] sm:$0xf]  ;;  %vm186_vm0 = vcmask 1043456   ;;  %vm179_vm1 = vcmask 31744  }
  0x48   :  { %v274_v1 = vld [vmem:[%s6527_s21] sm:$0xf]  ;;  %5706 = vmatprep.subr.msk.mxu0 %vm186_vm0, %v159_v0  ;;  %v156_v3 = vld [vmem:[%s6507_s5 + $0x8] sm:$0xff]  ;;  %v6711_v5 = vld [vmem:[%s6552_s14 + $0x18] sm:$0xff]  ;;  %v6494_v6 = vmov 0.0  }
  0x49   :  { %v155_v2 = vld [vmem:[%s6507_s5] sm:$0xff]  ;;  %5711 = vmatprep.subr.msk.mxu1 %vm186_vm0, %v274_v1  ;;  %5707 = vmatpush3.msk.msra.mxu0 %vm186_vm0, %v159_v0  ;;  %v6718_v7 = vld [vmem:[%s6552_s14 + $0x10] sm:$0xff] }
  0x4a   :  { %5708 = vmatprep.mubr.msk.f32.mxu0 %vm179_vm1, %v155_v2  ;;  %v371_v4 = vld [vmem:[%s6532_s25] sm:$0xf]  ;;  %5712 = vmatpush3.msk.msra.mxu1 %vm186_vm0, %v274_v1 }
  0x4b   :  { %5713 = vmatprep.mubr.msk.f32.mxu1 %vm179_vm1, %v155_v2  ;;  %5709 = vmatmul.mubr.msk.f32.vlgmr.msra.gmra.mxu0 %vm179_vm1, %v156_v3 }
  0x4c   :  { %5714 = vmatmul.mubr.msk.f32.vlgmr.msra.gmra.mxu1 %vm179_vm1, %v156_v3  ;;  %5721 = vmatprep.subr.mxu1 %v6494_v6 }
  0x4d   :  { %5716 = vmatprep.subr.msk.mxu0 %vm186_vm0, %v371_v4  ;;  %5722 = vmatpush3.msra.mxu1 %v6711_v5 }
  0x4e   :  { %5717 = vmatpush3.msk.msra.mxu0 %vm186_vm0, %v371_v4 }
  0x4f   :  { %84 = vsyncpa [#allocation5], 0  ;;  %5723 = vmatprep.subr.mxu1 %v6494_v6  ;;  %5718 = vmatprep.mubr.msk.f32.mxu0 %vm179_vm1, %v155_v2  ;;  %v6725_v8 = vld [vmem:[%s6557_s19 + $0x18] sm:$0xff]  ;;  %v6728_v9 = vld [vmem:[%s6552_s14 + $0x8] sm:$0xff]  ;;  %vm6495_vm2 = vmmov 0   ;;  %v6496_v18 = vmov 0  }
  0x50   :  { %5724 = vmatpush3.msra.mxu1 %v6718_v7  ;;  %5732 = vmatprep.subr.mxu0 %v6494_v6  ;;  %v6735_v10 = vld [vmem:[%s6557_s19 + $0x10] sm:$0xff]  ;;  %v6738_v11 = vld [vmem:[%s6552_s14] sm:$0xff]  ;;  %v6745_v12 = vld [vmem:[%s6557_s19 + $0x8] sm:$0xff]  ;;  %s7774_s0 = sld [smem:[#allocation9_spill]]  ;;  %vm483_vm3 = vcmask 261120   ;;  %vm2652_vm4 = vcmask 64512  }
  0x51   :  { %5719 = vmatmul.mubr.msk.f32.vlgmr.msra.gmra.mxu0 %vm179_vm1, %v156_v3  ;;  %5725 = vmatprep.subr.mxu1 %v6494_v6  ;;  %v6753_v13 = vld [vmem:[%s6557_s19] sm:$0xff]  ;;  %v6758_v14 = vld [vmem:[%s6562_s24 + $0x18] sm:$0xff]  ;;  %v6766_v15 = vld [vmem:[%s6562_s24 + $0x10] sm:$0xff]  ;;  %s7775_s5 = sld [smem:[#allocation10_spill]]  ;;  %vm2629_vm5 = vcmask 58368   ;;  %vm2733_vm6 = vcmask 254976  }
  0x52   :  { %5733 = vmatpush3.msra.mxu0 %v6725_v8  ;;  %5726 = vmatpush3.msra.mxu1 %v6728_v9  ;;  %v158_v16 = vld [vmem:[%s6512_s9 + $0x8] sm:$0xff]  ;;  %v6780_v19 = vld [vmem:[%s6562_s24] sm:$0xff]  ;;  %s7777_s17 = sld [smem:[#allocation12_spill]]  ;;  %s6497_s28 = smov [#allocation2]  }
  0x53   :  { %5734 = vmatprep.subr.mxu0 %v6494_v6  ;;  %5727 = vmatprep.subr.mxu1 %v6494_v6  ;;  %v6773_v17 = vld [vmem:[%s6562_s24 + $0x8] sm:$0xff]  ;;  %v157_v20 = vld [vmem:[%s6512_s9] sm:$0xff]  ;;  %s7776_s9 = sld [smem:[#allocation11_spill]]  ;;  %s5289_s1 = sshll.u32 %s6497_s28, 4  ;;  %s5290_s1 = int_to_ptr.vmem [resolvable:$true] %s5289_s1 }
  0x54   :  { %5735 = vmatpush3.msra.mxu0 %v6735_v10  ;;  %5728 = vmatpush3.msra.mxu1 %v6738_v11  ;;  %v5353_v23 = vld [vmem:[%s6537_s29] ss:$0 sm:$0xff]  ;;  %s7778_s21 = sld [smem:[#allocation14_spill]]  ;;  %s6498_s2 = smov [#allocation4]  }
  0x55   :  { %5729 = vmatprep.mubr.msk.f32.mxu1 %vm6495_vm2, %v6494_v6  ;;  %5736 = vmatprep.subr.mxu0 %v6494_v6  ;;  %v5358_v24 = vld [vmem:[%s6542_s3] ss:$0 sm:$0xff]  ;;  %s7779_s25 = sld [smem:[#allocation16_spill]]  ;;  %s5299_s7 = sshll.u32 %s6498_s2, 4  ;;  %s5300_s7 = int_to_ptr.vmem [resolvable:$true] %s5299_s7 }
  0x56   :  { %5730 = vmatmul.mubr.f32.vlgmr.msra.gmra.mxu1 %v6494_v6  ;;  %5737 = vmatpush3.msra.mxu0 %v6745_v12  ;;  %v5363_v30 = vld [vmem:[%s6547_s8] ss:$0 sm:$0xff]  ;;  %s7780_s29 = sld [smem:[#allocation13_spill]]  ;;  %s6412_s10 = scalar_lea.vmem %s5290_s1, 32 }
  0x57   :  { %5738 = vmatprep.subr.mxu0 %v6494_v6  ;;  %5740 = vmatprep.mubr.msk.f32.mxu0 %vm6495_vm2, %v6494_v6  ;;  %v5357_v31 = vld [vmem:[%s6567_s30] ss:$0 sm:$0xff]  ;;  %s7781_s3 = sld [smem:[#allocation15_spill]]  ;;  %p6413_p0 = scmp.ne.s32.totalorder %s5290_s1, %s6412_s10 }
  0x58   :  { %5739 = vmatpush3.msra.mxu0 %v6753_v13  ;;  %5743 = vmatprep.subr.mxu1 %v6494_v6  ;;  %v5362_v32 = vld [vmem:[%s6572_s6] ss:$0 sm:$0xff]  ;;  %s7782_s8 = sld [smem:[#allocation17_spill]]  ;;  %p6417_p1 = scmp.lt.s32.totalorder %s5290_s1, %s5290_s1 }
  0x59   :  { %5741 = vmatmul.mubr.f32.vlgmr.msra.gmra.mxu0 %v6494_v6  ;;  %5744 = vmatpush3.msra.mxu1 %v6758_v14  ;;  %v5367_v43 = vld [vmem:[%s6577_s12] ss:$0 sm:$0xff]  ;;  %s7783_s14 = sld [smem:[#allocation18_spill]]  ;;  %p6418_p2 = scmp.lt.s32.totalorder %s6412_s10, %s6412_s10 }
  0x5a   :  { %5745 = vmatprep.subr.mxu1 %v6494_v6  ;;  %5751 = vmatprep.mubr.msk.f32.mxu1 %vm6495_vm2, %v6494_v6  ;;  %v6824_v51 = vld [vmem:[%s7774_s0] ss:$0 sm:$0xff]  ;;  %s7784_s19 = sld [smem:[#allocation21_spill]] }
  0x5b   :  { %5746 = vmatpush3.msra.mxu1 %v6766_v15  ;;  %6270 = vset.pattern.permute.xlu0 %v6496_v18  ;;  %v6832_v61 = vld [vmem:[%s7775_s5] ss:$0 sm:$0xff]  ;;  %s7785_s24 = sld [smem:[#allocation19_spill]]  ;;  %p6419_p3 = por %p6418_p2, %p6417_p1 }
  0x5c   :  { %5747 = vmatprep.subr.mxu1 %v6494_v6  ;;  %168 = vperm.xlu0 %6270, %v158_v16   ;;  %v6836_v4 = vld [vmem:[%s7776_s9] ss:$0 sm:$0xff]  ;;  %s7786_s30 = sld [smem:[#allocation20_spill]] }
  0x5d   :  { %5748 = vmatpush3.msra.mxu1 %v6773_v17  ;;  %5754 = vmatprep.subr.mxu0 %v6494_v6  ;;  %s7787_s6 = sld [smem:[#allocation22_spill]]  ;;  %p6420_p4 = pnand %p6419_p3, %p6413_p0 }
  0x5e   :  { %5749 = vmatprep.subr.mxu1 %v6494_v6  ;;  %5755 = vmatpush3.msra.mxu0 %v6711_v5  ;;  %s7788_s12 = sld [smem:[#allocation8_spill]] }
  0x5f   :  { %5750 = vmatpush3.msra.mxu1 %v6780_v19  ;;  %5756 = vmatprep.subr.mxu0 %v6494_v6  ;;  %s7789_s15 = sld [smem:[#allocation23_spill]] }
  0x60   :  { %5752 = vmatmul.mubr.f32.vlgmr.msra.gmra.mxu1 %v6494_v6  ;;  %163 = vperm.xlu0 %6270, %v157_v20   ;;  %s7790_s16 = sld [smem:[#allocation24_spill]] }
  0x61   :  { %5765 = vmatprep.subr.mxu1 %v6494_v6  ;;  %5757 = vmatpush3.msra.mxu0 %v6718_v7  ;;  %s7791_s18 = sld [smem:[#allocation25_spill]] }
  0x62   :  { %5766 = vmatpush3.msra.mxu1 %v6725_v8  ;;  %5758 = vmatprep.subr.mxu0 %v6494_v6  ;;  %s7792_s22 = sld [smem:[#allocation26_spill]] }
  0x63   :  { %5767 = vmatprep.subr.mxu1 %v6494_v6  ;;  %5759 = vmatpush3.msra.mxu0 %v6728_v9  ;;  %s7793_s23 = sld [smem:[#allocation27_spill]] }
  0x64   :  { %5768 = vmatpush3.msra.mxu1 %v6735_v10  ;;  %5760 = vmatprep.subr.mxu0 %v6494_v6  ;;  %s7794_s26 = sld [smem:[#allocation28_spill]] }
  0x65   :  { %5769 = vmatprep.subr.mxu1 %v6494_v6  ;;  %5761 = vmatpush3.msra.mxu0 %v6738_v11 }
  0x66   :  { %5770 = vmatpush3.msra.mxu1 %v6745_v12  ;;  %5762 = vmatprep.mubr.msk.f32.mxu0 %vm6495_vm2, %v6494_v6 }
  0x67   :  { %5771 = vmatprep.subr.mxu1 %v6494_v6  ;;  %5773 = vmatprep.mubr.msk.f32.mxu1 %vm6495_vm2, %v6494_v6 }
  0x68   :  { %5772 = vmatpush3.msra.mxu1 %v6753_v13  ;;  %5776 = vmatprep.subr.mxu0 %v6494_v6 }
  0x69   :  { %5787 = vmatprep.subr.mxu1 %v6494_v6  ;;  %6271 = vset.pattern.permute.xlu1 %v6496_v18 }
  0xd7   :  { %v169_v21 = vpop.permute.xlu0 %168 }
  0xd8   :  { %v178_v29 = vmul.f32 %v5353_v23, %v169_v21  ;;  %v283_v42 = vmul.f32 %v5358_v24, %v169_v21  ;;  %v380_v16 = vmul.f32 %v5363_v30, %v169_v21 }
  0xdb   :  { %v164_v22 = vpop.permute.xlu0 %163 }
  0xdc   :  { %v177_v25 = vmul.f32 %v5353_v23, %v164_v22  ;;  %v282_v26 = vmul.f32 %v5358_v24, %v164_v22  ;;  %v379_v37 = vmul.f32 %v5363_v30, %v164_v22 }
 0x10b   :  { %v5710_v27 = vpop.f32.mrf.mxu0 }
 0x10c   :  { %v5715_v28 = vpop.f32.mrf.mxu1  ;;  %v262_v38 = vadd.f32 %v5710_v27, %v178_v29 }
 0x10d   :  { %v256_v33 = vpop.f32.mrf.mxu0  ;;  %v359_v49 = vadd.f32 %v5715_v28, %v283_v42 }
 0x10e   :  { %v353_v34 = vpop.f32.mrf.mxu1  ;;  %v257_v35 = vadd.f32 %v256_v33, %v177_v25  ;;  %v6819_v46 = vadd.f32 %v5357_v31, %v262_v38 }
 0x10f   :  { %v354_v36 = vadd.f32 %v353_v34, %v282_v26  ;;  %v6827_v56 = vadd.f32 %v5362_v32, %v359_v49 }
 0x110   :  { %v6814_v39 = vadd.f32 %v5357_v31, %v257_v35 }
 0x111   :  { %v6816_v40 = vadd.f32 %v5362_v32, %v354_v36  ;;  %v5720_v41 = vpop.f32.mrf.mxu0 }
 0x112   :  { %v456_v22 = vadd.f32 %v5720_v41, %v380_v16 }
 0x113   :  { %v450_v44 = vpop.f32.mrf.mxu0 }
 0x114   :  { %v451_v45 = vadd.f32 %v450_v44, %v379_v37  ;;  %v6839_v26 = vadd.f32 %v5367_v43, %v456_v22 }
 0x116   :  { %v6821_v47 = vadd.f32 %v5367_v43, %v451_v45  ;;  %v553_v48 = vpop.f32.mrf.mxu1 }
 0x117   :  { %v558_v50 = vrot.slane %v553_v48, 2 }
 0x118   :  { %v5731_v52 = vpop.f32.mrf.mxu1 }
 0x119   :  { %v560_v53 = vadd.f32 %v558_v50, %v6819_v46  ;;  %v640_v54 = vpop.f32.mrf.mxu0 }
 0x11a   :  { %v645_v55 = vrot.slane %v640_v54, 2 }
 0x11b   :  { %v567_v57 = vadd.f32 %v6824_v51, %v560_v53  ;;  %v5742_v58 = vpop.f32.mrf.mxu0 }
 0x11c   :  { %v647_v60 = vadd.f32 %v645_v55, %v6827_v56 }
 0x11d   :  { %v5369_v59 = vmul.f32 -1.442695, %v567_v57 }
 0x11e   :  { %v654_v63 = vadd.f32 %v6832_v61, %v647_v60 }
 0x11f   :  { %6272 = vpow2.f32 %v5369_v59 }
 0x120   :  { %v733_v62 = vpop.f32.mrf.mxu1  ;;  %v5371_v1 = vmul.f32 -1.442695, %v654_v63 }
 0x121   :  { %v734_v18 = vadd.f32 %v6836_v4, %v733_v62 }
 0x122   :  { %v5753_v0 = vpop.f32.mrf.mxu1  ;;  %6274 = vpow2.f32 %v5371_v1 }
 0x123   :  { %v738_v24 = vrot.slane %v734_v18, 2 }
 0x12c   :  { %v6273_v2 = vpop.eup %6272 }
 0x12d   :  { %v571_v3 = vadd.f32 1.0, %v6273_v2 }
 0x12f   :  { %6276 = vrcp.f32 %v571_v3  ;;  %v6275_v20 = vpop.eup %6274 }
 0x130   :  { %v658_v23 = vadd.f32 1.0, %v6275_v20 }
 0x132   :  { %6278 = vrcp.f32 %v658_v23 }
 0x13c   :  { %v6277_v25 = vpop.eup %6276 }
 0x13d   :  { %v740_v27 = vmul.f32 %v6277_v25, %v738_v24 }
 0x13f   :  { %v741_v28 = vadd.f32 %v740_v27, %v6839_v26  ;;  %v6279_v29 = vpop.eup %6278 }
 0x140   :  { %v743_v31 = vsub.f32 1.0, %v6279_v29  ;;  %v745_v34 = vmul.f32 0.0, %v6279_v29 }
 0x141   :  { %6280 = vtanh.f32 %v741_v28 }
 0x14e   :  { %v6281_v32 = vpop.eup %6280 }
 0x14f   :  { %v744_v33 = vmul.f32 %v6281_v32, %v743_v31 }
 0x151   :  { %v6842_v21 = vadd.f32 %v745_v34, %v744_v33 }
 0x153   :  { %v748_v30 = vrot.slane %v6842_v21, 6  ;;  %v991_v2 = vrot.slane %v6842_v21, 2 }
 0x155   :  { %5763 = vmatmul.mubr.msk.f32.vlgmr.msra.gmra.mxu0 %vm483_vm3, %v748_v30  ;;  %5774 = vmatmul.mubr.msk.f32.vlgmr.msra.gmra.mxu1 %vm483_vm3, %v748_v30 }
 0x156   :  { %5777 = vmatpush3.msra.mxu0 %v6758_v14  ;;  %5784 = vmatprep.mubr.msk.f32.mxu0 %vm6495_vm2, %v6494_v6 }
 0x157   :  { %5778 = vmatprep.subr.mxu0 %v6494_v6  ;;  %5788 = vmatpush3.msra.mxu1 %v6711_v5 }
 0x158   :  { %5779 = vmatpush3.msra.mxu0 %v6766_v15  ;;  %5789 = vmatprep.subr.mxu1 %v6494_v6 }
 0x159   :  { %5780 = vmatprep.subr.mxu0 %v6494_v6  ;;  %5790 = vmatpush3.msra.mxu1 %v6718_v7 }
 0x15a   :  { %5781 = vmatpush3.msra.mxu0 %v6773_v17  ;;  %5791 = vmatprep.subr.mxu1 %v6494_v6 }
 0x15b   :  { %5782 = vmatprep.subr.mxu0 %v6494_v6  ;;  %5792 = vmatpush3.msra.mxu1 %v6728_v9 }
 0x15c   :  { %5783 = vmatpush3.msra.mxu0 %v6780_v19  ;;  %5793 = vmatprep.subr.mxu1 %v6494_v6 }
 0x15d   :  { %5785 = vmatmul.mubr.msk.f32.vlgmr.msra.gmra.mxu0 %vm483_vm3, %v748_v30  ;;  %5798 = vmatprep.subr.mxu0 %v6494_v6 }
 0x15e   :  { %5799 = vmatpush3.msra.mxu0 %v6725_v8  ;;  %5794 = vmatpush3.msra.mxu1 %v6738_v11 }
 0x15f   :  { %5800 = vmatprep.subr.mxu0 %v6494_v6  ;;  %5795 = vmatprep.mubr.msk.f32.mxu1 %vm6495_vm2, %v6494_v6 }
 0x160   :  { %5801 = vmatpush3.msra.mxu0 %v6735_v10  ;;  %5806 = vmatprep.mubr.msk.f32.mxu0 %vm6495_vm2, %v6494_v6 }
 0x161   :  { %5802 = vmatprep.subr.mxu0 %v6494_v6  ;;  %5809 = vmatprep.subr.mxu1 %v6494_v6 }
 0x162   :  { %5803 = vmatpush3.msra.mxu0 %v6745_v12 }
 0x163   :  { %5804 = vmatprep.subr.mxu0 %v6494_v6 }
 0x164   :  { %5805 = vmatpush3.msra.mxu0 %v6753_v13 }
 0x165   :  { %5820 = vmatprep.subr.mxu0 %v6494_v6 }
 0x215   :  { %v817_v35 = vpop.f32.mrf.mxu0  ;;  %v898_v36 = vpop.f32.mrf.mxu1 }
 0x216   :  { %v822_v37 = vrot.slane %v817_v35, 4  ;;  %v903_v43 = vrot.slane %v898_v36, 4 }
 0x217   :  { %v5764_v38 = vpop.f32.mrf.mxu0  ;;  %v5775_v41 = vpop.f32.mrf.mxu1 }
 0x218   :  { %v824_v42 = vadd.f32 %v822_v37, %v6819_v46  ;;  %v905_v48 = vadd.f32 %v903_v43, %v6827_v56 }
 0x21a   :  { %v825_v44 = vadd.f32 %v6824_v51, %v824_v42  ;;  %v906_v52 = vadd.f32 %v6832_v61, %v905_v48 }
 0x21c   :  { %v5374_v45 = vmul.f32 -1.442695, %v825_v44  ;;  %v5376_v53 = vmul.f32 -1.442695, %v906_v52 }
 0x21d   :  { %v979_v49 = vpop.f32.mrf.mxu0 }
 0x21e   :  { %6282 = vpow2.f32 %v5374_v45  ;;  %v980_v58 = vadd.f32 %v6836_v4, %v979_v49 }
 0x21f   :  { %v5786_v50 = vpop.f32.mrf.mxu0  ;;  %6284 = vpow2.f32 %v5376_v53 }
 0x220   :  { %v984_v60 = vrot.slane %v980_v58, 4 }
 0x22b   :  { %v6283_v54 = vpop.eup %6282 }
 0x22c   :  { %v829_v55 = vadd.f32 1.0, %v6283_v54  ;;  %v6285_v57 = vpop.eup %6284 }
 0x22d   :  { %v910_v59 = vadd.f32 1.0, %v6285_v57 }
 0x22e   :  { %6286 = vrcp.f32 %v829_v55 }
 0x22f   :  { %6288 = vrcp.f32 %v910_v59 }
 0x23b   :  { %v6287_v62 = vpop.eup %6286 }
 0x23c   :  { %v986_v63 = vmul.f32 %v6287_v62, %v984_v60  ;;  %v6289_v1 = vpop.eup %6288 }
 0x23d   :  { %v989_v3 = vsub.f32 1.0, %v6289_v1  ;;  %v993_v20 = vmul.f32 %v6289_v1, %v991_v2 }
 0x23e   :  { %v987_v0 = vadd.f32 %v986_v63, %v6839_v26 }
 0x240   :  { %6290 = vtanh.f32 %v987_v0 }
 0x24d   :  { %v6291_v16 = vpop.eup %6290 }
 0x24e   :  { %v990_v18 = vmul.f32 %v6291_v16, %v989_v3 }
 0x250   :  { %v6885_v22 = vadd.f32 %v993_v20, %v990_v18 }
 0x252   :  { %v996_v23 = vrot.slane %v6885_v22, 4  ;;  %v1239_v53 = vrot.slane %v6885_v22, 2 }
 0x254   :  { %5796 = vmatmul.mubr.msk.f32.vlgmr.msra.gmra.mxu1 %vm483_vm3, %v996_v23  ;;  %5807 = vmatmul.mubr.msk.f32.vlgmr.msra.gmra.mxu0 %vm483_vm3, %v996_v23 }
 0x255   :  { %5810 = vmatpush3.msra.mxu1 %v6758_v14  ;;  %5817 = vmatprep.mubr.msk.f32.mxu1 %vm6495_vm2, %v6494_v6 }
 0x256   :  { %5811 = vmatprep.subr.mxu1 %v6494_v6  ;;  %5821 = vmatpush3.msra.mxu0 %v6711_v5 }
 0x257   :  { %5812 = vmatpush3.msra.mxu1 %v6766_v15  ;;  %5822 = vmatprep.subr.mxu0 %v6494_v6 }
 0x258   :  { %5813 = vmatprep.subr.mxu1 %v6494_v6  ;;  %5823 = vmatpush3.msra.mxu0 %v6718_v7 }
 0x259   :  { %5814 = vmatpush3.msra.mxu1 %v6773_v17  ;;  %5824 = vmatprep.subr.mxu0 %v6494_v6 }
 0x25a   :  { %5815 = vmatprep.subr.mxu1 %v6494_v6  ;;  %5825 = vmatpush3.msra.mxu0 %v6728_v9 }
 0x25b   :  { %5816 = vmatpush3.msra.mxu1 %v6780_v19  ;;  %5826 = vmatprep.subr.mxu0 %v6494_v6 }
 0x25c   :  { %5818 = vmatmul.mubr.msk.f32.vlgmr.msra.gmra.mxu1 %vm483_vm3, %v996_v23  ;;  %5831 = vmatprep.subr.mxu1 %v6494_v6 }
 0x25d   :  { %5832 = vmatpush3.msra.mxu1 %v6725_v8  ;;  %5827 = vmatpush3.msra.mxu0 %v6738_v11 }
 0x25e   :  { %5833 = vmatprep.subr.mxu1 %v6494_v6  ;;  %5828 = vmatprep.mubr.msk.f32.mxu0 %vm6495_vm2, %v6494_v6 }
 0x25f   :  { %5834 = vmatpush3.msra.mxu1 %v6735_v10  ;;  %5839 = vmatprep.mubr.msk.f32.mxu1 %vm6495_vm2, %v6494_v6 }
 0x260   :  { %5835 = vmatprep.subr.mxu1 %v6494_v6  ;;  %5842 = vmatprep.subr.mxu0 %v6494_v6 }
 0x261   :  { %5836 = vmatpush3.msra.mxu1 %v6745_v12 }
 0x262   :  { %5837 = vmatprep.subr.mxu1 %v6494_v6 }
 0x263   :  { %5838 = vmatpush3.msra.mxu1 %v6753_v13 }
 0x264   :  { %5853 = vmatprep.subr.mxu1 %v6494_v6 }
 0x314   :  { %v1065_v24 = vpop.f32.mrf.mxu1  ;;  %v1146_v25 = vpop.f32.mrf.mxu0 }
 0x315   :  { %v1070_v27 = vrot.slane %v1065_v24, 6  ;;  %v1151_v32 = vrot.slane %v1146_v25, 6 }
 0x316   :  { %v5797_v28 = vpop.f32.mrf.mxu1  ;;  %v5808_v29 = vpop.f32.mrf.mxu0 }
 0x317   :  { %v1072_v31 = vadd.f32 %v1070_v27, %v6819_v46  ;;  %v1153_v21 = vadd.f32 %v1151_v32, %v6827_v56 }
 0x319   :  { %v1073_v33 = vadd.f32 %v6824_v51, %v1072_v31  ;;  %v1154_v36 = vadd.f32 %v6832_v61, %v1153_v21 }
 0x31b   :  { %v5379_v34 = vmul.f32 -1.442695, %v1073_v33  ;;  %v5381_v37 = vmul.f32 -1.442695, %v1154_v36 }
 0x31c   :  { %v1227_v30 = vpop.f32.mrf.mxu1 }
 0x31d   :  { %6292 = vpow2.f32 %v5379_v34  ;;  %v1228_v43 = vadd.f32 %v6836_v4, %v1227_v30 }
 0x31e   :  { %v5819_v35 = vpop.f32.mrf.mxu1  ;;  %6294 = vpow2.f32 %v5381_v37 }
 0x31f   :  { %v1232_v45 = vrot.slane %v1228_v43, 6 }
 0x32a   :  { %v6293_v38 = vpop.eup %6292 }
 0x32b   :  { %v1077_v41 = vadd.f32 1.0, %v6293_v38  ;;  %v6295_v42 = vpop.eup %6294 }
 0x32c   :  { %v1158_v44 = vadd.f32 1.0, %v6295_v42 }
 0x32d   :  { %6296 = vrcp.f32 %v1077_v41 }
 0x32e   :  { %6298 = vrcp.f32 %v1158_v44 }
 0x33a   :  { %v6297_v48 = vpop.eup %6296 }
 0x33b   :  { %v1234_v49 = vmul.f32 %v6297_v48, %v1232_v45  ;;  %v6299_v52 = vpop.eup %6298 }
 0x33c   :  { %v1237_v54 = vsub.f32 1.0, %v6299_v52  ;;  %v1241_v58 = vmul.f32 %v6299_v52, %v1239_v53 }
 0x33d   :  { %v1235_v50 = vadd.f32 %v1234_v49, %v6839_v26 }
 0x33f   :  { %6300 = vtanh.f32 %v1235_v50 }
 0x34c   :  { %v6301_v55 = vpop.eup %6300 }
 0x34d   :  { %v1238_v57 = vmul.f32 %v6301_v55, %v1237_v54 }
 0x34f   :  { %v1242_v59 = vadd.f32 %v1241_v58, %v1238_v57 }
 0x351   :  { %v1244_v60 = vrot.slane %v1242_v59, 2 }
 0x353   :  { %5829 = vmatmul.mubr.msk.f32.vlgmr.msra.gmra.mxu0 %vm483_vm3, %v1244_v60  ;;  %5840 = vmatmul.mubr.msk.f32.vlgmr.msra.gmra.mxu1 %vm483_vm3, %v1244_v60 }
 0x354   :  { %5843 = vmatpush3.msra.mxu0 %v6758_v14  ;;  %5850 = vmatprep.mubr.msk.f32.mxu0 %vm6495_vm2, %v6494_v6 }
 0x355   :  { %5844 = vmatprep.subr.mxu0 %v6494_v6  ;;  %5854 = vmatpush3.msra.mxu1 %v6711_v5 }
 0x356   :  { %5845 = vmatpush3.msra.mxu0 %v6766_v15  ;;  %5855 = vmatprep.subr.mxu1 %v6494_v6 }
 0x357   :  { %5846 = vmatprep.subr.mxu0 %v6494_v6  ;;  %5856 = vmatpush3.msra.mxu1 %v6718_v7 }
 0x358   :  { %5847 = vmatpush3.msra.mxu0 %v6773_v17  ;;  %5857 = vmatprep.subr.mxu1 %v6494_v6 }
 0x359   :  { %5848 = vmatprep.subr.mxu0 %v6494_v6  ;;  %5858 = vmatpush3.msra.mxu1 %v6728_v9 }
 0x35a   :  { %5849 = vmatpush3.msra.mxu0 %v6780_v19  ;;  %5859 = vmatprep.subr.mxu1 %v6494_v6 }
 0x35b   :  { %5851 = vmatmul.mubr.msk.f32.vlgmr.msra.gmra.mxu0 %vm483_vm3, %v1244_v60  ;;  %5864 = vmatprep.subr.mxu0 %v6494_v6 }
 0x35c   :  { %5865 = vmatpush3.msra.mxu0 %v6725_v8  ;;  %5860 = vmatpush3.msra.mxu1 %v6738_v11 }
 0x35d   :  { %5866 = vmatprep.subr.mxu0 %v6494_v6  ;;  %5861 = vmatprep.mubr.msk.f32.mxu1 %vm6495_vm2, %v6494_v6 }
 0x35e   :  { %5867 = vmatpush3.msra.mxu0 %v6735_v10  ;;  %5872 = vmatprep.mubr.msk.f32.mxu0 %vm6495_vm2, %v6494_v6 }
 0x35f   :  { %5868 = vmatprep.subr.mxu0 %v6494_v6  ;;  %5875 = vmatprep.subr.mxu1 %v6494_v6 }
 0x360   :  { %5869 = vmatpush3.msra.mxu0 %v6745_v12 }
 0x361   :  { %5870 = vmatprep.subr.mxu0 %v6494_v6 }
 0x362   :  { %5871 = vmatpush3.msra.mxu0 %v6753_v13 }
 0x363   :  { %5886 = vmatprep.subr.mxu0 %v6494_v6 }
 0x413   :  { %v1313_v62 = vpop.f32.mrf.mxu0  ;;  %v1391_v63 = vpop.f32.mrf.mxu1 }
 0x414   :  { %v1317_v0 = vadd.f32 %v1313_v62, %v6819_v46  ;;  %v1395_v18 = vadd.f32 %v1391_v63, %v6827_v56 }
 0x415   :  { %v5830_v1 = vpop.f32.mrf.mxu0  ;;  %v5841_v2 = vpop.f32.mrf.mxu1 }
 0x416   :  { %v1318_v3 = vadd.f32 %v6824_v51, %v1317_v0  ;;  %v1396_v22 = vadd.f32 %v6832_v61, %v1395_v18 }
 0x418   :  { %v5384_v16 = vmul.f32 -1.442695, %v1318_v3  ;;  %v5386_v24 = vmul.f32 -1.442695, %v1396_v22 }
 0x41a   :  { %6302 = vpow2.f32 %v5384_v16 }
 0x41b   :  { %v1469_v20 = vpop.f32.mrf.mxu0  ;;  %6304 = vpow2.f32 %v5386_v24 }
 0x41c   :  { %v1470_v46 = vadd.f32 %v6836_v4, %v1469_v20 }
 0x41d   :  { %v5852_v23 = vpop.f32.mrf.mxu0 }
 0x427   :  { %v6303_v25 = vpop.eup %6302 }
 0x428   :  { %v1322_v27 = vadd.f32 1.0, %v6303_v25  ;;  %v6305_v28 = vpop.eup %6304 }
 0x429   :  { %v1400_v29 = vadd.f32 1.0, %v6305_v28 }
 0x42a   :  { %6306 = vrcp.f32 %v1322_v27 }
 0x42b   :  { %6308 = vrcp.f32 %v1400_v29 }
 0x437   :  { %v6307_v31 = vpop.eup %6306 }
 0x438   :  { %v1473_v32 = vmul.f32 %v6307_v31, %v1470_v46  ;;  %v6309_v56 = vpop.eup %6308 }
 0x439   :  { %v1476_v34 = vsub.f32 1.0, %v6309_v56  ;;  %v1479_v35 = vmul.f32 %v6309_v56, %v1244_v60 }
 0x43a   :  { %v1474_v33 = vadd.f32 %v1473_v32, %v6839_v26 }
 0x43c   :  { %6310 = vtanh.f32 %v1474_v33 }
 0x449   :  { %v6311_v21 = vpop.eup %6310 }
 0x44a   :  { %v1477_v30 = vmul.f32 %v6311_v21, %v1476_v34 }
 0x44c   :  { %v6967_v36 = vadd.f32 %v1479_v35, %v1477_v30 }
 0x44e   :  { %5862 = vmatmul.mubr.msk.f32.vlgmr.msra.gmra.mxu1 %vm483_vm3, %v6967_v36  ;;  %5873 = vmatmul.mubr.msk.f32.vlgmr.msra.gmra.mxu0 %vm483_vm3, %v6967_v36  ;;  %v1724_v16 = vrot.slane %v6967_v36, 2 }
 0x44f   :  { %5876 = vmatpush3.msra.mxu1 %v6758_v14  ;;  %5883 = vmatprep.mubr.msk.f32.mxu1 %vm6495_vm2, %v6494_v6 }
 0x450   :  { %5877 = vmatprep.subr.mxu1 %v6494_v6  ;;  %5887 = vmatpush3.msra.mxu0 %v6711_v5 }
 0x451   :  { %5878 = vmatpush3.msra.mxu1 %v6766_v15  ;;  %5888 = vmatprep.subr.mxu0 %v6494_v6 }
 0x452   :  { %5879 = vmatprep.subr.mxu1 %v6494_v6  ;;  %5889 = vmatpush3.msra.mxu0 %v6718_v7 }
 0x453   :  { %5880 = vmatpush3.msra.mxu1 %v6773_v17  ;;  %5890 = vmatprep.subr.mxu0 %v6494_v6 }
 0x454   :  { %5881 = vmatprep.subr.mxu1 %v6494_v6  ;;  %5891 = vmatpush3.msra.mxu0 %v6728_v9 }
 0x455   :  { %5882 = vmatpush3.msra.mxu1 %v6780_v19  ;;  %5892 = vmatprep.subr.mxu0 %v6494_v6 }
 0x456   :  { %5884 = vmatmul.mubr.msk.f32.vlgmr.msra.gmra.mxu1 %vm483_vm3, %v6967_v36  ;;  %5897 = vmatprep.subr.mxu1 %v6494_v6 }
 0x457   :  { %5898 = vmatpush3.msra.mxu1 %v6725_v8  ;;  %5893 = vmatpush3.msra.mxu0 %v6738_v11 }
 0x458   :  { %5899 = vmatprep.subr.mxu1 %v6494_v6  ;;  %5894 = vmatprep.mubr.msk.f32.mxu0 %vm6495_vm2, %v6494_v6 }
 0x459   :  { %5900 = vmatpush3.msra.mxu1 %v6735_v10  ;;  %5905 = vmatprep.mubr.msk.f32.mxu1 %vm6495_vm2, %v6494_v6 }
 0x45a   :  { %5901 = vmatprep.subr.mxu1 %v6494_v6  ;;  %5908 = vmatprep.subr.mxu0 %v6494_v6 }
 0x45b   :  { %5902 = vmatpush3.msra.mxu1 %v6745_v12 }
 0x45c   :  { %5903 = vmatprep.subr.mxu1 %v6494_v6 }
 0x45d   :  { %5904 = vmatpush3.msra.mxu1 %v6753_v13 }
 0x45e   :  { %5919 = vmatprep.subr.mxu1 %v6494_v6 }
 0x50e   :  { %v1550_v26 = vpop.f32.mrf.mxu1  ;;  %v1631_v37 = vpop.f32.mrf.mxu0 }
 0x50f   :  { %v1555_v38 = vrot.slane %v1550_v26, 2  ;;  %v1636_v44 = vrot.slane %v1631_v37, 2 }
 0x510   :  { %v5863_v41 = vpop.f32.mrf.mxu1  ;;  %v5874_v42 = vpop.f32.mrf.mxu0 }
 0x511   :  { %v1557_v43 = vadd.f32 %v1555_v38, %v6814_v39  ;;  %v1638_v49 = vadd.f32 %v1636_v44, %v6816_v40 }
 0x513   :  { %v1558_v45 = vadd.f32 %v6824_v51, %v1557_v43  ;;  %v1639_v53 = vadd.f32 %v6832_v61, %v1638_v49 }
 0x515   :  { %v5389_v48 = vmul.f32 -1.442695, %v1558_v45  ;;  %v5391_v54 = vmul.f32 -1.442695, %v1639_v53 }
 0x516   :  { %v1712_v50 = vpop.f32.mrf.mxu1 }
 0x517   :  { %6312 = vpow2.f32 %v5389_v48  ;;  %v1713_v59 = vadd.f32 %v6836_v4, %v1712_v50 }
 0x518   :  { %v5885_v52 = vpop.f32.mrf.mxu1  ;;  %6314 = vpow2.f32 %v5391_v54 }
 0x519   :  { %v1717_v62 = vrot.slane %v1713_v59, 2 }
 0x524   :  { %v6313_v55 = vpop.eup %6312 }
 0x525   :  { %v1562_v57 = vadd.f32 1.0, %v6313_v55  ;;  %v6315_v58 = vpop.eup %6314 }
 0x526   :  { %v1643_v60 = vadd.f32 1.0, %v6315_v58 }
 0x527   :  { %6316 = vrcp.f32 %v1562_v57 }
 0x528   :  { %6318 = vrcp.f32 %v1643_v60 }
 0x534   :  { %v6317_v63 = vpop.eup %6316 }
 0x535   :  { %v1719_v0 = vmul.f32 %v6317_v63, %v1717_v62  ;;  %v6319_v2 = vpop.eup %6318 }
 0x536   :  { %v1722_v3 = vsub.f32 1.0, %v6319_v2  ;;  %v1726_v22 = vmul.f32 %v6319_v2, %v1724_v16 }
 0x537   :  { %v1720_v1 = vadd.f32 %v1719_v0, %v6821_v47 }
 0x539   :  { %6320 = vtanh.f32 %v1720_v1 }
 0x546   :  { %v6321_v18 = vpop.eup %6320 }
 0x547   :  { %v1723_v20 = vmul.f32 %v6321_v18, %v1722_v3 }
 0x549   :  { %v7012_v23 = vadd.f32 %v1726_v22, %v1723_v20 }
 0x54b   :  { %v1729_v24 = vrot.slane %v7012_v23, 6  ;;  %v1972_v50 = vrot.slane %v7012_v23, 2 }
 0x54d   :  { %5895 = vmatmul.mubr.msk.f32.vlgmr.msra.gmra.mxu0 %vm483_vm3, %v1729_v24  ;;  %5906 = vmatmul.mubr.msk.f32.vlgmr.msra.gmra.mxu1 %vm483_vm3, %v1729_v24 }
 0x54e   :  { %5909 = vmatpush3.msra.mxu0 %v6758_v14  ;;  %5916 = vmatprep.mubr.msk.f32.mxu0 %vm6495_vm2, %v6494_v6 }
 0x54f   :  { %5910 = vmatprep.subr.mxu0 %v6494_v6  ;;  %5920 = vmatpush3.msra.mxu1 %v6711_v5 }
 0x550   :  { %5911 = vmatpush3.msra.mxu0 %v6766_v15  ;;  %5921 = vmatprep.subr.mxu1 %v6494_v6 }
 0x551   :  { %5912 = vmatprep.subr.mxu0 %v6494_v6  ;;  %5922 = vmatpush3.msra.mxu1 %v6718_v7 }
 0x552   :  { %5913 = vmatpush3.msra.mxu0 %v6773_v17  ;;  %5923 = vmatprep.subr.mxu1 %v6494_v6 }
 0x553   :  { %5914 = vmatprep.subr.mxu0 %v6494_v6  ;;  %5924 = vmatpush3.msra.mxu1 %v6728_v9 }
 0x554   :  { %5915 = vmatpush3.msra.mxu0 %v6780_v19  ;;  %5925 = vmatprep.subr.mxu1 %v6494_v6 }
 0x555   :  { %5917 = vmatmul.mubr.msk.f32.vlgmr.msra.gmra.mxu0 %vm483_vm3, %v1729_v24  ;;  %5930 = vmatprep.subr.mxu0 %v6494_v6 }
 0x556   :  { %5931 = vmatpush3.msra.mxu0 %v6725_v8  ;;  %5926 = vmatpush3.msra.mxu1 %v6738_v11 }
 0x557   :  { %5932 = vmatprep.subr.mxu0 %v6494_v6  ;;  %5927 = vmatprep.mubr.msk.f32.mxu1 %vm6495_vm2, %v6494_v6 }
 0x558   :  { %5933 = vmatpush3.msra.mxu0 %v6735_v10  ;;  %5938 = vmatprep.mubr.msk.f32.mxu0 %vm6495_vm2, %v6494_v6 }
 0x559   :  { %5934 = vmatprep.subr.mxu0 %v6494_v6  ;;  %5941 = vmatprep.subr.mxu1 %v6494_v6 }
 0x55a   :  { %5935 = vmatpush3.msra.mxu0 %v6745_v12 }
 0x55b   :  { %5936 = vmatprep.subr.mxu0 %v6494_v6 }
 0x55c   :  { %5937 = vmatpush3.msra.mxu0 %v6753_v13 }
 0x55d   :  { %5952 = vmatprep.subr.mxu0 %v6494_v6 }
 0x60d   :  { %v1798_v25 = vpop.f32.mrf.mxu0  ;;  %v1879_v27 = vpop.f32.mrf.mxu1 }
 0x60e   :  { %v1803_v28 = vrot.slane %v1798_v25, 4  ;;  %v1884_v32 = vrot.slane %v1879_v27, 4 }
 0x60f   :  { %v5896_v29 = vpop.f32.mrf.mxu0  ;;  %v5907_v46 = vpop.f32.mrf.mxu1 }
 0x610   :  { %v1805_v31 = vadd.f32 %v1803_v28, %v6814_v39  ;;  %v1886_v34 = vadd.f32 %v1884_v32, %v6816_v40 }
 0x612   :  { %v1806_v33 = vadd.f32 %v6824_v51, %v1805_v31  ;;  %v1887_v35 = vadd.f32 %v6832_v61, %v1886_v34  ;;  %v2466_v34 = vld [vmem:[%s7777_s17 + $0x10] sm:$0xff] }
 0x614   :  { %v5394_v56 = vmul.f32 -1.442695, %v1806_v33  ;;  %v5396_v36 = vmul.f32 -1.442695, %v1887_v35  ;;  %v2548_v35 = vld [vmem:[%s7778_s21] sm:$0xff] }
 0x615   :  { %v1960_v21 = vpop.f32.mrf.mxu0 }
 0x616   :  { %6322 = vpow2.f32 %v5394_v56  ;;  %v1961_v41 = vadd.f32 %v6836_v4, %v1960_v21  ;;  %v2549_v21 = vld [vmem:[%s7778_s21 + $0x8] sm:$0xff] }
 0x617   :  { %v5918_v30 = vpop.f32.mrf.mxu0  ;;  %6324 = vpow2.f32 %v5396_v36 }
 0x618   :  { %v1965_v43 = vrot.slane %v1961_v41, 4  ;;  %v2464_v30 = vld [vmem:[%s7777_s17] sm:$0xff] }
 0x623   :  { %v6323_v26 = vpop.eup %6322 }
 0x624   :  { %v1810_v37 = vadd.f32 1.0, %v6323_v26  ;;  %v6325_v38 = vpop.eup %6324 }
 0x625   :  { %v1891_v42 = vadd.f32 1.0, %v6325_v38 }
 0x626   :  { %6326 = vrcp.f32 %v1810_v37 }
 0x627   :  { %6328 = vrcp.f32 %v1891_v42 }
 0x633   :  { %v6327_v44 = vpop.eup %6326 }
 0x634   :  { %v1967_v45 = vmul.f32 %v6327_v44, %v1965_v43  ;;  %v6329_v49 = vpop.eup %6328 }
 0x635   :  { %v1970_v52 = vsub.f32 1.0, %v6329_v49  ;;  %v1974_v55 = vmul.f32 %v6329_v49, %v1972_v50 }
 0x636   :  { %v1968_v48 = vadd.f32 %v1967_v45, %v6821_v47 }
 0x638   :  { %6330 = vtanh.f32 %v1968_v48 }
 0x645   :  { %v6331_v53 = vpop.eup %6330 }
 0x646   :  { %v1971_v54 = vmul.f32 %v6331_v53, %v1970_v52 }
 0x648   :  { %v7055_v57 = vadd.f32 %v1974_v55, %v1971_v54 }
 0x64a   :  { %v1977_v58 = vrot.slane %v7055_v57, 4  ;;  %v2220_v28 = vrot.slane %v7055_v57, 2 }
 0x64c   :  { %5928 = vmatmul.mubr.msk.f32.vlgmr.msra.gmra.mxu1 %vm483_vm3, %v1977_v58  ;;  %5939 = vmatmul.mubr.msk.f32.vlgmr.msra.gmra.mxu0 %vm483_vm3, %v1977_v58 }
 0x64d   :  { %5942 = vmatpush3.msra.mxu1 %v6758_v14  ;;  %5949 = vmatprep.mubr.msk.f32.mxu1 %vm6495_vm2, %v6494_v6 }
 0x64e   :  { %5943 = vmatprep.subr.mxu1 %v6494_v6  ;;  %5953 = vmatpush3.msra.mxu0 %v6711_v5 }
 0x64f   :  { %5944 = vmatpush3.msra.mxu1 %v6766_v15  ;;  %5954 = vmatprep.subr.mxu0 %v6494_v6 }
 0x650   :  { %5945 = vmatprep.subr.mxu1 %v6494_v6  ;;  %5955 = vmatpush3.msra.mxu0 %v6718_v7 }
 0x651   :  { %5946 = vmatpush3.msra.mxu1 %v6773_v17  ;;  %5956 = vmatprep.subr.mxu0 %v6494_v6 }
 0x652   :  { %5947 = vmatprep.subr.mxu1 %v6494_v6  ;;  %5957 = vmatpush3.msra.mxu0 %v6728_v9 }
 0x653   :  { %5948 = vmatpush3.msra.mxu1 %v6780_v19  ;;  %5958 = vmatprep.subr.mxu0 %v6494_v6 }
 0x654   :  { %5950 = vmatmul.mubr.msk.f32.vlgmr.msra.gmra.mxu1 %vm483_vm3, %v1977_v58  ;;  %5963 = vmatprep.subr.mxu1 %v6494_v6 }
 0x655   :  { %5964 = vmatpush3.msra.mxu1 %v6725_v8  ;;  %5959 = vmatpush3.msra.mxu0 %v6738_v11 }
 0x656   :  { %5965 = vmatprep.subr.mxu1 %v6494_v6  ;;  %5960 = vmatprep.mubr.msk.f32.mxu0 %vm6495_vm2, %v6494_v6 }
 0x657   :  { %5966 = vmatpush3.msra.mxu1 %v6735_v10  ;;  %5971 = vmatprep.mubr.msk.f32.mxu1 %vm6495_vm2, %v6494_v6 }
 0x658   :  { %5967 = vmatprep.subr.mxu1 %v6494_v6  ;;  %5974 = vmatprep.subr.mxu0 %v6494_v6 }
 0x659   :  { %5968 = vmatpush3.msra.mxu1 %v6745_v12 }
 0x65a   :  { %5969 = vmatprep.subr.mxu1 %v6494_v6 }
 0x65b   :  { %5970 = vmatpush3.msra.mxu1 %v6753_v13 }
 0x65c   :  { %5985 = vmatprep.subr.mxu1 %v6494_v6 }
 0x70c   :  { %v2046_v5 = vpop.f32.mrf.mxu1  ;;  %v2127_v7 = vpop.f32.mrf.mxu0 }
 0x70d   :  { %v2051_v8 = vrot.slane %v2046_v5, 6  ;;  %v2132_v59 = vrot.slane %v2127_v7, 6 }
 0x70e   :  { %v5929_v9 = vpop.f32.mrf.mxu1  ;;  %v5940_v10 = vpop.f32.mrf.mxu0 }
 0x70f   :  { %v2053_v11 = vadd.f32 %v2051_v8, %v6814_v39  ;;  %v2134_v63 = vadd.f32 %v2132_v59, %v6816_v40  ;;  %v7144_v59 = vld [vmem:[%s7779_s25] sm:$0xff] }
 0x711   :  { %v2054_v60 = vadd.f32 %v6824_v51, %v2053_v11  ;;  %v2135_v13 = vadd.f32 %v6832_v61, %v2134_v63 }
 0x713   :  { %v5399_v62 = vmul.f32 -1.442695, %v2054_v60  ;;  %v5401_v1 = vmul.f32 -1.442695, %v2135_v13 }
 0x714   :  { %v2208_v12 = vpop.f32.mrf.mxu1 }
 0x715   :  { %6332 = vpow2.f32 %v5399_v62  ;;  %v2209_v18 = vadd.f32 %v6836_v4, %v2208_v12 }
 0x716   :  { %v5951_v0 = vpop.f32.mrf.mxu1  ;;  %6334 = vpow2.f32 %v5401_v1  ;;  %v7168_v1 = vld [vmem:[%s7782_s8] ss:$0 sm:$0xff] }
 0x717   :  { %v2213_v22 = vrot.slane %v2209_v18, 6 }
 0x722   :  { %v6333_v2 = vpop.eup %6332 }
 0x723   :  { %v2058_v3 = vadd.f32 1.0, %v6333_v2  ;;  %v6335_v16 = vpop.eup %6334  ;;  %v2651_v2 = vmul.f32 0.0, %v7168_v1 }
 0x724   :  { %v2139_v20 = vadd.f32 1.0, %v6335_v16  ;;  %v7172_v16 = vld [vmem:[%s7783_s14] ss:$0 sm:$0xff] }
 0x725   :  { %6336 = vrcp.f32 %v2058_v3 }
 0x726   :  { %6338 = vrcp.f32 %v2139_v20 }
 0x732   :  { %v6337_v23 = vpop.eup %6336 }
 0x733   :  { %v2215_v24 = vmul.f32 %v6337_v23, %v2213_v22  ;;  %v6339_v27 = vpop.eup %6338 }
 0x734   :  { %v2218_v29 = vsub.f32 1.0, %v6339_v27  ;;  %v2222_v32 = vmul.f32 %v6339_v27, %v2220_v28 }
 0x735   :  { %v2216_v25 = vadd.f32 %v2215_v24, %v6821_v47 }
 0x737   :  { %6340 = vtanh.f32 %v2216_v25 }
 0x744   :  { %v6341_v46 = vpop.eup %6340 }
 0x745   :  { %v2219_v31 = vmul.f32 %v6341_v46, %v2218_v29  ;;  %v7178_v46 = vld [vmem:[%s7784_s19 + $0x18] sm:$0xff] }
 0x747   :  { %v2223_v33 = vadd.f32 %v2222_v32, %v2219_v31  ;;  %v7181_v31 = vld [vmem:[%s7784_s19 + $0x10] sm:$0xff]  ;;  %v7186_v32 = vld [vmem:[%s7784_s19 + $0x8] sm:$0xff] }
 0x749   :  { %v7098_v56 = vrot.slane %v2223_v33, 2  ;;  %v7191_v33 = vld [vmem:[%s7784_s19] sm:$0xff] }
 0x74b   :  { %5961 = vmatmul.mubr.msk.f32.vlgmr.msra.gmra.mxu0 %vm483_vm3, %v7098_v56  ;;  %5972 = vmatmul.mubr.msk.f32.vlgmr.msra.gmra.mxu1 %vm483_vm3, %v7098_v56 }
 0x74c   :  { %5975 = vmatpush3.msra.mxu0 %v6758_v14  ;;  %5982 = vmatprep.mubr.msk.f32.mxu0 %vm6495_vm2, %v6494_v6  ;;  %v2467_v14 = vld [vmem:[%s7777_s17 + $0x18] sm:$0xff] }
 0x74d   :  { %5976 = vmatprep.subr.mxu0 %v6494_v6  ;;  %5993 = vmatprep.mubr.msk.f32.mxu1 %vm6495_vm2, %v6494_v6 }
 0x74e   :  { %5977 = vmatpush3.msra.mxu0 %v6766_v15  ;;  %v2551_v15 = vld [vmem:[%s7778_s21 + $0x18] sm:$0xff]  ;;  %5986 = vmatpush3.msra.mxu1 %v2467_v14 }
 0x74f   :  { %5978 = vmatprep.subr.mxu0 %v6494_v6  ;;  %5987 = vmatprep.subr.mxu1 %v6494_v6 }
 0x750   :  { %5979 = vmatpush3.msra.mxu0 %v6773_v17  ;;  %v2550_v17 = vld [vmem:[%s7778_s21 + $0x10] sm:$0xff]  ;;  %5988 = vmatpush3.msra.mxu1 %v2466_v34 }
 0x751   :  { %5980 = vmatprep.subr.mxu0 %v6494_v6  ;;  %5989 = vmatprep.subr.mxu1 %v6494_v6 }
 0x752   :  { %5981 = vmatpush3.msra.mxu0 %v6780_v19  ;;  %v2465_v19 = vld [vmem:[%s7777_s17 + $0x8] sm:$0xff] }
 0x753   :  { %5983 = vmatmul.mubr.msk.f32.vlgmr.msra.gmra.mxu0 %vm483_vm3, %v7098_v56  ;;  %5996 = vmatprep.subr.mxu0 %v6494_v6 }
 0x754   :  { %6004 = vmatprep.mubr.msk.f32.mxu0 %vm6495_vm2, %v6494_v6  ;;  %5997 = vmatpush3.msra.mxu0 %v2551_v15 }
 0x755   :  { %5998 = vmatprep.subr.mxu0 %v6494_v6  ;;  %5990 = vmatpush3.msra.mxu1 %v2465_v19 }
 0x756   :  { %5999 = vmatpush3.msra.mxu0 %v2550_v17  ;;  %5991 = vmatprep.subr.mxu1 %v6494_v6  ;;  %v7198_v17 = vld [vmem:[%s7785_s24] ss:$0 sm:$0xff] }
 0x757   :  { %6000 = vmatprep.subr.mxu0 %v6494_v6  ;;  %5992 = vmatpush3.msra.mxu1 %v2464_v30 }
 0x758   :  { %6001 = vmatpush3.msra.mxu0 %v2549_v21  ;;  %6023 = vmatprep.subr.mxu1 %v6494_v6  ;;  %v7201_v21 = vld [vmem:[%s7786_s30] ss:$0 sm:$0xff] }
 0x759   :  { %6002 = vmatprep.subr.mxu0 %v6494_v6 }
 0x75a   :  { %6003 = vmatpush3.msra.mxu0 %v2548_v35 }
 0x75b   :  { %6007 = vmatprep.subr.mxu0 %v6494_v6 }
 0x80b   :  { %v2294_v36 = vpop.f32.mrf.mxu0  ;;  %v2372_v26 = vpop.f32.mrf.mxu1 }
 0x80c   :  { %v2298_v37 = vadd.f32 %v2294_v36, %v6814_v39  ;;  %v2376_v44 = vadd.f32 %v2372_v26, %v6816_v40 }
 0x80d   :  { %v5962_v38 = vpop.f32.mrf.mxu0  ;;  %v5973_v41 = vpop.f32.mrf.mxu1 }
 0x80e   :  { %v2299_v42 = vadd.f32 %v6824_v51, %v2298_v37  ;;  %v2377_v48 = vadd.f32 %v6832_v61, %v2376_v44  ;;  %v7211_v37 = vld [vmem:[%s7787_s6] ss:$0 sm:$0xff] }
 0x810   :  { %v5404_v43 = vmul.f32 -1.442695, %v2299_v42  ;;  %v5406_v50 = vmul.f32 -1.442695, %v2377_v48 }
 0x812   :  { %6342 = vpow2.f32 %v5404_v43 }
 0x813   :  { %v2450_v45 = vpop.f32.mrf.mxu0  ;;  %6344 = vpow2.f32 %v5406_v50 }
 0x814   :  { %v2451_v55 = vadd.f32 %v6836_v4, %v2450_v45  ;;  %v5410_v4 = vld [vmem:[%s7781_s3] ss:$0 sm:$0xff] }
 0x815   :  { %v5984_v49 = vpop.f32.mrf.mxu0 }
 0x81f   :  { %v6343_v52 = vpop.eup %6342 }
 0x820   :  { %v2303_v53 = vadd.f32 1.0, %v6343_v52  ;;  %v6345_v54 = vpop.eup %6344  ;;  %v2644_v52 = vld [vmem:[%s7788_s12] sm:$0x3] }
 0x821   :  { %v2381_v39 = vadd.f32 1.0, %v6345_v54 }
 0x822   :  { %6346 = vrcp.f32 %v2303_v53  ;;  %v7218_v53 = vld [vmem:[%s7788_s12] sm:$0x3] }
 0x823   :  { %6348 = vrcp.f32 %v2381_v39 }
 0x82f   :  { %v6347_v57 = vpop.eup %6346 }
 0x830   :  { %v2454_v51 = vmul.f32 %v6347_v57, %v2451_v55  ;;  %v6349_v58 = vpop.eup %6348 }
 0x831   :  { %v2457_v5 = vsub.f32 1.0, %v6349_v58  ;;  %v2460_v8 = vmul.f32 %v6349_v58, %v7098_v56  ;;  %v7225_v58 = vld [vmem:[%s7790_s16] ss:$0 sm:$0xff] }
 0x832   :  { %v2455_v40 = vadd.f32 %v2454_v51, %v6821_v47  ;;  %v5408_v47 = vld [vmem:[%s7780_s29] ss:$0 sm:$0xff] }
 0x833   :  { %v7222_v51 = vld [vmem:[%s7789_s15] ss:$0 sm:$0xff] }
 0x834   :  { %6350 = vtanh.f32 %v2455_v40 }
 0x841   :  { %v6351_v61 = vpop.eup %6350 }
 0x842   :  { %v2458_v7 = vmul.f32 %v6351_v61, %v2457_v5 }
 0x844   :  { %v2461_v9 = vadd.f32 %v2460_v8, %v2458_v7 }
 0x846   :  { %v2462_v10 = vmul.f32 0.1, %v2461_v9 }
 0x848   :  { %v2463_v11 = vmax.f32 %v2461_v9, %v2462_v10 }
 0x84a   :  { %5994 = vmatmul.mubr.msk.f32.vlgmr.msra.gmra.mxu1 %vm483_vm3, %v2463_v11  ;;  %6005 = vmatmul.mubr.msk.f32.vlgmr.msra.gmra.mxu0 %vm483_vm3, %v2463_v11 }
 0x84b   :  { %6008 = vmatpush3.msra.mxu0 %v7144_v59  ;;  %6009 = vmatprep.mubr.msk.f32.mxu0 %vm6495_vm2, %v6494_v6 }
 0x84c   :  { %6012 = vmatprep.subr.mxu0 %v6494_v6  ;;  %6024 = vmatpush3.msra.mxu1 %v7144_v59 }
 0x84d   :  { %6025 = vmatprep.mubr.msk.f32.mxu1 %vm6495_vm2, %v6494_v6  ;;  %6028 = vmatprep.subr.mxu1 %v6494_v6 }
 0x90a   :  { %v2544_v60 = vpop.f32.mrf.mxu1  ;;  %v2625_v62 = vpop.f32.mrf.mxu0 }
 0x90b   :  { %v7158_v63 = vadd.f32 %v5408_v47, %v2544_v60  ;;  %v2626_v12 = vadd.f32 %v5410_v4, %v2625_v62 }
 0x90c   :  { %v5995_v0 = vpop.f32.mrf.mxu1  ;;  %v6006_v13 = vpop.f32.mrf.mxu0 }
 0x90d   :  { %6010 = vmatmul.mubr.msk.f32.vlgmr.msra.gmra.mxu0 %vm2652_vm4, %v7158_v63  ;;  %2630 = vst.msk [vmem:[#allocation2] sm:$0x3] %vm2629_vm5, %v7158_v63  ;;  %2631 = vst.msk [vmem:[#allocation4] sm:$0x3] %vm2629_vm5, %v2626_v12  ;;  %v7251_v13 = vld [vmem:[%s7788_s12 + $0x2] sm:$0x3] }
 0x90e   :  { %6020 = vmatprep.mubr.msk.f32.mxu0 %vm6495_vm2, %v6494_v6  ;;  %6013 = vmatpush3.msra.mxu0 %v7178_v46 }
 0x90f   :  { %6014 = vmatprep.subr.mxu0 %v6494_v6 }
 0x910   :  { %6015 = vmatpush3.msra.mxu0 %v7181_v31 }
 0x911   :  { %6016 = vmatprep.subr.mxu0 %v6494_v6 }
 0x912   :  { %6017 = vmatpush3.msra.mxu0 %v7186_v32 }
 0x913   :  { %6018 = vmatprep.subr.mxu0 %v6494_v6 }
 0x914   :  { %6019 = vmatpush3.msra.mxu0 %v7191_v33 }
 0x915   :  { %6039 = vmatprep.subr.mxu0 %v6494_v6 }
 0x9cd   :  { %v2722_v3 = vpop.f32.mrf.mxu0 }
 0x9ce   :  { %v2723_v18 = vadd.f32 %v2722_v3, %v2651_v2 }
 0x9cf   :  { %v6011_v20 = vpop.f32.mrf.mxu0 }
 0x9d0   :  { %v2732_v22 = vadd.f32 %v7172_v16, %v2723_v18 }
 0x9d2   :  { %v2734_v23 = vsel %vm2733_vm6, %v2732_v22, 0.0 }
 0x9d3   :  { %2735 = vadd.xlane.f32.xlu1 %v2734_v23 }
 0xa5c   :  { %v2736_v24 = vpop.xlane.xlu1 %2735 }
 0xa5d   :  { %v2738_v25 = vmul.f32 0.03125, %v2736_v24 }
 0xa5f   :  { %v2739_v27 = vsub.f32 %v2732_v22, %v2738_v25 }
 0xa61   :  { %v2740_v28 = vmul.f32 %v2739_v27, %v2739_v27 }
 0xa63   :  { %v2741_v29 = vsel %vm2733_vm6, %v2740_v28, 0.0 }
 0xa64   :  { %2742 = vadd.xlane.f32.xlu1 %v2741_v29 }
 0xaed   :  { %v2743_v56 = vpop.xlane.xlu1 %2742 }
 0xaee   :  { %v2744_v14 = vmul.f32 0.03125, %v2743_v56 }
 0xaf0   :  { %v2745_v15 = vadd.f32 1e-05, %v2744_v14 }
 0xaf2   :  { %6352 = vrsqrt.f32 %v2745_v15 }
 0xaff   :  { %v6353_v34 = vpop.eup %6352 }
 0xb00   :  { %v2747_v19 = vmul.f32 %v6353_v34, %v2739_v27 }
 0xb02   :  { %v2754_v30 = vmul.f32 %v7198_v17, %v2747_v19 }
 0xb04   :  { %v2761_v35 = vadd.f32 %v7201_v21, %v2754_v30 }
 0xb06   :  { %v2762_v36 = vmul.f32 0.1, %v2761_v35 }
 0xb08   :  { %v2763_v26 = vmax.f32 %v2761_v35, %v2762_v36 }
 0xb0a   :  { %6021 = vmatmul.mubr.msk.f32.vlgmr.msra.gmra.mxu0 %vm483_vm3, %v2763_v26 }
 0xb0b   :  { %6040 = vmatpush3.msra.mxu0 %v7144_v59  ;;  %6041 = vmatprep.mubr.msk.f32.mxu0 %vm6495_vm2, %v6494_v6 }
 0xb0c   :  { %6044 = vmatprep.subr.mxu0 %v6494_v6 }
 0xbca   :  { %v2839_v38 = vpop.f32.mrf.mxu0 }
 0xbcb   :  { %v2840_v41 = vadd.f32 %v7211_v37, %v2839_v38 }
 0xbcc   :  { %v6022_v42 = vpop.f32.mrf.mxu0 }
 0xbcd   :  { %v2843_v43 = vsel %vm2629_vm5, %v2840_v41, 0.0 }
 0xbce   :  { %2844 = vadd.xlane.f32.xlu0 %v2843_v43  ;;  %v5421_v43 = vld [vmem:[%s7788_s12 + $0x2] sm:$0x3] }
 0xc57   :  { %v2845_v44 = vpop.xlane.xlu0 %2844 }
 0xc58   :  { %v2847_v45 = vmul.f32 0.125, %v2845_v44  ;;  %v2884_v44 = vsub.f32 %v5421_v43, %v7218_v53 }
 0xc5a   :  { %v2848_v48 = vsub.f32 %v2840_v41, %v2847_v45 }
 0xc5c   :  { %v2849_v49 = vmul.f32 %v2848_v48, %v2848_v48 }
 0xc5e   :  { %v2850_v50 = vsel %vm2629_vm5, %v2849_v49, 0.0 }
 0xc5f   :  { %2851 = vadd.xlane.f32.xlu1 %v2850_v50 }
 0xc70   :  { %2875 = vperm.xlu1 %6271, %v2644_v52  }
 0xc74   :  { %2887 = vperm.xlu1 %6271, %v7218_v53  }
 0xce8   :  { %v2852_v54 = vpop.xlane.xlu1 %2851 }
 0xce9   :  { %v2853_v39 = vmul.f32 0.125, %v2852_v54 }
 0xceb   :  { %v2854_v55 = vadd.f32 1e-05, %v2853_v39 }
 0xcec   :  { %v2876_v9 = vpop.permute.xlu1 %2875 }
 0xced   :  { %6354 = vrsqrt.f32 %v2854_v55 }
 0xcf0   :  { %v2888_v47 = vpop.permute.xlu1 %2887 }
 0xcf1   :  { %v2890_v4 = vmul.f32 %v7168_v1, %v2888_v47 }
 0xcfa   :  { %v6355_v57 = vpop.eup %6354 }
 0xcfb   :  { %v2856_v40 = vmul.f32 %v6355_v57, %v2848_v48 }
 0xcfd   :  { %v2863_v5 = vmul.f32 %v7222_v51, %v2856_v40 }
 0xcff   :  { %v2870_v61 = vadd.f32 %v7225_v58, %v2863_v5 }
 0xd01   :  { %v2871_v7 = vmul.f32 0.1, %v2870_v61 }
 0xd03   :  { %v2872_v8 = vmax.f32 %v2870_v61, %v2871_v7 }
 0xd05   :  { %v2878_v10 = vmul.f32 %v2876_v9, %v2872_v8 }
 0xd07   :  { %v7230_v11 = vadd.f32 %v2878_v10, %v7158_v63 }
 0xd09   :  { %2880 = vst.msk [vmem:[%s6687_s27] sm:$0x3] %vm2629_vm5, %v7230_v11  ;;  %6026 = vmatmul.mubr.msk.f32.vlgmr.msra.gmra.mxu1 %vm2652_vm4, %v7230_v11 }
 0xd0a   :  { %6029 = vmatpush3.msra.mxu1 %v7178_v46  ;;  %6036 = vmatprep.mubr.msk.f32.mxu1 %vm6495_vm2, %v6494_v6 }
 0xd0b   :  { %6030 = vmatprep.subr.mxu1 %v6494_v6 }
 0xd0c   :  { %6031 = vmatpush3.msra.mxu1 %v7181_v31 }
 0xd0d   :  { %6032 = vmatprep.subr.mxu1 %v6494_v6 }
 0xd0e   :  { %6033 = vmatpush3.msra.mxu1 %v7186_v32 }
 0xd0f   :  { %6034 = vmatprep.subr.mxu1 %v6494_v6 }
 0xd10   :  { %6035 = vmatpush3.msra.mxu1 %v7191_v33 }
 0xd11   :  { %6055 = vmatprep.subr.mxu1 %v6494_v6 }
 0xdc9   :  { %v2960_v60 = vpop.f32.mrf.mxu1 }
 0xdca   :  { %v2961_v62 = vadd.f32 %v2960_v60, %v2890_v4 }
 0xdcb   :  { %v6027_v63 = vpop.f32.mrf.mxu1 }
 0xdcc   :  { %v2964_v12 = vadd.f32 %v7172_v16, %v2961_v62 }
 0xdce   :  { %v2965_v0 = vsel %vm2733_vm6, %v2964_v12, 0.0 }
 0xdcf   :  { %2966 = vadd.xlane.f32.xlu1 %v2965_v0  ;;  %v7292_v0 = vld [vmem:[%s7788_s12 + $0x4] sm:$0x3] }
 0xde0   :  { %3086 = vperm.xlu1 %6271, %v7251_v13  }
 0xe58   :  { %v2967_v2 = vpop.xlane.xlu1 %2966 }
 0xe59   :  { %v2968_v3 = vmul.f32 0.03125, %v2967_v2 }
 0xe5b   :  { %v2969_v18 = vsub.f32 %v2964_v12, %v2968_v3 }
 0xe5c   :  { %v3087_v53 = vpop.permute.xlu1 %3086 }
 0xe5d   :  { %v2970_v20 = vmul.f32 %v2969_v18, %v2969_v18  ;;  %v3089_v7 = vmul.f32 %v7168_v1, %v3087_v53 }
 0xe5f   :  { %v2971_v22 = vsel %vm2733_vm6, %v2970_v20, 0.0 }
 0xe60   :  { %2972 = vadd.xlane.f32.xlu0 %v2971_v22 }
 0xee9   :  { %v2973_v23 = vpop.xlane.xlu0 %2972 }
 0xeea   :  { %v2974_v24 = vmul.f32 0.03125, %v2973_v23 }
 0xeec   :  { %v2975_v25 = vadd.f32 1e-05, %v2974_v24 }
 0xeee   :  { %6356 = vrsqrt.f32 %v2975_v25 }
 0xefb   :  { %v6357_v27 = vpop.eup %6356 }
 0xefc   :  { %v2977_v28 = vmul.f32 %v6357_v27, %v2969_v18 }
 0xefe   :  { %v2978_v29 = vmul.f32 %v7198_v17, %v2977_v28 }
 0xf00   :  { %v2979_v56 = vadd.f32 %v7201_v21, %v2978_v29 }
 0xf02   :  { %v2980_v14 = vmul.f32 0.1, %v2979_v56 }
 0xf04   :  { %v2981_v15 = vmax.f32 %v2979_v56, %v2980_v14 }
 0xf06   :  { %6037 = vmatmul.mubr.msk.f32.vlgmr.msra.gmra.mxu1 %vm483_vm3, %v2981_v15 }
 0xf07   :  { %6056 = vmatpush3.msra.mxu1 %v7144_v59  ;;  %6057 = vmatprep.mubr.msk.f32.mxu1 %vm6495_vm2, %v6494_v6 }
 0xf08   :  { %6060 = vmatprep.subr.mxu1 %v6494_v6 }
 0xfc6   :  { %v3051_v34 = vpop.f32.mrf.mxu1 }
 0xfc7   :  { %v3052_v19 = vadd.f32 %v7211_v37, %v3051_v34 }
 0xfc8   :  { %v6038_v30 = vpop.f32.mrf.mxu1 }
 0xfc9   :  { %v3055_v35 = vsel %vm2629_vm5, %v3052_v19, 0.0 }
 0xfca   :  { %3056 = vadd.xlane.f32.xlu0 %v3055_v35 }
0x1053   :  { %v3057_v36 = vpop.xlane.xlu0 %3056 }
0x1054   :  { %v3058_v26 = vmul.f32 0.125, %v3057_v36  ;;  %v5425_v36 = vld [vmem:[%s7788_s12 + $0x4] sm:$0x3] }
0x1056   :  { %v3059_v38 = vsub.f32 %v3052_v19, %v3058_v26  ;;  %v3083_v26 = vsub.f32 %v5425_v36, %v7251_v13 }
0x1058   :  { %v3060_v41 = vmul.f32 %v3059_v38, %v3059_v38 }
0x105a   :  { %v3061_v42 = vsel %vm2629_vm5, %v3060_v41, 0.0 }
0x105b   :  { %3062 = vadd.xlane.f32.xlu0 %v3061_v42 }
0x1071   :  { %3074 = vperm.xlu0 %6270, %v2884_v44  }
0x10e4   :  { %v3063_v45 = vpop.xlane.xlu0 %3062 }
0x10e5   :  { %v3064_v48 = vmul.f32 0.125, %v3063_v45 }
0x10e7   :  { %v3065_v49 = vadd.f32 1e-05, %v3064_v48 }
0x10e9   :  { %6358 = vrsqrt.f32 %v3065_v49 }
0x10ec   :  { %v3075_v40 = vpop.permute.xlu0 %3074 }
0x10f6   :  { %v6359_v50 = vpop.eup %6358 }
0x10f7   :  { %v3067_v52 = vmul.f32 %v6359_v50, %v3059_v38 }
0x10f9   :  { %v3068_v54 = vmul.f32 %v7222_v51, %v3067_v52 }
0x10fb   :  { %v3069_v39 = vadd.f32 %v7225_v58, %v3068_v54 }
0x10fd   :  { %v3070_v55 = vmul.f32 0.1, %v3069_v39 }
0x10ff   :  { %v3071_v57 = vmax.f32 %v3069_v39, %v3070_v55 }
0x1101   :  { %v3077_v5 = vmul.f32 %v3075_v40, %v3071_v57 }
0x1103   :  { %v7270_v61 = vadd.f32 %v3077_v5, %v7230_v11 }
0x1105   :  { %3079 = vst.msk [vmem:[%s6687_s27 + $0x2] sm:$0x3] %vm2629_vm5, %v7270_v61  ;;  %6042 = vmatmul.mubr.msk.f32.vlgmr.msra.gmra.mxu0 %vm2652_vm4, %v7270_v61 }
0x1106   :  { %6045 = vmatpush3.msra.mxu0 %v7178_v46  ;;  %6052 = vmatprep.mubr.msk.f32.mxu0 %vm6495_vm2, %v6494_v6 }
0x1107   :  { %6046 = vmatprep.subr.mxu0 %v6494_v6 }
0x1108   :  { %6047 = vmatpush3.msra.mxu0 %v7181_v31 }
0x1109   :  { %6048 = vmatprep.subr.mxu0 %v6494_v6 }
0x110a   :  { %6049 = vmatpush3.msra.mxu0 %v7186_v32 }
0x110b   :  { %6050 = vmatprep.subr.mxu0 %v6494_v6 }
0x110c   :  { %6051 = vmatpush3.msra.mxu0 %v7191_v33 }
0x110d   :  { %6071 = vmatprep.subr.mxu0 %v6494_v6 }
0x11c5   :  { %v3159_v8 = vpop.f32.mrf.mxu0 }
0x11c6   :  { %v3160_v9 = vadd.f32 %v3159_v8, %v3089_v7 }
0x11c7   :  { %v6043_v10 = vpop.f32.mrf.mxu0 }
0x11c8   :  { %v3163_v11 = vadd.f32 %v7172_v16, %v3160_v9 }
0x11ca   :  { %v3164_v47 = vsel %vm2733_vm6, %v3163_v11, 0.0 }
0x11cb   :  { %3165 = vadd.xlane.f32.xlu0 %v3164_v47  ;;  %v7332_v47 = vld [vmem:[%s7788_s12 + $0x6] sm:$0x3] }
0x1254   :  { %v3166_v4 = vpop.xlane.xlu0 %3165 }
0x1255   :  { %v3167_v60 = vmul.f32 0.03125, %v3166_v4 }
0x1257   :  { %v3168_v62 = vsub.f32 %v3163_v11, %v3167_v60 }
0x1259   :  { %v3169_v63 = vmul.f32 %v3168_v62, %v3168_v62 }
0x125b   :  { %v3170_v12 = vsel %vm2733_vm6, %v3169_v63, 0.0 }
0x125c   :  { %3171 = vadd.xlane.f32.xlu1 %v3170_v12 }
0x126d   :  { %3285 = vperm.xlu1 %6271, %v7292_v0  }
0x12e5   :  { %v3172_v2 = vpop.xlane.xlu1 %3171 }
0x12e6   :  { %v3173_v3 = vmul.f32 0.03125, %v3172_v2 }
0x12e8   :  { %v3174_v18 = vadd.f32 1e-05, %v3173_v3 }
0x12e9   :  { %v3286_v13 = vpop.permute.xlu1 %3285 }
0x12ea   :  { %6360 = vrsqrt.f32 %v3174_v18  ;;  %v3288_v55 = vmul.f32 %v7168_v1, %v3286_v13 }
0x12f7   :  { %v6361_v20 = vpop.eup %6360 }
0x12f8   :  { %v3176_v22 = vmul.f32 %v6361_v20, %v3168_v62 }
0x12fa   :  { %v3177_v23 = vmul.f32 %v7198_v17, %v3176_v22 }
0x12fc   :  { %v3178_v24 = vadd.f32 %v7201_v21, %v3177_v23 }
0x12fe   :  { %v3179_v25 = vmul.f32 0.1, %v3178_v24 }
0x1300   :  { %v3180_v27 = vmax.f32 %v3178_v24, %v3179_v25 }
0x1302   :  { %6053 = vmatmul.mubr.msk.f32.vlgmr.msra.gmra.mxu0 %vm483_vm3, %v3180_v27 }
0x1303   :  { %6072 = vmatpush3.msra.mxu0 %v7144_v59  ;;  %6073 = vmatprep.mubr.msk.f32.mxu0 %vm6495_vm2, %v6494_v6 }
0x1304   :  { %6076 = vmatprep.subr.mxu0 %v6494_v6 }
0x13c2   :  { %v3250_v28 = vpop.f32.mrf.mxu0 }
0x13c3   :  { %v3251_v29 = vadd.f32 %v7211_v37, %v3250_v28 }
0x13c4   :  { %v6054_v56 = vpop.f32.mrf.mxu0 }
0x13c5   :  { %v3254_v14 = vsel %vm2629_vm5, %v3251_v29, 0.0 }
0x13c6   :  { %3255 = vadd.xlane.f32.xlu0 %v3254_v14 }
0x144f   :  { %v3256_v15 = vpop.xlane.xlu0 %3255 }
0x1450   :  { %v3257_v34 = vmul.f32 0.125, %v3256_v15  ;;  %v5429_v15 = vld [vmem:[%s7788_s12 + $0x6] sm:$0x3] }
0x1452   :  { %v3258_v19 = vsub.f32 %v3251_v29, %v3257_v34  ;;  %v3282_v34 = vsub.f32 %v5429_v15, %v7292_v0 }
0x1454   :  { %v3259_v30 = vmul.f32 %v3258_v19, %v3258_v19 }
0x1456   :  { %v3260_v35 = vsel %vm2629_vm5, %v3259_v30, 0.0 }
0x1457   :  { %3261 = vadd.xlane.f32.xlu0 %v3260_v35 }
0x146d   :  { %3273 = vperm.xlu0 %6270, %v3083_v26  }
0x14e0   :  { %v3262_v38 = vpop.xlane.xlu0 %3261 }
0x14e1   :  { %v3263_v41 = vmul.f32 0.125, %v3262_v38 }
0x14e3   :  { %v3264_v42 = vadd.f32 1e-05, %v3263_v41 }
0x14e5   :  { %6362 = vrsqrt.f32 %v3264_v42 }
0x14e8   :  { %v3274_v52 = vpop.permute.xlu0 %3273 }
0x14f2   :  { %v6363_v43 = vpop.eup %6362 }
0x14f3   :  { %v3266_v44 = vmul.f32 %v6363_v43, %v3258_v19 }
0x14f5   :  { %v3267_v45 = vmul.f32 %v7222_v51, %v3266_v44 }
0x14f7   :  { %v3268_v48 = vadd.f32 %v7225_v58, %v3267_v45 }
0x14f9   :  { %v3269_v49 = vmul.f32 0.1, %v3268_v48 }
0x14fb   :  { %v3270_v50 = vmax.f32 %v3268_v48, %v3269_v49 }
0x14fd   :  { %v3276_v54 = vmul.f32 %v3274_v52, %v3270_v50 }
0x14ff   :  { %v7310_v39 = vadd.f32 %v3276_v54, %v7270_v61 }
0x1501   :  { %3278 = vst.msk [vmem:[%s6687_s27 + $0x4] sm:$0x3] %vm2629_vm5, %v7310_v39  ;;  %6058 = vmatmul.mubr.msk.f32.vlgmr.msra.gmra.mxu1 %vm2652_vm4, %v7310_v39 }
0x1502   :  { %6061 = vmatpush3.msra.mxu1 %v7178_v46  ;;  %6068 = vmatprep.mubr.msk.f32.mxu1 %vm6495_vm2, %v6494_v6 }
0x1503   :  { %6062 = vmatprep.subr.mxu1 %v6494_v6 }
0x1504   :  { %6063 = vmatpush3.msra.mxu1 %v7181_v31 }
0x1505   :  { %6064 = vmatprep.subr.mxu1 %v6494_v6 }
0x1506   :  { %6065 = vmatpush3.msra.mxu1 %v7186_v32 }
0x1507   :  { %6066 = vmatprep.subr.mxu1 %v6494_v6 }
0x1508   :  { %6067 = vmatpush3.msra.mxu1 %v7191_v33 }
0x1509   :  { %6087 = vmatprep.subr.mxu1 %v6494_v6 }
0x15c1   :  { %v3358_v57 = vpop.f32.mrf.mxu1 }
0x15c2   :  { %v3359_v40 = vadd.f32 %v3358_v57, %v3288_v55 }
0x15c3   :  { %v6059_v5 = vpop.f32.mrf.mxu1 }
0x15c4   :  { %v3362_v61 = vadd.f32 %v7172_v16, %v3359_v40 }
0x15c6   :  { %v3363_v53 = vsel %vm2733_vm6, %v3362_v61, 0.0 }
0x15c7   :  { %3364 = vadd.xlane.f32.xlu0 %v3363_v53 }
0x1650   :  { %v3365_v7 = vpop.xlane.xlu0 %3364 }
0x1651   :  { %v3366_v8 = vmul.f32 0.03125, %v3365_v7 }
0x1653   :  { %v3367_v9 = vsub.f32 %v3362_v61, %v3366_v8 }
0x1655   :  { %v3368_v10 = vmul.f32 %v3367_v9, %v3367_v9 }
0x1657   :  { %v3369_v11 = vsel %vm2733_vm6, %v3368_v10, 0.0 }
0x1658   :  { %3370 = vadd.xlane.f32.xlu1 %v3369_v11 }
0x1669   :  { %3484 = vperm.xlu1 %6271, %v7332_v47  }
0x16e1   :  { %v3371_v4 = vpop.xlane.xlu1 %3370 }
0x16e2   :  { %v3372_v60 = vmul.f32 0.03125, %v3371_v4 }
0x16e4   :  { %v3373_v62 = vadd.f32 1e-05, %v3372_v60 }
0x16e5   :  { %v3485_v0 = vpop.permute.xlu1 %3484 }
0x16e6   :  { %6364 = vrsqrt.f32 %v3373_v62  ;;  %v3487_v49 = vmul.f32 %v7168_v1, %v3485_v0 }
0x16f3   :  { %v6365_v63 = vpop.eup %6364 }
0x16f4   :  { %v3375_v12 = vmul.f32 %v6365_v63, %v3367_v9 }
0x16f6   :  { %v3376_v2 = vmul.f32 %v7198_v17, %v3375_v12 }
0x16f8   :  { %v3377_v3 = vadd.f32 %v7201_v21, %v3376_v2 }
0x16fa   :  { %v3378_v18 = vmul.f32 0.1, %v3377_v3 }
0x16fc   :  { %v3379_v20 = vmax.f32 %v3377_v3, %v3378_v18  ;;  %v5433_v18 = vld [vmem:[%s7788_s12 + $0x8] sm:$0x3] }
0x16fe   :  { %6069 = vmatmul.mubr.msk.f32.vlgmr.msra.gmra.mxu1 %vm483_vm3, %v3379_v20  ;;  %v3481_v20 = vsub.f32 %v5433_v18, %v7332_v47 }
0x16ff   :  { %6088 = vmatpush3.msra.mxu1 %v7144_v59  ;;  %6089 = vmatprep.mubr.msk.f32.mxu1 %vm6495_vm2, %v6494_v6 }
0x1700   :  { %6092 = vmatprep.subr.mxu1 %v6494_v6 }
0x17be   :  { %v3449_v22 = vpop.f32.mrf.mxu1 }
0x17bf   :  { %v3450_v23 = vadd.f32 %v7211_v37, %v3449_v22 }
0x17c0   :  { %v6070_v24 = vpop.f32.mrf.mxu1 }
0x17c1   :  { %v3453_v25 = vsel %vm2629_vm5, %v3450_v23, 0.0 }
0x17c2   :  { %3454 = vadd.xlane.f32.xlu0 %v3453_v25 }
0x184b   :  { %v3455_v27 = vpop.xlane.xlu0 %3454 }
0x184c   :  { %v3456_v28 = vmul.f32 0.125, %v3455_v27 }
0x184e   :  { %v3457_v29 = vsub.f32 %v3450_v23, %v3456_v28  ;;  %v5436_v28 = vld [vmem:[%s7788_s12 + $0x8] sm:$0x3] }
0x1850   :  { %v3458_v56 = vmul.f32 %v3457_v29, %v3457_v29 }
0x1852   :  { %v3459_v14 = vsel %vm2629_vm5, %v3458_v56, 0.0 }
0x1853   :  { %3460 = vadd.xlane.f32.xlu0 %v3459_v14 }
0x1869   :  { %3472 = vperm.xlu0 %6270, %v3282_v34  }
0x18dc   :  { %v3461_v19 = vpop.xlane.xlu0 %3460 }
0x18dd   :  { %v3462_v30 = vmul.f32 0.125, %v3461_v19 }
0x18df   :  { %v3463_v35 = vadd.f32 1e-05, %v3462_v30 }
0x18e1   :  { %6366 = vrsqrt.f32 %v3463_v35 }
0x18e4   :  { %v3473_v44 = vpop.permute.xlu0 %3472 }
0x18ee   :  { %v6367_v36 = vpop.eup %6366 }
0x18ef   :  { %v3465_v26 = vmul.f32 %v6367_v36, %v3457_v29 }
0x18f1   :  { %v3466_v38 = vmul.f32 %v7222_v51, %v3465_v26 }
0x18f3   :  { %v3467_v41 = vadd.f32 %v7225_v58, %v3466_v38 }
0x18f5   :  { %v3468_v42 = vmul.f32 0.1, %v3467_v41 }
0x18f7   :  { %v3469_v43 = vmax.f32 %v3467_v41, %v3468_v42 }
0x18f9   :  { %v3475_v45 = vmul.f32 %v3473_v44, %v3469_v43 }
0x18fb   :  { %v7350_v48 = vadd.f32 %v3475_v45, %v7310_v39 }
0x18fd   :  { %3477 = vst.msk [vmem:[%s6687_s27 + $0x6] sm:$0x3] %vm2629_vm5, %v7350_v48  ;;  %6074 = vmatmul.mubr.msk.f32.vlgmr.msra.gmra.mxu0 %vm2652_vm4, %v7350_v48 }
0x18fe   :  { %6077 = vmatpush3.msra.mxu0 %v7178_v46  ;;  %6084 = vmatprep.mubr.msk.f32.mxu0 %vm6495_vm2, %v6494_v6 }
0x18ff   :  { %6078 = vmatprep.subr.mxu0 %v6494_v6 }
0x1900   :  { %6079 = vmatpush3.msra.mxu0 %v7181_v31 }
0x1901   :  { %6080 = vmatprep.subr.mxu0 %v6494_v6 }
0x1902   :  { %6081 = vmatpush3.msra.mxu0 %v7186_v32 }
0x1903   :  { %6082 = vmatprep.subr.mxu0 %v6494_v6 }
0x1904   :  { %6083 = vmatpush3.msra.mxu0 %v7191_v33 }
0x1905   :  { %6103 = vmatprep.subr.mxu0 %v6494_v6 }
0x19bd   :  { %v3557_v50 = vpop.f32.mrf.mxu0 }
0x19be   :  { %v3558_v52 = vadd.f32 %v3557_v50, %v3487_v49 }
0x19bf   :  { %v6075_v54 = vpop.f32.mrf.mxu0 }
0x19c0   :  { %v3561_v39 = vadd.f32 %v7172_v16, %v3558_v52 }
0x19c2   :  { %v3562_v13 = vsel %vm2733_vm6, %v3561_v39, 0.0 }
0x19c3   :  { %3563 = vadd.xlane.f32.xlu1 %v3562_v13 }
0x1a4c   :  { %v3564_v55 = vpop.xlane.xlu1 %3563 }
0x1a4d   :  { %v3565_v57 = vmul.f32 0.03125, %v3564_v55 }
0x1a4f   :  { %v3566_v40 = vsub.f32 %v3561_v39, %v3565_v57 }
0x1a51   :  { %v3567_v5 = vmul.f32 %v3566_v40, %v3566_v40 }
0x1a53   :  { %v3568_v61 = vsel %vm2733_vm6, %v3567_v5, 0.0 }
0x1a54   :  { %3569 = vadd.xlane.f32.xlu0 %v3568_v61 }
0x1add   :  { %v3570_v53 = vpop.xlane.xlu0 %3569 }
0x1ade   :  { %v3571_v7 = vmul.f32 0.03125, %v3570_v53 }
0x1ae0   :  { %v3572_v8 = vadd.f32 1e-05, %v3571_v7 }
0x1ae2   :  { %6368 = vrsqrt.f32 %v3572_v8 }
0x1aef   :  { %v6369_v9 = vpop.eup %6368 }
0x1af0   :  { %v3574_v10 = vmul.f32 %v6369_v9, %v3566_v40 }
0x1af2   :  { %v3575_v11 = vmul.f32 %v7198_v17, %v3574_v10 }
0x1af4   :  { %v3576_v4 = vadd.f32 %v7201_v21, %v3575_v11 }
0x1af6   :  { %v3577_v60 = vmul.f32 0.1, %v3576_v4 }
0x1af8   :  { %v3578_v62 = vmax.f32 %v3576_v4, %v3577_v60  ;;  %v5437_v60 = vld [vmem:[%s7788_s12 + $0xa] sm:$0x3] }
0x1afa   :  { %6085 = vmatmul.mubr.msk.f32.vlgmr.msra.gmra.mxu0 %vm483_vm3, %v3578_v62  ;;  %v3680_v62 = vsub.f32 %v5437_v60, %v5436_v28  ;;  %v5444_v60 = vld [vmem:[%s7788_s12 + $0xc] sm:$0x3] }
0x1afb   :  { %6104 = vmatpush3.msra.mxu0 %v7144_v59  ;;  %6105 = vmatprep.mubr.msk.f32.mxu0 %vm6495_vm2, %v6494_v6 }
0x1afc   :  { %6108 = vmatprep.subr.mxu0 %v6494_v6 }
0x1bba   :  { %v3648_v63 = vpop.f32.mrf.mxu0 }
0x1bbb   :  { %v3649_v12 = vadd.f32 %v7211_v37, %v3648_v63 }
0x1bbc   :  { %v6086_v2 = vpop.f32.mrf.mxu0 }
0x1bbd   :  { %v3652_v3 = vsel %vm2629_vm5, %v3649_v12, 0.0 }
0x1bbe   :  { %3653 = vadd.xlane.f32.xlu0 %v3652_v3 }
0x1bd4   :  { %3671 = vperm.xlu0 %6270, %v3481_v20   ;;  %v5440_v20 = vld [vmem:[%s7788_s12 + $0xa] sm:$0x3] }
0x1c47   :  { %v3654_v22 = vpop.xlane.xlu0 %3653 }
0x1c48   :  { %v3655_v23 = vmul.f32 0.125, %v3654_v22 }
0x1c4a   :  { %v3656_v24 = vsub.f32 %v3649_v12, %v3655_v23 }
0x1c4c   :  { %v3657_v25 = vmul.f32 %v3656_v24, %v3656_v24 }
0x1c4e   :  { %v3658_v27 = vsel %vm2629_vm5, %v3657_v25, 0.0 }
0x1c4f   :  { %3659 = vadd.xlane.f32.xlu1 %v3658_v27  ;;  %v3672_v36 = vpop.permute.xlu0 %3671 }
0x1c60   :  { %3683 = vperm.xlu1 %6271, %v5436_v28  }
0x1cd8   :  { %v3660_v29 = vpop.xlane.xlu1 %3659 }
0x1cd9   :  { %v3661_v56 = vmul.f32 0.125, %v3660_v29 }
0x1cdb   :  { %v3662_v14 = vadd.f32 1e-05, %v3661_v56 }
0x1cdc   :  { %v3684_v41 = vpop.permute.xlu1 %3683 }
0x1cdd   :  { %6370 = vrsqrt.f32 %v3662_v14  ;;  %v3686_v42 = vmul.f32 %v7168_v1, %v3684_v41 }
0x1cea   :  { %v6371_v15 = vpop.eup %6370 }
0x1ceb   :  { %v3664_v34 = vmul.f32 %v6371_v15, %v3656_v24 }
0x1ced   :  { %v3665_v19 = vmul.f32 %v7222_v51, %v3664_v34 }
0x1cef   :  { %v3666_v47 = vadd.f32 %v7225_v58, %v3665_v19 }
0x1cf1   :  { %v3667_v30 = vmul.f32 0.1, %v3666_v47 }
0x1cf3   :  { %v3668_v35 = vmax.f32 %v3666_v47, %v3667_v30 }
0x1cf5   :  { %v3674_v26 = vmul.f32 %v3672_v36, %v3668_v35 }
0x1cf7   :  { %v7387_v38 = vadd.f32 %v3674_v26, %v7350_v48 }
0x1cf9   :  { %3676 = vst.msk [vmem:[%s6687_s27 + $0x8] sm:$0x3] %vm2629_vm5, %v7387_v38  ;;  %6090 = vmatmul.mubr.msk.f32.vlgmr.msra.gmra.mxu1 %vm2652_vm4, %v7387_v38 }
0x1cfa   :  { %6093 = vmatpush3.msra.mxu1 %v7178_v46  ;;  %6100 = vmatprep.mubr.msk.f32.mxu1 %vm6495_vm2, %v6494_v6 }
0x1cfb   :  { %6094 = vmatprep.subr.mxu1 %v6494_v6 }
0x1cfc   :  { %6095 = vmatpush3.msra.mxu1 %v7181_v31 }
0x1cfd   :  { %6096 = vmatprep.subr.mxu1 %v6494_v6 }
0x1cfe   :  { %6097 = vmatpush3.msra.mxu1 %v7186_v32 }
0x1cff   :  { %6098 = vmatprep.subr.mxu1 %v6494_v6 }
0x1d00   :  { %6099 = vmatpush3.msra.mxu1 %v7191_v33 }
0x1d01   :  { %6119 = vmatprep.subr.mxu1 %v6494_v6 }
0x1db9   :  { %v3756_v43 = vpop.f32.mrf.mxu1 }
0x1dba   :  { %v3757_v44 = vadd.f32 %v3756_v43, %v3686_v42 }
0x1dbb   :  { %v6091_v45 = vpop.f32.mrf.mxu1 }
0x1dbc   :  { %v3760_v48 = vadd.f32 %v7172_v16, %v3757_v44 }
0x1dbe   :  { %v3761_v0 = vsel %vm2733_vm6, %v3760_v48, 0.0 }
0x1dbf   :  { %3762 = vadd.xlane.f32.xlu1 %v3761_v0 }
0x1e48   :  { %v3763_v49 = vpop.xlane.xlu1 %3762 }
0x1e49   :  { %v3764_v50 = vmul.f32 0.03125, %v3763_v49 }
0x1e4b   :  { %v3765_v52 = vsub.f32 %v3760_v48, %v3764_v50 }
0x1e4d   :  { %v3766_v54 = vmul.f32 %v3765_v52, %v3765_v52 }
0x1e4f   :  { %v3767_v39 = vsel %vm2733_vm6, %v3766_v54, 0.0 }
0x1e50   :  { %3768 = vadd.xlane.f32.xlu0 %v3767_v39 }
0x1ed9   :  { %v3769_v13 = vpop.xlane.xlu0 %3768 }
0x1eda   :  { %v3770_v55 = vmul.f32 0.03125, %v3769_v13 }
0x1edc   :  { %v3771_v57 = vadd.f32 1e-05, %v3770_v55 }
0x1ede   :  { %6372 = vrsqrt.f32 %v3771_v57 }
0x1eeb   :  { %v6373_v40 = vpop.eup %6372 }
0x1eec   :  { %v3773_v5 = vmul.f32 %v6373_v40, %v3765_v52 }
0x1eee   :  { %v3774_v61 = vmul.f32 %v7198_v17, %v3773_v5 }
0x1ef0   :  { %v3775_v53 = vadd.f32 %v7201_v21, %v3774_v61 }
0x1ef2   :  { %v3776_v7 = vmul.f32 0.1, %v3775_v53 }
0x1ef4   :  { %v3777_v8 = vmax.f32 %v3775_v53, %v3776_v7  ;;  %v5441_v7 = vld [vmem:[%s7788_s12 + $0xc] sm:$0x3] }
0x1ef6   :  { %6101 = vmatmul.mubr.msk.f32.vlgmr.msra.gmra.mxu1 %vm483_vm3, %v3777_v8  ;;  %v3879_v8 = vsub.f32 %v5441_v7, %v5440_v20 }
0x1ef7   :  { %6120 = vmatpush3.msra.mxu1 %v7144_v59  ;;  %6121 = vmatprep.mubr.msk.f32.mxu1 %vm6495_vm2, %v6494_v6 }
0x1ef8   :  { %6124 = vmatprep.subr.mxu1 %v6494_v6 }
0x1fb6   :  { %v3847_v9 = vpop.f32.mrf.mxu1 }
0x1fb7   :  { %v3848_v10 = vadd.f32 %v7211_v37, %v3847_v9 }
0x1fb8   :  { %v6102_v11 = vpop.f32.mrf.mxu1 }
0x1fb9   :  { %v3851_v4 = vsel %vm2629_vm5, %v3848_v10, 0.0 }
0x1fba   :  { %3852 = vadd.xlane.f32.xlu0 %v3851_v4 }
0x1fd0   :  { %3870 = vperm.xlu0 %6270, %v3680_v62  }
0x2043   :  { %v3853_v63 = vpop.xlane.xlu0 %3852 }
0x2044   :  { %v3854_v12 = vmul.f32 0.125, %v3853_v63 }
0x2046   :  { %v3855_v2 = vsub.f32 %v3848_v10, %v3854_v12 }
0x2048   :  { %v3856_v3 = vmul.f32 %v3855_v2, %v3855_v2 }
0x204a   :  { %v3857_v18 = vsel %vm2629_vm5, %v3856_v3, 0.0 }
0x204b   :  { %3858 = vadd.xlane.f32.xlu1 %v3857_v18  ;;  %v3871_v15 = vpop.permute.xlu0 %3870 }
0x205c   :  { %3882 = vperm.xlu1 %6271, %v5440_v20  }
0x20d4   :  { %v3859_v22 = vpop.xlane.xlu1 %3858 }
0x20d5   :  { %v3860_v23 = vmul.f32 0.125, %v3859_v22 }
0x20d7   :  { %v3861_v24 = vadd.f32 1e-05, %v3860_v23 }
0x20d8   :  { %v3883_v47 = vpop.permute.xlu1 %3882 }
0x20d9   :  { %6374 = vrsqrt.f32 %v3861_v24  ;;  %v3885_v30 = vmul.f32 %v7168_v1, %v3883_v47 }
0x20e6   :  { %v6375_v25 = vpop.eup %6374 }
0x20e7   :  { %v3863_v27 = vmul.f32 %v6375_v25, %v3855_v2 }
0x20e9   :  { %v3864_v29 = vmul.f32 %v7222_v51, %v3863_v27 }
0x20eb   :  { %v3865_v28 = vadd.f32 %v7225_v58, %v3864_v29 }
0x20ed   :  { %v3866_v56 = vmul.f32 0.1, %v3865_v28 }
0x20ef   :  { %v3867_v14 = vmax.f32 %v3865_v28, %v3866_v56 }
0x20f1   :  { %v3873_v34 = vmul.f32 %v3871_v15, %v3867_v14 }
0x20f3   :  { %v7423_v19 = vadd.f32 %v3873_v34, %v7387_v38 }
0x20f5   :  { %3875 = vst.msk [vmem:[%s6687_s27 + $0xa] sm:$0x3] %vm2629_vm5, %v7423_v19  ;;  %6106 = vmatmul.mubr.msk.f32.vlgmr.msra.gmra.mxu0 %vm2652_vm4, %v7423_v19 }
0x20f6   :  { %6109 = vmatpush3.msra.mxu0 %v7178_v46  ;;  %6116 = vmatprep.mubr.msk.f32.mxu0 %vm6495_vm2, %v6494_v6 }
0x20f7   :  { %6110 = vmatprep.subr.mxu0 %v6494_v6 }
0x20f8   :  { %6111 = vmatpush3.msra.mxu0 %v7181_v31 }
0x20f9   :  { %6112 = vmatprep.subr.mxu0 %v6494_v6 }
0x20fa   :  { %6113 = vmatpush3.msra.mxu0 %v7186_v32 }
0x20fb   :  { %6114 = vmatprep.subr.mxu0 %v6494_v6 }
0x20fc   :  { %6115 = vmatpush3.msra.mxu0 %v7191_v33 }
0x20fd   :  { %6135 = vmatprep.subr.mxu0 %v6494_v6 }
0x21b5   :  { %v3955_v35 = vpop.f32.mrf.mxu0 }
0x21b6   :  { %v3956_v36 = vadd.f32 %v3955_v35, %v3885_v30 }
0x21b7   :  { %v6107_v26 = vpop.f32.mrf.mxu0 }
0x21b8   :  { %v3959_v38 = vadd.f32 %v7172_v16, %v3956_v36 }
0x21ba   :  { %v3960_v41 = vsel %vm2733_vm6, %v3959_v38, 0.0 }
0x21bb   :  { %3961 = vadd.xlane.f32.xlu1 %v3960_v41 }
0x2244   :  { %v3962_v42 = vpop.xlane.xlu1 %3961 }
0x2245   :  { %v3963_v43 = vmul.f32 0.03125, %v3962_v42 }
0x2247   :  { %v3964_v44 = vsub.f32 %v3959_v38, %v3963_v43  ;;  %v7484_v43 = vld [vmem:[%s7779_s25] sm:$0xff] }
0x2249   :  { %v3965_v45 = vmul.f32 %v3964_v44, %v3964_v44 }
0x224b   :  { %v3966_v48 = vsel %vm2733_vm6, %v3965_v45, 0.0 }
0x224c   :  { %3967 = vadd.xlane.f32.xlu0 %v3966_v48  ;;  %v5445_v48 = vld [vmem:[%s7788_s12 + $0xe] sm:$0x3] }
0x22d5   :  { %v3968_v0 = vpop.xlane.xlu0 %3967 }
0x22d6   :  { %v3969_v49 = vmul.f32 0.03125, %v3968_v0  ;;  %v4078_v0 = vsub.f32 %v5445_v48, %v5444_v60 }
0x22d8   :  { %v3970_v50 = vadd.f32 1e-05, %v3969_v49 }
0x22da   :  { %6376 = vrsqrt.f32 %v3970_v50 }
0x22e7   :  { %v6377_v52 = vpop.eup %6376 }
0x22e8   :  { %v3972_v54 = vmul.f32 %v6377_v52, %v3964_v44 }
0x22ea   :  { %v3973_v39 = vmul.f32 %v7198_v17, %v3972_v54 }
0x22ec   :  { %v3974_v13 = vadd.f32 %v7201_v21, %v3973_v39 }
0x22ee   :  { %v3975_v55 = vmul.f32 0.1, %v3974_v13 }
0x22f0   :  { %v3976_v57 = vmax.f32 %v3974_v13, %v3975_v55  ;;  %v7495_v13 = vld [vmem:[%s7788_s12 + $0xe] sm:$0x3] }
0x22f2   :  { %6117 = vmatmul.mubr.msk.f32.vlgmr.msra.gmra.mxu0 %vm483_vm3, %v3976_v57 }
0x22f3   :  { %6136 = vmatpush3.msra.mxu0 %v7144_v59  ;;  %6137 = vmatprep.mubr.msk.f32.mxu0 %vm6495_vm2, %v6494_v6 }
0x22f4   :  { %6140 = vmatprep.subr.mxu0 %v6494_v6 }
0x23b2   :  { %v4046_v40 = vpop.f32.mrf.mxu0 }
0x23b3   :  { %v4047_v5 = vadd.f32 %v7211_v37, %v4046_v40 }
0x23b4   :  { %v6118_v61 = vpop.f32.mrf.mxu0 }
0x23b5   :  { %v4050_v53 = vsel %vm2629_vm5, %v4047_v5, 0.0 }
0x23b6   :  { %4051 = vadd.xlane.f32.xlu0 %v4050_v53 }
0x23cc   :  { %4069 = vperm.xlu0 %6270, %v3879_v8  }
0x243f   :  { %v4052_v9 = vpop.xlane.xlu0 %4051 }
0x2440   :  { %v4053_v10 = vmul.f32 0.125, %v4052_v9 }
0x2442   :  { %v4054_v11 = vsub.f32 %v4047_v5, %v4053_v10 }
0x2444   :  { %v4055_v59 = vmul.f32 %v4054_v11, %v4054_v11 }
0x2446   :  { %v4056_v4 = vsel %vm2629_vm5, %v4055_v59, 0.0  ;;  %v7509_v59 = vld [vmem:[%s7784_s19 + $0x18] sm:$0xff] }
0x2447   :  { %4057 = vadd.xlane.f32.xlu1 %v4056_v4  ;;  %v4070_v24 = vpop.permute.xlu0 %4069  ;;  %v7526_v4 = vld [vmem:[%s7784_s19] sm:$0xff] }
0x2458   :  { %4081 = vperm.xlu1 %6271, %v5444_v60  }
0x24d0   :  { %v4058_v62 = vpop.xlane.xlu1 %4057 }
0x24d1   :  { %v4059_v63 = vmul.f32 0.125, %v4058_v62  ;;  %v7531_v62 = vld [vmem:[%s7782_s8] ss:$0 sm:$0xff] }
0x24d3   :  { %v4060_v12 = vadd.f32 1e-05, %v4059_v63 }
0x24d4   :  { %v4082_v29 = vpop.permute.xlu1 %4081 }
0x24d5   :  { %6378 = vrsqrt.f32 %v4060_v12 }
0x24e2   :  { %v6379_v2 = vpop.eup %6378 }
0x24e3   :  { %v4062_v3 = vmul.f32 %v6379_v2, %v4054_v11 }
0x24e5   :  { %v4063_v18 = vmul.f32 %v7222_v51, %v4062_v3 }
0x24e7   :  { %v4064_v20 = vadd.f32 %v7225_v58, %v4063_v18  ;;  %v7535_v18 = vld [vmem:[%s7783_s14] ss:$0 sm:$0xff] }
0x24e9   :  { %v4065_v22 = vmul.f32 0.1, %v4064_v20 }
0x24eb   :  { %v4066_v23 = vmax.f32 %v4064_v20, %v4065_v22 }
0x24ed   :  { %v4072_v25 = vmul.f32 %v4070_v24, %v4066_v23 }
0x24ef   :  { %v7459_v27 = vadd.f32 %v4072_v25, %v7423_v19 }
0x24f1   :  { %4074 = vst.msk [vmem:[%s6687_s27 + $0xc] sm:$0x3] %vm2629_vm5, %v7459_v27  ;;  %6122 = vmatmul.mubr.msk.f32.vlgmr.msra.gmra.mxu1 %vm2652_vm4, %v7459_v27 }
0x24f2   :  { %6125 = vmatpush3.msra.mxu1 %v7178_v46  ;;  %6132 = vmatprep.mubr.msk.f32.mxu1 %vm6495_vm2, %v6494_v6  ;;  %v4084_v46 = vmul.f32 %v7168_v1, %v4082_v29 }
0x24f3   :  { %6126 = vmatprep.subr.mxu1 %v6494_v6 }
0x24f4   :  { %6127 = vmatpush3.msra.mxu1 %v7181_v31 }
0x24f5   :  { %6128 = vmatprep.subr.mxu1 %v6494_v6 }
0x24f6   :  { %6129 = vmatpush3.msra.mxu1 %v7186_v32 }
0x24f7   :  { %6130 = vmatprep.subr.mxu1 %v6494_v6 }
0x24f8   :  { %6131 = vmatpush3.msra.mxu1 %v7191_v33 }
0x24f9   :  { %6151 = vmatprep.subr.mxu1 %v6494_v6 }
0x25b1   :  { %v4154_v28 = vpop.f32.mrf.mxu1 }
0x25b2   :  { %v4155_v56 = vadd.f32 %v4154_v28, %v4084_v46 }
0x25b3   :  { %v6123_v14 = vpop.f32.mrf.mxu1 }
0x25b4   :  { %v4158_v15 = vadd.f32 %v7172_v16, %v4155_v56 }
0x25b6   :  { %v4159_v31 = vsel %vm2733_vm6, %v4158_v15, 0.0 }
0x25b7   :  { %4160 = vadd.xlane.f32.xlu1 %v4159_v31  ;;  %v7541_v31 = vld [vmem:[%s7785_s24] ss:$0 sm:$0xff] }
0x2640   :  { %v4161_v34 = vpop.xlane.xlu1 %4160 }
0x2641   :  { %v4162_v19 = vmul.f32 0.03125, %v4161_v34 }
0x2643   :  { %v4163_v32 = vsub.f32 %v4158_v15, %v4162_v19  ;;  %v7545_v19 = vld [vmem:[%s7786_s30] ss:$0 sm:$0xff] }
0x2645   :  { %v4164_v47 = vmul.f32 %v4163_v32, %v4163_v32 }
0x2647   :  { %v4165_v33 = vsel %vm2733_vm6, %v4164_v47, 0.0 }
0x2648   :  { %4166 = vadd.xlane.f32.xlu0 %v4165_v33 }
0x26d1   :  { %v4167_v30 = vpop.xlane.xlu0 %4166 }
0x26d2   :  { %v4168_v35 = vmul.f32 0.03125, %v4167_v30 }
0x26d4   :  { %v4169_v36 = vadd.f32 1e-05, %v4168_v35  ;;  %v7554_v35 = vld [vmem:[%s7787_s6] ss:$0 sm:$0xff] }
0x26d6   :  { %6380 = vrsqrt.f32 %v4169_v36 }
0x26e3   :  { %v6381_v1 = vpop.eup %6380 }
0x26e4   :  { %v4171_v26 = vmul.f32 %v6381_v1, %v4163_v32 }
0x26e6   :  { %v4172_v16 = vmul.f32 %v7198_v17, %v4171_v26 }
0x26e8   :  { %v4173_v38 = vadd.f32 %v7201_v21, %v4172_v16  ;;  %v5449_v16 = vld [vmem:[%s7788_s12 + $0x10] sm:$0x3] }
0x26ea   :  { %v4174_v41 = vmul.f32 0.1, %v4173_v38 }
0x26ec   :  { %v4175_v42 = vmax.f32 %v4173_v38, %v4174_v41  ;;  %v4277_v38 = vsub.f32 %v5449_v16, %v7495_v13  ;;  %v7608_v16 = vld [vmem:[%s7788_s12 + $0x12] sm:$0x3] }
0x26ee   :  { %6133 = vmatmul.mubr.msk.f32.vlgmr.msra.gmra.mxu1 %vm483_vm3, %v4175_v42 }
0x26ef   :  { %6152 = vmatpush3.msra.mxu1 %v7484_v43  ;;  %6153 = vmatprep.mubr.msk.f32.mxu1 %vm6495_vm2, %v6494_v6 }
0x26f0   :  { %6156 = vmatprep.subr.mxu1 %v6494_v6 }
0x27ae   :  { %v4245_v44 = vpop.f32.mrf.mxu1 }
0x27af   :  { %v4246_v45 = vadd.f32 %v7211_v37, %v4245_v44 }
0x27b0   :  { %v6134_v17 = vpop.f32.mrf.mxu1 }
0x27b1   :  { %v4249_v21 = vsel %vm2629_vm5, %v4246_v45, 0.0 }
0x27b2   :  { %4250 = vadd.xlane.f32.xlu0 %v4249_v21  ;;  %v7562_v21 = vld [vmem:[%s7788_s12 + $0x10] sm:$0x3] }
0x27c8   :  { %4268 = vperm.xlu0 %6270, %v4078_v0  }
0x283b   :  { %v4251_v49 = vpop.xlane.xlu0 %4250 }
0x283c   :  { %v4252_v50 = vmul.f32 0.125, %v4251_v49 }
0x283e   :  { %v4253_v52 = vsub.f32 %v4246_v45, %v4252_v50 }
0x2840   :  { %v4254_v54 = vmul.f32 %v4253_v52, %v4253_v52 }
0x2842   :  { %v4255_v39 = vsel %vm2629_vm5, %v4254_v54, 0.0  ;;  %v7566_v54 = vld [vmem:[%s7789_s15] ss:$0 sm:$0xff] }
0x2843   :  { %4256 = vadd.xlane.f32.xlu1 %v4255_v39  ;;  %v4269_v9 = vpop.permute.xlu0 %4268 }
0x2854   :  { %4280 = vperm.xlu1 %6271, %v7495_v13   ;;  %v7570_v13 = vld [vmem:[%s7790_s16] ss:$0 sm:$0xff] }
0x28cc   :  { %v4257_v37 = vpop.xlane.xlu1 %4256 }
0x28cd   :  { %v4258_v55 = vmul.f32 0.125, %v4257_v37 }
0x28cf   :  { %v4259_v57 = vadd.f32 1e-05, %v4258_v55 }
0x28d0   :  { %v4281_v60 = vpop.permute.xlu1 %4280 }
0x28d1   :  { %6382 = vrsqrt.f32 %v4259_v57  ;;  %v4283_v63 = vmul.f32 %v7531_v62, %v4281_v60 }
0x28de   :  { %v6383_v40 = vpop.eup %6382 }
0x28df   :  { %v4261_v5 = vmul.f32 %v6383_v40, %v4253_v52 }
0x28e1   :  { %v4262_v61 = vmul.f32 %v7222_v51, %v4261_v5  ;;  %v7516_v51 = vld [vmem:[%s7784_s19 + $0x10] sm:$0xff] }
0x28e3   :  { %v4263_v53 = vadd.f32 %v7225_v58, %v4262_v61  ;;  %v7521_v58 = vld [vmem:[%s7784_s19 + $0x8] sm:$0xff] }
0x28e5   :  { %v4264_v7 = vmul.f32 0.1, %v4263_v53 }
0x28e7   :  { %v4265_v8 = vmax.f32 %v4263_v53, %v4264_v7 }
0x28e9   :  { %v4271_v10 = vmul.f32 %v4269_v9, %v4265_v8 }
0x28eb   :  { %v7501_v11 = vadd.f32 %v4271_v10, %v7459_v27 }
0x28ed   :  { %4273 = vst.msk [vmem:[%s6687_s27 + $0xe] sm:$0x3] %vm2629_vm5, %v7501_v11  ;;  %6138 = vmatmul.mubr.msk.f32.vlgmr.msra.gmra.mxu0 %vm2652_vm4, %v7501_v11 }
0x28ee   :  { %6141 = vmatpush3.msra.mxu0 %v7509_v59  ;;  %6148 = vmatprep.mubr.msk.f32.mxu0 %vm6495_vm2, %v6494_v6 }
0x28ef   :  { %6142 = vmatprep.subr.mxu0 %v6494_v6 }
0x28f0   :  { %6143 = vmatpush3.msra.mxu0 %v7516_v51 }
0x28f1   :  { %6144 = vmatprep.subr.mxu0 %v6494_v6 }
0x28f2   :  { %6145 = vmatpush3.msra.mxu0 %v7521_v58 }
0x28f3   :  { %6146 = vmatprep.subr.mxu0 %v6494_v6 }
0x28f4   :  { %6147 = vmatpush3.msra.mxu0 %v7526_v4 }
0x28f5   :  { %6167 = vmatprep.subr.mxu0 %v6494_v6 }
0x29ad   :  { %v4353_v12 = vpop.f32.mrf.mxu0 }
0x29ae   :  { %v4354_v2 = vadd.f32 %v4353_v12, %v4283_v63 }
0x29af   :  { %v6139_v3 = vpop.f32.mrf.mxu0 }
0x29b0   :  { %v4357_v20 = vadd.f32 %v7535_v18, %v4354_v2 }
0x29b2   :  { %v4358_v22 = vsel %vm2733_vm6, %v4357_v20, 0.0 }
0x29b3   :  { %4359 = vadd.xlane.f32.xlu1 %v4358_v22 }
0x2a3c   :  { %v4360_v23 = vpop.xlane.xlu1 %4359 }
0x2a3d   :  { %v4361_v24 = vmul.f32 0.03125, %v4360_v23 }
0x2a3f   :  { %v4362_v25 = vsub.f32 %v4357_v20, %v4361_v24 }
0x2a41   :  { %v4363_v27 = vmul.f32 %v4362_v25, %v4362_v25 }
0x2a43   :  { %v4364_v29 = vsel %vm2733_vm6, %v4363_v27, 0.0 }
0x2a44   :  { %4365 = vadd.xlane.f32.xlu0 %v4364_v29 }
0x2acd   :  { %v4366_v46 = vpop.xlane.xlu0 %4365 }
0x2ace   :  { %v4367_v28 = vmul.f32 0.03125, %v4366_v46 }
0x2ad0   :  { %v4368_v56 = vadd.f32 1e-05, %v4367_v28 }
0x2ad2   :  { %6384 = vrsqrt.f32 %v4368_v56 }
0x2adf   :  { %v6385_v14 = vpop.eup %6384 }
0x2ae0   :  { %v4370_v15 = vmul.f32 %v6385_v14, %v4362_v25 }
0x2ae2   :  { %v4371_v34 = vmul.f32 %v7541_v31, %v4370_v15 }
0x2ae4   :  { %v4372_v32 = vadd.f32 %v7545_v19, %v4371_v34 }
0x2ae6   :  { %v4373_v47 = vmul.f32 0.1, %v4372_v32 }
0x2ae8   :  { %v4374_v33 = vmax.f32 %v4372_v32, %v4373_v47  ;;  %v5453_v47 = vld [vmem:[%s7788_s12 + $0x12] sm:$0x3] }
0x2aea   :  { %6149 = vmatmul.mubr.msk.f32.vlgmr.msra.gmra.mxu0 %vm483_vm3, %v4374_v33  ;;  %v4476_v33 = vsub.f32 %v5453_v47, %v7562_v21  ;;  %v5457_v47 = vld [vmem:[%s7788_s12 + $0x14] sm:$0x3] }
0x2aeb   :  { %6168 = vmatpush3.msra.mxu0 %v7484_v43  ;;  %6169 = vmatprep.mubr.msk.f32.mxu0 %vm6495_vm2, %v6494_v6 }
0x2aec   :  { %6172 = vmatprep.subr.mxu0 %v6494_v6 }
0x2baa   :  { %v4444_v30 = vpop.f32.mrf.mxu0 }
0x2bab   :  { %v4445_v36 = vadd.f32 %v7554_v35, %v4444_v30 }
0x2bac   :  { %v6150_v1 = vpop.f32.mrf.mxu0 }
0x2bad   :  { %v4448_v26 = vsel %vm2629_vm5, %v4445_v36, 0.0 }
0x2bae   :  { %4449 = vadd.xlane.f32.xlu0 %v4448_v26 }
0x2bc4   :  { %4467 = vperm.xlu0 %6270, %v4277_v38  }
0x2c37   :  { %v4450_v41 = vpop.xlane.xlu0 %4449 }
0x2c38   :  { %v4451_v42 = vmul.f32 0.125, %v4450_v41 }
0x2c3a   :  { %v4452_v44 = vsub.f32 %v4445_v36, %v4451_v42 }
0x2c3c   :  { %v4453_v45 = vmul.f32 %v4452_v44, %v4452_v44 }
0x2c3e   :  { %v4454_v17 = vsel %vm2629_vm5, %v4453_v45, 0.0 }
0x2c3f   :  { %4455 = vadd.xlane.f32.xlu1 %v4454_v17  ;;  %v4468_v40 = vpop.permute.xlu0 %4467 }
0x2c50   :  { %4479 = vperm.xlu1 %6271, %v7562_v21  }
0x2cc8   :  { %v4456_v48 = vpop.xlane.xlu1 %4455 }
0x2cc9   :  { %v4457_v0 = vmul.f32 0.125, %v4456_v48 }
0x2ccb   :  { %v4458_v49 = vadd.f32 1e-05, %v4457_v0 }
0x2ccc   :  { %v4480_v53 = vpop.permute.xlu1 %4479 }
0x2ccd   :  { %6386 = vrsqrt.f32 %v4458_v49  ;;  %v4482_v7 = vmul.f32 %v7531_v62, %v4480_v53 }
0x2cda   :  { %v6387_v50 = vpop.eup %6386 }
0x2cdb   :  { %v4460_v52 = vmul.f32 %v6387_v50, %v4452_v44 }
0x2cdd   :  { %v4461_v39 = vmul.f32 %v7566_v54, %v4460_v52 }
0x2cdf   :  { %v4462_v37 = vadd.f32 %v7570_v13, %v4461_v39 }
0x2ce1   :  { %v4463_v55 = vmul.f32 0.1, %v4462_v37 }
0x2ce3   :  { %v4464_v57 = vmax.f32 %v4462_v37, %v4463_v55 }
0x2ce5   :  { %v4470_v5 = vmul.f32 %v4468_v40, %v4464_v57 }
0x2ce7   :  { %v7574_v61 = vadd.f32 %v4470_v5, %v7501_v11 }
0x2ce9   :  { %4472 = vst.msk [vmem:[%s6687_s27 + $0x10] sm:$0x3] %vm2629_vm5, %v7574_v61  ;;  %6154 = vmatmul.mubr.msk.f32.vlgmr.msra.gmra.mxu1 %vm2652_vm4, %v7574_v61 }
0x2cea   :  { %6157 = vmatpush3.msra.mxu1 %v7509_v59  ;;  %6164 = vmatprep.mubr.msk.f32.mxu1 %vm6495_vm2, %v6494_v6 }
0x2ceb   :  { %6158 = vmatprep.subr.mxu1 %v6494_v6 }
0x2cec   :  { %6159 = vmatpush3.msra.mxu1 %v7516_v51 }
0x2ced   :  { %6160 = vmatprep.subr.mxu1 %v6494_v6 }
0x2cee   :  { %6161 = vmatpush3.msra.mxu1 %v7521_v58 }
0x2cef   :  { %6162 = vmatprep.subr.mxu1 %v6494_v6 }
0x2cf0   :  { %6163 = vmatpush3.msra.mxu1 %v7526_v4 }
0x2cf1   :  { %6183 = vmatprep.subr.mxu1 %v6494_v6 }
0x2da9   :  { %v4552_v8 = vpop.f32.mrf.mxu1 }
0x2daa   :  { %v4553_v9 = vadd.f32 %v4552_v8, %v4482_v7 }
0x2dab   :  { %v6155_v10 = vpop.f32.mrf.mxu1 }
0x2dac   :  { %v4556_v11 = vadd.f32 %v7535_v18, %v4553_v9 }
0x2dae   :  { %v4557_v60 = vsel %vm2733_vm6, %v4556_v11, 0.0 }
0x2daf   :  { %4558 = vadd.xlane.f32.xlu1 %v4557_v60 }
0x2e38   :  { %v4559_v63 = vpop.xlane.xlu1 %4558 }
0x2e39   :  { %v4560_v12 = vmul.f32 0.03125, %v4559_v63 }
0x2e3b   :  { %v4561_v2 = vsub.f32 %v4556_v11, %v4560_v12 }
0x2e3d   :  { %v4562_v3 = vmul.f32 %v4561_v2, %v4561_v2 }
0x2e3f   :  { %v4563_v20 = vsel %vm2733_vm6, %v4562_v3, 0.0 }
0x2e40   :  { %4564 = vadd.xlane.f32.xlu0 %v4563_v20 }
0x2ec9   :  { %v4565_v22 = vpop.xlane.xlu0 %4564 }
0x2eca   :  { %v4566_v23 = vmul.f32 0.03125, %v4565_v22 }
0x2ecc   :  { %v4567_v24 = vadd.f32 1e-05, %v4566_v23 }
0x2ece   :  { %6388 = vrsqrt.f32 %v4567_v24  ;;  %v5073_v24 = vld [vmem:[%s7791_s18] sm:$0xff] }
0x2edb   :  { %v6389_v25 = vpop.eup %6388 }
0x2edc   :  { %v4569_v27 = vmul.f32 %v6389_v25, %v4561_v2  ;;  %v5070_v25 = vld [vmem:[%s6687_s27] sm:$0xff] }
0x2ede   :  { %v4570_v29 = vmul.f32 %v7541_v31, %v4569_v27  ;;  %v5071_v27 = vld [vmem:[%s6687_s27 + $0x8] sm:$0xff] }
0x2ee0   :  { %v4571_v46 = vadd.f32 %v7545_v19, %v4570_v29 }
0x2ee2   :  { %v4572_v28 = vmul.f32 0.1, %v4571_v46 }
0x2ee4   :  { %v4573_v56 = vmax.f32 %v4571_v46, %v4572_v28 }
0x2ee6   :  { %6165 = vmatmul.mubr.msk.f32.vlgmr.msra.gmra.mxu1 %vm483_vm3, %v4573_v56 }
0x2ee7   :  { %6184 = vmatpush3.msra.mxu1 %v7484_v43  ;;  %6185 = vmatprep.mubr.msk.f32.mxu1 %vm6495_vm2, %v6494_v6 }
0x2ee8   :  { %6188 = vmatprep.subr.mxu1 %v6494_v6 }
0x2fa6   :  { %v4643_v14 = vpop.f32.mrf.mxu1 }
0x2fa7   :  { %v4644_v15 = vadd.f32 %v7554_v35, %v4643_v14 }
0x2fa8   :  { %v6166_v34 = vpop.f32.mrf.mxu1 }
0x2fa9   :  { %v4647_v32 = vsel %vm2629_vm5, %v4644_v15, 0.0 }
0x2faa   :  { %4648 = vadd.xlane.f32.xlu0 %v4647_v32 }
0x2fc0   :  { %4666 = vperm.xlu0 %6270, %v4476_v33   ;;  %v4675_v33 = vsub.f32 %v5457_v47, %v7608_v16 }
0x3033   :  { %v4649_v30 = vpop.xlane.xlu0 %4648 }
0x3034   :  { %v4650_v36 = vmul.f32 0.125, %v4649_v30 }
0x3036   :  { %v4651_v43 = vsub.f32 %v4644_v15, %v4650_v36 }
0x3038   :  { %v4652_v1 = vmul.f32 %v4651_v43, %v4651_v43 }
0x303a   :  { %v4653_v26 = vsel %vm2629_vm5, %v4652_v1, 0.0 }
0x303b   :  { %4654 = vadd.xlane.f32.xlu1 %v4653_v26  ;;  %v4667_v49 = vpop.permute.xlu0 %4666 }
0x304c   :  { %4678 = vperm.xlu1 %6271, %v7608_v16  }
0x30c4   :  { %v4655_v38 = vpop.xlane.xlu1 %4654 }
0x30c5   :  { %v4656_v41 = vmul.f32 0.125, %v4655_v38  ;;  %v7659_v38 = vld [vmem:[%s7788_s12 + $0x14] sm:$0x3] }
0x30c7   :  { %v4657_v42 = vadd.f32 1e-05, %v4656_v41 }
0x30c8   :  { %v4679_v39 = vpop.permute.xlu1 %4678 }
0x30c9   :  { %6390 = vrsqrt.f32 %v4657_v42  ;;  %v4681_v37 = vmul.f32 %v7531_v62, %v4679_v39 }
0x30d6   :  { %v6391_v44 = vpop.eup %6390 }
0x30d7   :  { %v4659_v45 = vmul.f32 %v6391_v44, %v4651_v43 }
0x30d9   :  { %v4660_v17 = vmul.f32 %v7566_v54, %v4659_v45 }
0x30db   :  { %v4661_v21 = vadd.f32 %v7570_v13, %v4660_v17 }
0x30dd   :  { %v4662_v48 = vmul.f32 0.1, %v4661_v21 }
0x30df   :  { %v4663_v0 = vmax.f32 %v4661_v21, %v4662_v48 }
0x30e1   :  { %v4669_v50 = vmul.f32 %v4667_v49, %v4663_v0 }
0x30e3   :  { %v7614_v52 = vadd.f32 %v4669_v50, %v7574_v61 }
0x30e5   :  { %4671 = vst.msk [vmem:[%s6687_s27 + $0x12] sm:$0x3] %vm2629_vm5, %v7614_v52  ;;  %6170 = vmatmul.mubr.msk.f32.vlgmr.msra.gmra.mxu0 %vm2652_vm4, %v7614_v52 }
0x30e6   :  { %6173 = vmatpush3.msra.mxu0 %v7509_v59  ;;  %6180 = vmatprep.mubr.msk.f32.mxu0 %vm6495_vm2, %v6494_v6 }
0x30e7   :  { %6174 = vmatprep.subr.mxu0 %v6494_v6 }
0x30e8   :  { %6175 = vmatpush3.msra.mxu0 %v7516_v51 }
0x30e9   :  { %6176 = vmatprep.subr.mxu0 %v6494_v6 }
0x30ea   :  { %6177 = vmatpush3.msra.mxu0 %v7521_v58 }
0x30eb   :  { %6178 = vmatprep.subr.mxu0 %v6494_v6 }
0x30ec   :  { %6179 = vmatpush3.msra.mxu0 %v7526_v4 }
0x30ed   :  { %6199 = vmatprep.subr.mxu0 %v6494_v6 }
0x31a5   :  { %v4751_v55 = vpop.f32.mrf.mxu0 }
0x31a6   :  { %v4752_v57 = vadd.f32 %v4751_v55, %v4681_v37 }
0x31a7   :  { %v6171_v40 = vpop.f32.mrf.mxu0 }
0x31a8   :  { %v4755_v5 = vadd.f32 %v7535_v18, %v4752_v57 }
0x31aa   :  { %v4756_v61 = vsel %vm2733_vm6, %v4755_v5, 0.0 }
0x31ab   :  { %4757 = vadd.xlane.f32.xlu1 %v4756_v61 }
0x3234   :  { %v4758_v53 = vpop.xlane.xlu1 %4757 }
0x3235   :  { %v4759_v7 = vmul.f32 0.03125, %v4758_v53 }
0x3237   :  { %v4760_v8 = vsub.f32 %v4755_v5, %v4759_v7 }
0x3239   :  { %v4761_v9 = vmul.f32 %v4760_v8, %v4760_v8 }
0x323b   :  { %v4762_v10 = vsel %vm2733_vm6, %v4761_v9, 0.0 }
0x323c   :  { %4763 = vadd.xlane.f32.xlu0 %v4762_v10 }
0x32c5   :  { %v4764_v11 = vpop.xlane.xlu0 %4763 }
0x32c6   :  { %v4765_v60 = vmul.f32 0.03125, %v4764_v11 }
0x32c8   :  { %v4766_v63 = vadd.f32 1e-05, %v4765_v60  ;;  %v7689_v60 = vld [vmem:[%s7792_s22] ss:$0 sm:$0xff] }
0x32ca   :  { %6392 = vrsqrt.f32 %v4766_v63 }
0x32d7   :  { %v6393_v12 = vpop.eup %6392 }
0x32d8   :  { %v4768_v2 = vmul.f32 %v6393_v12, %v4760_v8 }
0x32da   :  { %v4769_v3 = vmul.f32 %v7541_v31, %v4768_v2 }
0x32dc   :  { %v4770_v20 = vadd.f32 %v7545_v19, %v4769_v3  ;;  %v5179_v3 = vld [vmem:[%s7793_s23 + $0x18] sm:$0xff] }
0x32de   :  { %v4771_v22 = vmul.f32 0.1, %v4770_v20 }
0x32e0   :  { %v4772_v23 = vmax.f32 %v4770_v20, %v4771_v22  ;;  %v5178_v20 = vld [vmem:[%s7793_s23 + $0x10] sm:$0xff] }
0x32e2   :  { %6181 = vmatmul.mubr.msk.f32.vlgmr.msra.gmra.mxu0 %vm483_vm3, %v4772_v23  ;;  %v5176_v23 = vld [vmem:[%s7793_s23] sm:$0xff] }
0x32e3   :  { %6200 = vmatpush3.msra.mxu0 %v5073_v24  ;;  %6201 = vmatprep.mubr.msk.f32.mxu0 %vm6495_vm2, %v6494_v6 }
0x32e6   :  { %6202 = vmatmul.mubr.msk.f32.vlgmr.msra.gmra.mxu0 %vm2652_vm4, %v5070_v25 }
0x32e7   :  { %6204 = vmatprep.mubr.msk.f32.mxu0 %vm6495_vm2, %v6494_v6 }
0x32ea   :  { %6205 = vmatmul.mubr.msk.f32.gmra.mxu0 %vm2652_vm4, %v5071_v27 }
0x32eb   :  { %6207 = vmatprep.mubr.msk.f32.mxu0 %vm6495_vm2, %v6494_v6 }
0x33a2   :  { %v4842_v29 = vpop.f32.mrf.mxu0 }
0x33a3   :  { %v4843_v46 = vadd.f32 %v7554_v35, %v4842_v29 }
0x33a4   :  { %v6182_v28 = vpop.f32.mrf.mxu0 }
0x33a5   :  { %v4846_v56 = vsel %vm2629_vm5, %v4843_v46, 0.0 }
0x33a6   :  { %4847 = vadd.xlane.f32.xlu0 %v4846_v56  ;;  %v7651_v14 = vpop.f32.mrf.mxu0 }
0x33a7   :  { %v5157_v12 = vadd.f32 %v7689_v60, %v7651_v14  ;;  %v7714_v14 = vld [vmem:[%s7794_s26] ss:$0 sm:$0xff] }
0x33a8   :  { %v6203_v15 = vpop.f32.mrf.mxu0 }
0x33a9   :  { %v5170_v22 = vmul.f32 0.1, %v5157_v12 }
0x33aa   :  { %v7653_v34 = vpop.f32.mrf.mxu0 }
0x33ab   :  { %v5173_v24 = vmax.f32 %v5157_v12, %v5170_v22 }
0x33ac   :  { %v6206_v32 = vpop.f32.mrf.mxu0 }
0x33bc   :  { %4865 = vperm.xlu0 %6270, %v4675_v33  }
0x342f   :  { %v4848_v30 = vpop.xlane.xlu0 %4847 }
0x3430   :  { %v4849_v36 = vmul.f32 0.125, %v4848_v30 }
0x3432   :  { %v4850_v43 = vsub.f32 %v4843_v46, %v4849_v36 }
0x3434   :  { %v4851_v1 = vmul.f32 %v4850_v43, %v4850_v43 }
0x3436   :  { %v4852_v26 = vsel %vm2629_vm5, %v4851_v1, 0.0 }
0x3437   :  { %4853 = vadd.xlane.f32.xlu1 %v4852_v26  ;;  %v4866_v49 = vpop.permute.xlu0 %4865 }
0x3448   :  { %4877 = vperm.xlu1 %6271, %v7659_v38  }
0x34c0   :  { %v4854_v41 = vpop.xlane.xlu1 %4853 }
0x34c1   :  { %v4855_v42 = vmul.f32 0.125, %v4854_v41 }
0x34c3   :  { %v4856_v44 = vadd.f32 1e-05, %v4855_v42 }
0x34c5   :  { %6394 = vrsqrt.f32 %v4856_v44 }
0x34d2   :  { %v6395_v45 = vpop.eup %6394 }
0x34d3   :  { %v4858_v17 = vmul.f32 %v6395_v45, %v4850_v43 }
0x34d5   :  { %v4859_v16 = vmul.f32 %v7566_v54, %v4858_v17 }
0x34d7   :  { %v4860_v21 = vadd.f32 %v7570_v13, %v4859_v16 }
0x34d9   :  { %v4861_v48 = vmul.f32 0.1, %v4860_v21 }
0x34db   :  { %v4862_v0 = vmax.f32 %v4860_v21, %v4861_v48 }
0x34dd   :  { %v4868_v50 = vmul.f32 %v4866_v49, %v4862_v0 }
0x34df   :  { %v7665_v39 = vadd.f32 %v4868_v50, %v7614_v52  ;;  %v4878_v52 = vpop.permute.xlu1 %4877 }
0x34e1   :  { %4870 = vst.msk [vmem:[%s6687_s27 + $0x14] sm:$0x3] %vm2629_vm5, %v7665_v39  ;;  %6186 = vmatmul.mubr.msk.f32.vlgmr.msra.gmra.mxu1 %vm2652_vm4, %v7665_v39 }
0x34e2   :  { %6189 = vmatpush3.msra.mxu1 %v7509_v59  ;;  %6196 = vmatprep.mubr.msk.f32.mxu1 %vm6495_vm2, %v6494_v6  ;;  %v4880_v59 = vmul.f32 %v7531_v62, %v4878_v52 }
0x34e3   :  { %6190 = vmatprep.subr.mxu1 %v6494_v6 }
0x34e4   :  { %6191 = vmatpush3.msra.mxu1 %v7516_v51 }
0x34e5   :  { %6192 = vmatprep.subr.mxu1 %v6494_v6 }
0x34e6   :  { %6193 = vmatpush3.msra.mxu1 %v7521_v58 }
0x34e7   :  { %6194 = vmatprep.subr.mxu1 %v6494_v6 }
0x34e8   :  { %6195 = vmatpush3.msra.mxu1 %v7526_v4 }
0x34e9   :  { %6210 = vmatprep.subr.mxu1 %v6494_v6 }
0x35a1   :  { %v4950_v37 = vpop.f32.mrf.mxu1 }
0x35a2   :  { %v4951_v55 = vadd.f32 %v4950_v37, %v4880_v59 }
0x35a3   :  { %v6187_v57 = vpop.f32.mrf.mxu1 }
0x35a4   :  { %v4954_v40 = vadd.f32 %v7535_v18, %v4951_v55 }
0x35a6   :  { %v4955_v51 = vsel %vm2733_vm6, %v4954_v40, 0.0 }
0x35a7   :  { %4956 = vadd.xlane.f32.xlu1 %v4955_v51 }
0x3630   :  { %v4957_v5 = vpop.xlane.xlu1 %4956 }
0x3631   :  { %v4958_v58 = vmul.f32 0.03125, %v4957_v5 }
0x3633   :  { %v4959_v61 = vsub.f32 %v4954_v40, %v4958_v58 }
0x3635   :  { %v4960_v53 = vmul.f32 %v4959_v61, %v4959_v61 }
0x3637   :  { %v4961_v4 = vsel %vm2733_vm6, %v4960_v53, 0.0 }
0x3638   :  { %4962 = vadd.xlane.f32.xlu0 %v4961_v4 }
0x36c1   :  { %v4963_v7 = vpop.xlane.xlu0 %4962 }
0x36c2   :  { %v4964_v62 = vmul.f32 0.03125, %v4963_v7 }
0x36c4   :  { %v4965_v8 = vadd.f32 1e-05, %v4964_v62 }
0x36c6   :  { %6396 = vrsqrt.f32 %v4965_v8 }
0x36d3   :  { %v6397_v9 = vpop.eup %6396 }
0x36d4   :  { %v4967_v18 = vmul.f32 %v6397_v9, %v4959_v61 }
0x36d6   :  { %v4968_v10 = vmul.f32 %v7541_v31, %v4967_v18  ;;  %v5162_v31 = vadd.f32 %v7689_v60, %v7653_v34 }
0x36d8   :  { %v4969_v11 = vadd.f32 %v7545_v19, %v4968_v10  ;;  %v5177_v19 = vld [vmem:[%s7793_s23 + $0x8] sm:$0xff]  ;;  %v5171_v25 = vmul.f32 0.1, %v5162_v31 }
0x36da   :  { %v4970_v63 = vmul.f32 0.1, %v4969_v11  ;;  %v5174_v27 = vmax.f32 %v5162_v31, %v5171_v25 }
0x36dc   :  { %v4971_v2 = vmax.f32 %v4969_v11, %v4970_v63 }
0x36de   :  { %6197 = vmatmul.mubr.msk.f32.vlgmr.msra.gmra.mxu1 %vm483_vm3, %v4971_v2 }
0x36df   :  { %6211 = vmatpush3.msra.mxu1 %v5179_v3  ;;  %6218 = vmatprep.mubr.msk.f32.mxu1 %vm6495_vm2, %v6494_v6 }
0x36e0   :  { %6212 = vmatprep.subr.mxu1 %v6494_v6 }
0x36e1   :  { %6213 = vmatpush3.msra.mxu1 %v5178_v20 }
0x36e2   :  { %6214 = vmatprep.subr.mxu1 %v6494_v6 }
0x36e3   :  { %6215 = vmatpush3.msra.mxu1 %v5177_v19 }
0x36e4   :  { %6216 = vmatprep.subr.mxu1 %v6494_v6 }
0x36e5   :  { %6217 = vmatpush3.msra.mxu1 %v5176_v23 }
0x36e6   :  { %6219 = vmatmul.mubr.msk.f32.vlgmr.msra.gmra.mxu1 %vm483_vm3, %v5173_v24 }
0x36e7   :  { %6221 = vmatprep.mubr.msk.f32.mxu1 %vm6495_vm2, %v6494_v6 }
0x36ea   :  { %6222 = vmatmul.mubr.msk.f32.gmra.mxu1 %vm483_vm3, %v5174_v27 }
0x36eb   :  { %6224 = vmatprep.mubr.msk.f32.mxu1 %vm6495_vm2, %v6494_v6  ;;  %v5461_v6 = vld [vmem:[%s7788_s12 + $0x16] sm:$0x3] }
0x379e   :  { %v5041_v29 = vpop.f32.mrf.mxu1 }
0x379f   :  { %v5042_v46 = vadd.f32 %v7554_v35, %v5041_v29  ;;  %v4874_v35 = vsub.f32 %v5461_v6, %v7659_v38 }
0x37a0   :  { %v6198_v28 = vpop.f32.mrf.mxu1 }
0x37a1   :  { %v5045_v56 = vsel %vm2629_vm5, %v5042_v46, 0.0 }
0x37a2   :  { %5046 = vadd.xlane.f32.xlu0 %v5045_v56 }
0x37a6   :  { %v5262_v15 = vpop.f32.mrf.mxu1 }
0x37a7   :  { %v5263_v34 = vadd.f32 %v7714_v14, %v5262_v15 }
0x37a8   :  { %v6220_v32 = vpop.f32.mrf.mxu1 }
0x37a9   :  { %5276 = vst.msk [vmem:[%s6682_s20] sm:$0xff] %vm179_vm1, %v5263_v34 }
0x37aa   :  { %v5267_v47 = vpop.f32.mrf.mxu1 }
0x37ab   :  { %v5268_v33 = vadd.f32 %v7714_v14, %v5267_v47 }
0x37ac   :  { %v6223_v30 = vpop.f32.mrf.mxu1 }
0x37ad   :  { %5277 = vst.msk [vmem:[%s6682_s20 + $0x8] sm:$0xff] %vm179_vm1, %v5268_v33 }
0x37b8   :  { %5064 = vperm.xlu0 %6270, %v4874_v35  }
0x382b   :  { %v5047_v36 = vpop.xlane.xlu0 %5046 }
0x382c   :  { %v5048_v43 = vmul.f32 0.125, %v5047_v36 }
0x382e   :  { %v5049_v1 = vsub.f32 %v5042_v46, %v5048_v43 }
0x3830   :  { %v5050_v26 = vmul.f32 %v5049_v1, %v5049_v1 }
0x3832   :  { %v5051_v41 = vsel %vm2629_vm5, %v5050_v26, 0.0 }
0x3833   :  { %5052 = vadd.xlane.f32.xlu1 %v5051_v41  ;;  %v5065_v49 = vpop.permute.xlu0 %5064 }
0x38bc   :  { %v5053_v42 = vpop.xlane.xlu1 %5052 }
0x38bd   :  { %v5054_v44 = vmul.f32 0.125, %v5053_v42 }
0x38bf   :  { %v5055_v45 = vadd.f32 1e-05, %v5054_v44 }
0x38c1   :  { %6398 = vrsqrt.f32 %v5055_v45 }
0x38ce   :  { %v6399_v17 = vpop.eup %6398 }
0x38cf   :  { %v5057_v16 = vmul.f32 %v6399_v17, %v5049_v1 }
0x38d1   :  { %v5058_v21 = vmul.f32 %v7566_v54, %v5057_v16 }
0x38d3   :  { %v5059_v38 = vadd.f32 %v7570_v13, %v5058_v21 }
0x38d5   :  { %v5060_v48 = vmul.f32 0.1, %v5059_v38 }
0x38d7   :  { %v5061_v0 = vmax.f32 %v5059_v38, %v5060_v48 }
0x38d9   :  { %v5067_v50 = vmul.f32 %v5065_v49, %v5061_v0 }
0x38db   :  { %v5068_v52 = vadd.f32 %v5067_v50, %v7665_v39 }
0x38dd   :  { %5069 = vst.msk [vmem:[%s6687_s27 + $0x16] sm:$0x3] %vm2629_vm5, %v5068_v52 }
0x38e4   :  { %v5072_v59 = vld [vmem:[%s6687_s27 + $0x10] sm:$0xff] }
0x38e5   :  { %6208 = vmatmul.mubr.msk.f32.gmra.mxu0 %vm2652_vm4, %v5072_v59 }
0x39a5   :  { %v5166_v37 = vpop.f32.mrf.mxu0 }
0x39a6   :  { %v5167_v55 = vadd.f32 %v7689_v60, %v5166_v37 }
0x39a7   :  { %v6209_v57 = vpop.f32.mrf.mxu0 }
0x39a8   :  { %v5172_v40 = vmul.f32 0.1, %v5167_v55 }
0x39aa   :  { %v5175_v51 = vmax.f32 %v5167_v55, %v5172_v40 }
0x39ac   :  { %6225 = vmatmul.mubr.msk.f32.gmra.mxu1 %vm483_vm3, %v5175_v51 }
0x39ad   :  { %6423 = shalt.err (!%p6420_p4)
}
0x39ae   :  { %5292 = dma.vmem_to_hbm [thread:$0]  %s5290_s1, 32, %s6692_s4, [#allocation3]  }
0x39af   :  { %s6432_s27 = scalar_lea.vmem %s5300_s7, 32  ;;  %p6437_p6 = scmp.lt.s32.totalorder %s5300_s7, %s5300_s7 }
0x39b0   :  { %p6433_p5 = scmp.ne.s32.totalorder %s5300_s7, %s6432_s27  ;;  %p6438_p7 = scmp.lt.s32.totalorder %s6432_s27, %s6432_s27 }
0x39b2   :  { %p6439_p8 = por %p6438_p7, %p6437_p6 }
0x39b4   :  { %p6440_p9 = pnand %p6439_p8, %p6433_p5 }
0x39b6   :  { %6443 = shalt.err (!%p6440_p9)
}
0x39b7   :  { %5302 = dma.vmem_to_hbm [thread:$0]  %s5300_s7, 32, %s6697_s13, [#allocation5]  }
0x3a6c   :  { %v5272_v54 = vpop.f32.mrf.mxu1 }
0x3a6d   :  { %v5273_v13 = vadd.f32 %v7714_v14, %v5272_v54 }
0x3a6e   :  { %v6226_v39 = vpop.f32.mrf.mxu1 }
0x3a6f   :  { %5278 = vst.msk [vmem:[%s6682_s20 + $0x10] sm:$0xff] %vm179_vm1, %v5273_v13 }
0x3a70   :  { %6452 = dma.done.wait [#allocation3], 32  }
0x3a71   :  { %6453 = vsyncadd [#allocation3], 4294967264 }
0x3a72   :  { %6454 = dma.done.wait [#allocation5], 32  }
0x3a73   :  { %6455 = vsyncadd [#allocation5], 4294967264 }
0x3a74   :  { %5313 = vsyncpa [#allocation3], 1 }
0x3a75   :  { %5314 = vsyncpa [#allocation5], 1 }

</bundles_post_ra>
